<compile_context>
chip_gen: v7x
topology: tpu7x:2x2x1
jax: 0.10.0
libtpu: 0.0.40
codegen_flags: <defaults>
</compile_context>

<pallas_src>
import numpy as np
import jax
import jax.numpy as jnp
from jax import lax
from jax.experimental import pallas as pl
from jax.experimental.pallas import tpu as pltpu

EPS_VN = 1e-6     # TODO(synk): EPS of VNLeakyReLU assumed from ResGen invariant.py
LEAKY_SCA = 0.01  # nn.LeakyReLU default slope (GVPerceptronVN scalar activation)
LEAKY_VN = 0.2    # VNLeakyReLU negative_slope


def _vmem_limit_bytes():
    # v5e/v6e: 128 MiB physical VMEM, v7x: 64 MiB; keep ~16 MiB headroom for I/O + compiler.
    try:
        cap = int(pltpu.get_tpu_info().vmem_capacity_bytes)
    except Exception:
        cap = 64 * 1024 * 1024
    return int(max(32 * 1024 * 1024, min(cap - 16 * 1024 * 1024, 112 * 1024 * 1024)))


def _preprocess_params(params):
    """Fuse heads sharing an LHS and pre-cast all matmul weights to bf16."""
    bf16, f32 = jnp.bfloat16, jnp.float32
    kp = {}
    for pre in ("nm", "em", "mo", "rc", "ao"):
        for suf in ("_Wlv", "_Wlv2", "_Wg", "_Wls_v"):
            kp[pre + suf] = params[pre + suf].astype(bf16)
        kp[pre + "_bg"] = params[pre + "_bg"].astype(f32)
    for pre in ("nm", "mo", "rc", "ao"):
        kp[pre + "_Wls_s"] = params[pre + "_Wls_s"].astype(bf16)
    kp["em_Wls_g"] = params["em_Wls_g"].astype(bf16)
    kp["em_Wls_f"] = params["em_Wls_f"].astype(bf16)
    kp["ao_Wdir"] = params["ao_Wdir"].astype(bf16)
    kp["Wevn"] = params["Wevn"].astype(bf16)
    # weights consumed elementwise stay f32
    kp["W_em"] = params["W_em"].astype(f32)
    kp["Wattn_d"] = params["Wattn_d"].astype(f32)
    # fused node scalar heads: [attn_a(+battn) | attn_b | node_net | node_sca_net]
    kp["W_scahead"] = jnp.concatenate(
        [params["Wattn_a"], params["Wattn_b"], params["Wnn"], params["Wnsn"]],
        axis=1).astype(bf16)
    kp["b_scahead"] = jnp.concatenate(
        [params["battn"], jnp.zeros_like(params["battn"]), params["bnn"], params["bnsn"]],
        axis=1).astype(f32)
    # fused node vector heads: [node_vec_net | vec_attn_net]
    kp["W_vechead"] = jnp.concatenate([params["Wnvn"], params["Wvattn"]], axis=1).astype(bf16)
    # fused edge scalar heads: [edge_net | edge_sca_net]
    kp["W_edgehead"] = jnp.concatenate([params["Wen"], params["Wesn"]], axis=1).astype(bf16)
    kp["b_edgehead"] = jnp.concatenate([params["ben"], params["besn"]], axis=1).astype(f32)
    return kp


# ---------------------------------------------------------------------------
# forward wrapper
# ---------------------------------------------------------------------------
def geoattn_forward(params, node_sca, node_vec, node_pos, edge_feature, edge_index,
                    cutoff=10.0):
    f32 = jnp.float32

    N, ds = node_sca.shape
    dv = node_vec.shape[1]
    E, net = edge_feature.shape
    de = params["W_em"].shape[1]
    num_g = de - net
    H = params["Wnn"].shape[1]
    OS, OV = params["mo_Wg"].shape

    assert ds == OS and dv == OV, "residual connection requires node dims == out dims"
    assert N <= E, "reference double-indexing quirk requires num_nodes <= num_edges"
    assert num_g >= 2, "GaussianSmearing needs at least 2 gaussians"

    kp = _preprocess_params(params)
    names = list(kp.keys())

    row = edge_index[0].astype(jnp.int32)
    col = edge_index[1].astype(jnp.int32)
    # The reference double-indexes already row-gathered per-edge features with node indices;
    # this collapses to per-node gathers with composed indices row[row] / row[col].
    rr = jnp.take(row, row)
    rc = jnp.take(row, col)

    # stacked equivariant layout: (3R, C) with row blocks [x; y; z]
    nvec_stacked = jnp.concatenate(
        [node_vec[:, :, 0], node_vec[:, :, 1], node_vec[:, :, 2]], axis=0).astype(f32)

    def kernel(*refs):
        (row_s, rowc_ref, colc_ref, rrc_ref, rcc_ref, rowr_ref,
         nsca_ref, nvec_ref, pos_ref, efeat_ref) = refs[:10]
        p = dict(zip(names, refs[10:10 + len(names)]))
        out_sca_ref, out_vec_ref = refs[10 + len(names):12 + len(names)]
        aw_ref, segmax_ref = refs[12 + len(names):]

        def bdot(a, w_ref):
            # dense layer matmul: bf16 x bf16 with f32 accumulation on the MXU (lazy weight read)
            return jnp.dot(a.astype(jnp.bfloat16), w_ref[...],
                           preferred_element_type=jnp.float32)

        def odot(onehot, x):
            # one-hot gather / scatter-sum matmul in f32 (exact row select / segment sum)
            return jnp.dot(onehot, x, preferred_element_type=jnp.float32)

        def vsplit(s, r):
            return s[0:r], s[r:2 * r], s[2 * r:3 * r]

        def vtile(x):
            return jnp.concatenate([x, x, x], axis=0)

        def gv_linear(pre, sca_term, vec_stacked, r):
            # GVLinear with a concat-free scalar path (pre-split scalar weights)
            vi = bdot(vec_stacked, p[pre + "_Wlv"])                 # (3r, hid)
            vx, vy, vz = vsplit(vi, r)
            vnorm = jnp.sqrt(vx * vx + vy * vy + vz * vz)           # (r, hid)
            out_s = bdot(vnorm, p[pre + "_Wls_v"]) + sca_term       # (r, out_s)
            out_v = bdot(vi, p[pre + "_Wlv2"])                      # (3r, out_v)
            gate = jax.nn.sigmoid(bdot(out_s, p[pre + "_Wg"]) + p[pre + "_bg"][...])
            return out_s, out_v * vtile(gate)

        # ---- one-hot index matrices (built once from int columns) ----------------
        lane_n = lax.broadcasted_iota(jnp.int32, (E, N), 1)
        oh_rr = (lane_n == rrc_ref[...]).astype(jnp.float32)        # (E, N) gather row[row]
        oh_rc = (lane_n == rcc_ref[...]).astype(jnp.float32)        # (E, N) gather row[col]
        oh_row = (lane_n == rowc_ref[...]).astype(jnp.float32)      # (E, N) gather row
        oh_col = (lane_n == colc_ref[...]).astype(jnp.float32)      # (E, N) gather col
        oh_row_t = (lax.broadcasted_iota(jnp.int32, (N, E), 0)
                    == rowr_ref[...]).astype(jnp.float32)           # (N, E) scatter-sum by row

        n_sca = nsca_ref[...]                                       # (N, ds)
        n_vec = nvec_ref[...]                                       # (3N, dv)

        # ---- per-node precompute (all node-side linears applied once per node) ----
        ns, nvs = gv_linear("nm", bdot(n_sca, p["nm_Wls_s"]), n_vec, N)
        sh = bdot(ns, p["W_scahead"]) + p["b_scahead"][...]         # (N, 4H)
        vh = bdot(nvs, p["W_vechead"])                              # (3N, 2H) [nvn | va]
        vhx, vhy, vhz = vsplit(vh, N)

        rhs_rr = jnp.concatenate([sh, vhx, vhy, vhz], axis=1)       # (N, 10H)
        rhs_rc = jnp.concatenate([sh[:, H:2 * H], vhx[:, H:2 * H],
                                  vhy[:, H:2 * H], vhz[:, H:2 * H]], axis=1)   # (N, 4H)

        # ---- gathers as one-hot matmuls (MXU; no per-edge copy loops) -------------
        g_rr = odot(oh_rr, rhs_rr)                                  # (E, 10H)
        g_rc = odot(oh_rc, rhs_rc)                                  # (E, 4H)

        nswa_rr = g_rr[:, 0:H]
        nn_rr = g_rr[:, 2 * H:3 * H]
        nsn_rr = g_rr[:, 3 * H:4 * H]
        nvn_rr_x, va_rr_x = g_rr[:, 4 * H:5 * H], g_rr[:, 5 * H:6 * H]
        nvn_rr_y, va_rr_y = g_rr[:, 6 * H:7 * H], g_rr[:, 7 * H:8 * H]
        nvn_rr_z, va_rr_z = g_rr[:, 8 * H:9 * H], g_rr[:, 9 * H:10 * H]
        nswb_rc = g_rc[:, 0:H]
        va_rc_x = g_rc[:, H:2 * H]
        va_rc_y = g_rc[:, 2 * H:3 * H]
        va_rc_z = g_rc[:, 3 * H:4 * H]

        # ---- edge geometry ---------------------------------------------------------
        evec = odot(oh_row - oh_col, pos_ref[...])                  # (E, 3) = pos[row]-pos[col]
        evx, evy, evz = evec[:, 0:1], evec[:, 1:2], evec[:, 2:3]
        edge_dist = jnp.sqrt(evx * evx + evy * evy + evz * evz)     # (E, 1)
        inv_d = 1.0 / (edge_dist + 1e-7)                            # exact division

        # GaussianSmearing(start=0, stop=cutoff, num_gaussians=num_g)
        stepg = cutoff / (num_g - 1)
        coeff = -0.5 / (stepg * stepg)
        offs = lax.broadcasted_iota(jnp.int32, (1, num_g), 1).astype(jnp.float32) * stepg
        dm = edge_dist - offs
        d_gauss = jnp.exp(coeff * dm * dm)                          # (E, num_g)

        # EdgeMapping: normalized edge vector (outer product with W_em), stacked layout
        ev_st = jnp.concatenate([evx, evy, evz], axis=0)            # (3E, 1)
        edge_vec0 = (ev_st * vtile(inv_d)) * p["W_em"][...]         # (3E, de)

        # edge_mapper GVLinear (scalar input split: gaussians | edge types)
        e_sca, e_vec = gv_linear(
            "em", bdot(d_gauss, p["em_Wls_g"]) + bdot(efeat_ref[...], p["em_Wls_f"]),
            edge_vec0, E)                                           # (E, ds), (3E, dv)

        # ---- scalar attention logits (bias folded into the rr block) ---------------
        alpha = nswa_rr + nswb_rc + edge_dist * p["Wattn_d"][...]   # (E, H)
        aw_ref[...] = alpha

        # ---- scatter_softmax over edge_index_row -----------------------------------
        # per-segment max: the single remaining sequential pass (no matmul form for scatter-max)
        segmax_ref[...] = jnp.full((N, H), -1e30, dtype=jnp.float32)

        @pl.loop(0, E)
        def _(e):
            r = row_s[e]
            segmax_ref[pl.ds(r, 1), :] = jnp.maximum(segmax_ref[pl.ds(r, 1), :],
                                                     aw_ref[pl.ds(e, 1), :])

        seg_max_e = odot(oh_row, segmax_ref[...])                   # (E, H) gathered segment max
        exp_aw = jnp.exp(alpha - seg_max_e)                         # (E, H)
        segsum = odot(oh_row_t, exp_aw)                             # (N, H) scatter-sum (MXU)
        inv_segsum = 1.0 / (segsum + 1e-16)                         # exact, hoisted per node
        alpha_soft = exp_aw * odot(oh_row, inv_segsum)              # (E, H)

        # ---- vector attention --------------------------------------------------------
        alpha_vec = jax.nn.sigmoid(jnp.sum(
            va_rr_x * va_rc_x + va_rr_y * va_rc_y + va_rr_z * va_rc_z,
            axis=-1, keepdims=True))                                # (E, 1)

        # ---- messages (per xyz component; no vtile copies on the per-edge hot path) --
        eh = bdot(e_sca, p["W_edgehead"]) + p["b_edgehead"][...]    # (E, 2H) [en | esn]
        en_e, esn_e = eh[:, 0:H], eh[:, H:2 * H]
        evn_e = bdot(e_vec, p["Wevn"])                              # (3E, H)
        evn_x, evn_y, evn_z = vsplit(evn_e, E)

        msg_sca = nn_rr * en_e * alpha_soft                         # (E, H)
        msg_vec = jnp.concatenate(
            [(nsn_rr * evn_x + nvn_rr_x * esn_e) * alpha_vec,
             (nsn_rr * evn_y + nvn_rr_y * esn_e) * alpha_vec,
             (nsn_rr * evn_z + nvn_rr_z * esn_e) * alpha_vec], axis=0)   # (3E, H)

        m_sca, m_vec = gv_linear("mo", bdot(msg_sca, p["mo_Wls_s"]), msg_vec, E)
        mvx, mvy, mvz = vsplit(m_vec, E)

        # ---- scatter_sum aggregation as one one-hot matmul ----------------------------
        mslab = jnp.concatenate([m_sca, mvx, mvy, mvz], axis=1)     # (E, OS+3OV)
        agg = odot(oh_row_t, mslab)                                 # (N, OS+3OV)
        agg_sca = agg[:, 0:OS]
        agg_vec = jnp.concatenate([agg[:, OS:OS + OV],
                                   agg[:, OS + OV:OS + 2 * OV],
                                   agg[:, OS + 2 * OV:OS + 3 * OV]], axis=0)   # (3N, OV)

        # ---- residual + aggr_out (GVPerceptronVN) --------------------------------------
        resi_sca, resi_vec = gv_linear("rc", bdot(n_sca, p["rc_Wls_s"]), n_vec, N)
        out_sca0 = resi_sca + agg_sca
        out_vec0 = resi_vec + agg_vec

        o_sca, o_vec = gv_linear("ao", bdot(out_sca0, p["ao_Wls_s"]), out_vec0, N)

        # VNLeakyReLU (vector activation) + LeakyReLU (scalar activation)
        dvec = bdot(o_vec, p["ao_Wdir"])                            # (3N, OV)
        vx, vy, vz = vsplit(o_vec, N)
        dx, dy, dz = vsplit(dvec, N)
        dotp = vx * dx + vy * dy + vz * dz                          # (N, OV)
        dns = dx * dx + dy * dy + dz * dz
        coef = dotp / (dns + EPS_VN)                                # exact division
        keep = dotp >= 0.0

        def vn_act(v, dc):
            inner = jnp.where(keep, v, v - coef * dc)
            return LEAKY_VN * v + (1.0 - LEAKY_VN) * inner

        out_sca_ref[...] = jnp.where(o_sca >= 0.0, o_sca, LEAKY_SCA * o_sca)
        out_vec_ref[...] = jnp.concatenate(
            [vn_act(vx, dx), vn_act(vy, dy), vn_act(vz, dz)], axis=0)   # (3N, OV)

    data = [row,                                      # (E,)  SMEM  (segmax loop indices)
            row.reshape(E, 1), col.reshape(E, 1),     # (E,1) VMEM  (one-hot gathers)
            rr.reshape(E, 1), rc.reshape(E, 1),
            row.reshape(1, E),                        # (1,E) VMEM  (one-hot scatter)
            node_sca.astype(f32), nvec_stacked, node_pos.astype(f32),
            edge_feature.astype(f32)]
    weights = [kp[k] for k in names]

    in_specs = ([pl.BlockSpec(memory_space=pltpu.MemorySpace.SMEM)]
                + [pl.BlockSpec(memory_space=pltpu.MemorySpace.VMEM)] * (9 + len(names)))

    out_sca, out_vec_st = pl.pallas_call(
        kernel,
        out_shape=(jax.ShapeDtypeStruct((N, OS), f32),
                   jax.ShapeDtypeStruct((3 * N, OV), f32)),
        in_specs=in_specs,
        out_specs=(pl.BlockSpec(memory_space=pltpu.MemorySpace.VMEM),
                   pl.BlockSpec(memory_space=pltpu.MemorySpace.VMEM)),
        scratch_shapes=[
            pltpu.VMEM((E, H), f32),     # attention logits (read by the segmax loop)
            pltpu.VMEM((N, H), f32),     # per-segment max accumulator
        ],
        compiler_params=pltpu.CompilerParams(vmem_limit_bytes=_vmem_limit_bytes()),
    )(*(data + weights))

    out_vec = jnp.stack([out_vec_st[0:N], out_vec_st[N:2 * N], out_vec_st[2 * N:3 * N]],
                        axis=-1)                                     # (N, OV, 3)
    return out_sca, out_vec


# ---------------------------------------------------------------------------
# deterministic synthetic parameter init (weights stored as (in, out), pre-split
# wherever the kernel uses concat-free partial dots)
# ---------------------------------------------------------------------------
def init_params(key, ds, dv, num_edge_types, de, hd, os_, ov):
    ks = iter(jax.random.split(key, 80))

    def w(in_f, out_f):
        return jax.random.normal(next(ks), (in_f, out_f), dtype=jnp.float32) / np.sqrt(in_f)

    def b(out_f):
        return 0.01 * jax.random.normal(next(ks), (1, out_f), dtype=jnp.float32)

    num_g = de - num_edge_types
    p = {}
    p["W_em"] = jax.random.normal(next(ks), (1, de), dtype=jnp.float32)   # EdgeMapping Linear(1, de)

    def gv(prefix, in_s, in_v, out_s, out_v):
        hid = max(in_v, out_v)
        p[f"{prefix}_Wlv"] = w(in_v, hid)
        p[f"{prefix}_Wlv2"] = w(hid, out_v)
        p[f"{prefix}_Wg"] = w(out_s, out_v)
        p[f"{prefix}_bg"] = b(out_v)
        p[f"{prefix}_Wls_v"] = w(hid, out_s)       # lin_scalar rows for the vector-norm part
        p[f"{prefix}_Wls_s"] = w(in_s, out_s)      # lin_scalar rows for the scalar part

    gv("nm", ds, dv, ds, dv)                       # node_mapper
    gv("em", de, de, ds, dv)                       # edge_mapper
    w_es = p.pop("em_Wls_s")                       # split scalar weight: [gaussians | edge types]
    p["em_Wls_g"] = w_es[:num_g]
    p["em_Wls_f"] = w_es[num_g:]

    for nm_, in_f in (("en", ds), ("nn", ds), ("esn", ds), ("nsn", ds)):
        p[f"W{nm_}"] = w(in_f, hd)
        p[f"b{nm_}"] = b(hd)
    p["Wevn"] = w(dv, hd)                          # VNLinear (bias-free)
    p["Wnvn"] = w(dv, hd)
    p["Wvattn"] = w(dv, hd)
    p["Wattn_a"] = w(ds, hd)                       # sca_attn_net Linear(2*ds+1, hd), pre-split
    p["Wattn_b"] = w(ds, hd)
    p["Wattn_d"] = w(1, hd)
    p["battn"] = b(hd)

    gv("mo", hd, hd, os_, ov)                      # msg_out
    gv("rc", ds, dv, ds, dv)                       # resi_connecter
    gv("ao", os_, ov, os_, ov)                     # aggr_out GVLinear
    p["ao_Wdir"] = w(ov, ov)                       # aggr_out VNLeakyReLU.map_to_dir (bias-free)
    return p


if __name__ == "__main__":
    # small shapes consistent with the module (scaled-down hyperparameters)
    N, E = 16, 32                         # num nodes, num edges (N <= E required by the
                                          # double-indexing quirk in the reference forward)
    DS, DV = 32, 8                        # node scalar / vector dims (== out dims, residual)
    NET, DE = 4, 16                       # num_edge_types, edge_dim
    H, OS, OV = 16, 32, 8                 # hid_dim, out_sca_dim, out_vec_dim
    CUTOFF = 10.0

    key = jax.random.PRNGKey(0)
    kp, k1, k2, k3, k4, k5, k6 = jax.random.split(key, 7)

    params = init_params(kp, DS, DV, NET, DE, H, OS, OV)

    node_sca = jax.random.normal(k1, (N, DS), dtype=jnp.float32)
    node_vec = jax.random.normal(k2, (N, DV, 3), dtype=jnp.float32)
    node_pos = 3.0 * jax.random.normal(k3, (N, 3), dtype=jnp.float32)
    edge_feature = jax.random.normal(k4, (E, NET), dtype=jnp.float32)
    row = jax.random.randint(k5, (E,), 0, N)
    col = jax.random.randint(k6, (E,), 0, N)
    edge_index = jnp.stack([row, col], axis=0)

    out_sca, out_vec = geoattn_forward(params, node_sca, node_vec, node_pos,
                                       edge_feature, edge_index, cutoff=CUTOFF)
    jax.block_until_ready((out_sca, out_vec))

    assert out_sca.shape == (N, OS) and out_vec.shape == (N, OV, 3)
    assert bool(jnp.all(jnp.isfinite(out_sca))) and bool(jnp.all(jnp.isfinite(out_vec)))
    print("KERNEL_OK")
</pallas_src>

<mosaic_0001>
module attributes {stable_mosaic.version = 11 : i64} {
  func.func @kernel(%arg0: memref<32xi32, #tpu.memory_space<smem>>, %arg1: memref<32x1xi32, #tpu.memory_space<vmem>>, %arg2: memref<32x1xi32, #tpu.memory_space<vmem>>, %arg3: memref<32x1xi32, #tpu.memory_space<vmem>>, %arg4: memref<32x1xi32, #tpu.memory_space<vmem>>, %arg5: memref<1x32xi32, #tpu.memory_space<vmem>>, %arg6: memref<16x32xf32, #tpu.memory_space<vmem>>, %arg7: memref<48x8xf32, #tpu.memory_space<vmem>>, %arg8: memref<16x3xf32, #tpu.memory_space<vmem>>, %arg9: memref<32x4xf32, #tpu.memory_space<vmem>>, %arg10: memref<8x8xbf16, #tpu.memory_space<vmem>>, %arg11: memref<8x8xbf16, #tpu.memory_space<vmem>>, %arg12: memref<32x8xbf16, #tpu.memory_space<vmem>>, %arg13: memref<8x32xbf16, #tpu.memory_space<vmem>>, %arg14: memref<1x8xf32, #tpu.memory_space<vmem>>, %arg15: memref<16x16xbf16, #tpu.memory_space<vmem>>, %arg16: memref<16x8xbf16, #tpu.memory_space<vmem>>, %arg17: memref<32x8xbf16, #tpu.memory_space<vmem>>, %arg18: memref<16x32xbf16, #tpu.memory_space<vmem>>, %arg19: memref<1x8xf32, #tpu.memory_space<vmem>>, %arg20: memref<16x16xbf16, #tpu.memory_space<vmem>>, %arg21: memref<16x8xbf16, #tpu.memory_space<vmem>>, %arg22: memref<32x8xbf16, #tpu.memory_space<vmem>>, %arg23: memref<16x32xbf16, #tpu.memory_space<vmem>>, %arg24: memref<1x8xf32, #tpu.memory_space<vmem>>, %arg25: memref<8x8xbf16, #tpu.memory_space<vmem>>, %arg26: memref<8x8xbf16, #tpu.memory_space<vmem>>, %arg27: memref<32x8xbf16, #tpu.memory_space<vmem>>, %arg28: memref<8x32xbf16, #tpu.memory_space<vmem>>, %arg29: memref<1x8xf32, #tpu.memory_space<vmem>>, %arg30: memref<8x8xbf16, #tpu.memory_space<vmem>>, %arg31: memref<8x8xbf16, #tpu.memory_space<vmem>>, %arg32: memref<32x8xbf16, #tpu.memory_space<vmem>>, %arg33: memref<8x32xbf16, #tpu.memory_space<vmem>>, %arg34: memref<1x8xf32, #tpu.memory_space<vmem>>, %arg35: memref<32x32xbf16, #tpu.memory_space<vmem>>, %arg36: memref<16x32xbf16, #tpu.memory_space<vmem>>, %arg37: memref<32x32xbf16, #tpu.memory_space<vmem>>, %arg38: memref<32x32xbf16, #tpu.memory_space<vmem>>, %arg39: memref<12x32xbf16, #tpu.memory_space<vmem>>, %arg40: memref<4x32xbf16, #tpu.memory_space<vmem>>, %arg41: memref<8x8xbf16, #tpu.memory_space<vmem>>, %arg42: memref<8x16xbf16, #tpu.memory_space<vmem>>, %arg43: memref<1x16xf32, #tpu.memory_space<vmem>>, %arg44: memref<1x16xf32, #tpu.memory_space<vmem>>, %arg45: memref<32x64xbf16, #tpu.memory_space<vmem>>, %arg46: memref<1x64xf32, #tpu.memory_space<vmem>>, %arg47: memref<8x32xbf16, #tpu.memory_space<vmem>>, %arg48: memref<32x32xbf16, #tpu.memory_space<vmem>>, %arg49: memref<1x32xf32, #tpu.memory_space<vmem>>, %arg50: memref<16x32xf32, #tpu.memory_space<vmem>>, %arg51: memref<48x8xf32, #tpu.memory_space<vmem>>, %arg52: memref<32x16xf32, #tpu.memory_space<vmem>>, %arg53: memref<16x16xf32, #tpu.memory_space<vmem>>) attributes {dimension_semantics = [], scalar_prefetch = 0 : i64, scratch_operands = 2 : i64, tpu.core_type = #tpu.core_type<tc>} {
    %0 = tpu.iota {dimensions = array<i32: 1>} : vector<32x16xi32>
    %c0 = arith.constant 0 : index
    %c0_0 = arith.constant 0 : index
    %1 = vector.load %arg3[%c0, %c0_0] : memref<32x1xi32, #tpu.memory_space<vmem>>, vector<32x1xi32>
    %2 = vector.broadcast %1 : vector<32x1xi32> to vector<32x16xi32>
    %3 = arith.cmpi eq, %0, %2 : vector<32x16xi32>
    %4 = arith.extui %3 : vector<32x16xi1> to vector<32x16xi32>
    %5 = arith.sitofp %4 : vector<32x16xi32> to vector<32x16xf32>
    %c0_1 = arith.constant 0 : index
    %c0_2 = arith.constant 0 : index
    %6 = vector.load %arg4[%c0_1, %c0_2] : memref<32x1xi32, #tpu.memory_space<vmem>>, vector<32x1xi32>
    %7 = vector.broadcast %6 : vector<32x1xi32> to vector<32x16xi32>
    %8 = arith.cmpi eq, %0, %7 : vector<32x16xi32>
    %9 = arith.extui %8 : vector<32x16xi1> to vector<32x16xi32>
    %10 = arith.sitofp %9 : vector<32x16xi32> to vector<32x16xf32>
    %c0_3 = arith.constant 0 : index
    %c0_4 = arith.constant 0 : index
    %11 = vector.load %arg1[%c0_3, %c0_4] : memref<32x1xi32, #tpu.memory_space<vmem>>, vector<32x1xi32>
    %12 = vector.broadcast %11 : vector<32x1xi32> to vector<32x16xi32>
    %13 = arith.cmpi eq, %0, %12 : vector<32x16xi32>
    %14 = arith.extui %13 : vector<32x16xi1> to vector<32x16xi32>
    %15 = arith.sitofp %14 : vector<32x16xi32> to vector<32x16xf32>
    %c0_5 = arith.constant 0 : index
    %c0_6 = arith.constant 0 : index
    %16 = vector.load %arg2[%c0_5, %c0_6] : memref<32x1xi32, #tpu.memory_space<vmem>>, vector<32x1xi32>
    %17 = vector.broadcast %16 : vector<32x1xi32> to vector<32x16xi32>
    %18 = arith.cmpi eq, %0, %17 : vector<32x16xi32>
    %19 = arith.extui %18 : vector<32x16xi1> to vector<32x16xi32>
    %20 = arith.sitofp %19 : vector<32x16xi32> to vector<32x16xf32>
    %21 = tpu.iota {dimensions = array<i32: 0>} : vector<16x32xi32>
    %c0_7 = arith.constant 0 : index
    %c0_8 = arith.constant 0 : index
    %22 = vector.load %arg5[%c0_7, %c0_8] : memref<1x32xi32, #tpu.memory_space<vmem>>, vector<1x32xi32>
    %23 = vector.broadcast %22 : vector<1x32xi32> to vector<16x32xi32>
    %24 = arith.cmpi eq, %21, %23 : vector<16x32xi32>
    %25 = arith.extui %24 : vector<16x32xi1> to vector<16x32xi32>
    %26 = arith.sitofp %25 : vector<16x32xi32> to vector<16x32xf32>
    %c0_9 = arith.constant 0 : index
    %c0_10 = arith.constant 0 : index
    %27 = vector.load %arg6[%c0_9, %c0_10] : memref<16x32xf32, #tpu.memory_space<vmem>>, vector<16x32xf32>
    %c0_11 = arith.constant 0 : index
    %c0_12 = arith.constant 0 : index
    %28 = vector.load %arg7[%c0_11, %c0_12] : memref<48x8xf32, #tpu.memory_space<vmem>>, vector<48x8xf32>
    %29 = arith.truncf %27 : vector<16x32xf32> to vector<16x32xbf16>
    %c0_13 = arith.constant 0 : index
    %c0_14 = arith.constant 0 : index
    %30 = vector.load %arg35[%c0_13, %c0_14] : memref<32x32xbf16, #tpu.memory_space<vmem>>, vector<32x32xbf16>
    %cst = arith.constant dense<0.000000e+00> : vector<16x32xf32>
    %31 = tpu.matmul %29, %30, %cst {dimension_numbers = #tpu.dot_dimension_numbers<[1], [0], [0], [1], [0, 0, 1, 1], [], []>} : vector<16x32xbf16>, vector<32x32xbf16>, vector<16x32xf32> -> vector<16x32xf32>
    %32 = arith.truncf %28 : vector<48x8xf32> to vector<48x8xbf16>
    %c0_15 = arith.constant 0 : index
    %c0_16 = arith.constant 0 : index
    %33 = vector.load %arg10[%c0_15, %c0_16] : memref<8x8xbf16, #tpu.memory_space<vmem>>, vector<8x8xbf16>
    %cst_17 = arith.constant dense<0.000000e+00> : vector<48x8xf32>
    %34 = tpu.matmul %32, %33, %cst_17 {dimension_numbers = #tpu.dot_dimension_numbers<[1], [0], [0], [1], [0, 0, 1, 1], [], []>} : vector<48x8xbf16>, vector<8x8xbf16>, vector<48x8xf32> -> vector<48x8xf32>
    %35 = vector.extract_strided_slice %34 {offsets = [0, 0], sizes = [16, 8], strides = [1, 1]} : vector<48x8xf32> to vector<16x8xf32>
    %36 = vector.extract_strided_slice %34 {offsets = [16, 0], sizes = [16, 8], strides = [1, 1]} : vector<48x8xf32> to vector<16x8xf32>
    %37 = vector.extract_strided_slice %34 {offsets = [32, 0], sizes = [16, 8], strides = [1, 1]} : vector<48x8xf32> to vector<16x8xf32>
    %38 = arith.mulf %35, %35 : vector<16x8xf32>
    %39 = arith.mulf %36, %36 : vector<16x8xf32>
    %40 = arith.addf %38, %39 : vector<16x8xf32>
    %41 = arith.mulf %37, %37 : vector<16x8xf32>
    %42 = arith.addf %40, %41 : vector<16x8xf32>
    %43 = math.sqrt %42 : vector<16x8xf32>
    %44 = arith.truncf %43 : vector<16x8xf32> to vector<16x8xbf16>
    %c0_18 = arith.constant 0 : index
    %c0_19 = arith.constant 0 : index
    %45 = vector.load %arg13[%c0_18, %c0_19] : memref<8x32xbf16, #tpu.memory_space<vmem>>, vector<8x32xbf16>
    %cst_20 = arith.constant dense<0.000000e+00> : vector<16x32xf32>
    %46 = tpu.matmul %44, %45, %cst_20 {dimension_numbers = #tpu.dot_dimension_numbers<[1], [0], [0], [1], [0, 0, 1, 1], [], []>} : vector<16x8xbf16>, vector<8x32xbf16>, vector<16x32xf32> -> vector<16x32xf32>
    %47 = arith.addf %46, %31 : vector<16x32xf32>
    %48 = arith.truncf %34 : vector<48x8xf32> to vector<48x8xbf16>
    %c0_21 = arith.constant 0 : index
    %c0_22 = arith.constant 0 : index
    %49 = vector.load %arg11[%c0_21, %c0_22] : memref<8x8xbf16, #tpu.memory_space<vmem>>, vector<8x8xbf16>
    %cst_23 = arith.constant dense<0.000000e+00> : vector<48x8xf32>
    %50 = tpu.matmul %48, %49, %cst_23 {dimension_numbers = #tpu.dot_dimension_numbers<[1], [0], [0], [1], [0, 0, 1, 1], [], []>} : vector<48x8xbf16>, vector<8x8xbf16>, vector<48x8xf32> -> vector<48x8xf32>
    %51 = arith.truncf %47 : vector<16x32xf32> to vector<16x32xbf16>
    %c0_24 = arith.constant 0 : index
    %c0_25 = arith.constant 0 : index
    %52 = vector.load %arg12[%c0_24, %c0_25] : memref<32x8xbf16, #tpu.memory_space<vmem>>, vector<32x8xbf16>
    %cst_26 = arith.constant dense<0.000000e+00> : vector<16x8xf32>
    %53 = tpu.matmul %51, %52, %cst_26 {dimension_numbers = #tpu.dot_dimension_numbers<[1], [0], [0], [1], [0, 0, 1, 1], [], []>} : vector<16x32xbf16>, vector<32x8xbf16>, vector<16x8xf32> -> vector<16x8xf32>
    %c0_27 = arith.constant 0 : index
    %c0_28 = arith.constant 0 : index
    %54 = vector.load %arg14[%c0_27, %c0_28] : memref<1x8xf32, #tpu.memory_space<vmem>>, vector<1x8xf32>
    %55 = vector.broadcast %54 : vector<1x8xf32> to vector<16x8xf32>
    %56 = arith.addf %53, %55 : vector<16x8xf32>
    %57 = arith.negf %56 : vector<16x8xf32>
    %58 = math.exp %57 : vector<16x8xf32>
    %cst_29 = arith.constant 1.000000e+00 : f32
    %59 = vector.broadcast %cst_29 : f32 to vector<16x8xf32>
    %60 = arith.addf %59, %58 : vector<16x8xf32>
    %61 = arith.divf %59, %60 : vector<16x8xf32>
    %62 = tpu.concatenate %61, %61, %61 in 0 : vector<16x8xf32>, vector<16x8xf32>, vector<16x8xf32> -> vector<48x8xf32>
    %63 = arith.mulf %50, %62 : vector<48x8xf32>
    %64 = arith.truncf %47 : vector<16x32xf32> to vector<16x32xbf16>
    %c0_30 = arith.constant 0 : index
    %c0_31 = arith.constant 0 : index
    %65 = vector.load %arg45[%c0_30, %c0_31] : memref<32x64xbf16, #tpu.memory_space<vmem>>, vector<32x64xbf16>
    %cst_32 = arith.constant dense<0.000000e+00> : vector<16x64xf32>
    %66 = tpu.matmul %64, %65, %cst_32 {dimension_numbers = #tpu.dot_dimension_numbers<[1], [0], [0], [1], [0, 0, 1, 1], [], []>} : vector<16x32xbf16>, vector<32x64xbf16>, vector<16x64xf32> -> vector<16x64xf32>
    %c0_33 = arith.constant 0 : index
    %c0_34 = arith.constant 0 : index
    %67 = vector.load %arg46[%c0_33, %c0_34] : memref<1x64xf32, #tpu.memory_space<vmem>>, vector<1x64xf32>
    %68 = vector.broadcast %67 : vector<1x64xf32> to vector<16x64xf32>
    %69 = arith.addf %66, %68 : vector<16x64xf32>
    %70 = arith.truncf %63 : vector<48x8xf32> to vector<48x8xbf16>
    %c0_35 = arith.constant 0 : index
    %c0_36 = arith.constant 0 : index
    %71 = vector.load %arg47[%c0_35, %c0_36] : memref<8x32xbf16, #tpu.memory_space<vmem>>, vector<8x32xbf16>
    %cst_37 = arith.constant dense<0.000000e+00> : vector<48x32xf32>
    %72 = tpu.matmul %70, %71, %cst_37 {dimension_numbers = #tpu.dot_dimension_numbers<[1], [0], [0], [1], [0, 0, 1, 1], [], []>} : vector<48x8xbf16>, vector<8x32xbf16>, vector<48x32xf32> -> vector<48x32xf32>
    %73 = vector.extract_strided_slice %72 {offsets = [0, 0], sizes = [16, 32], strides = [1, 1]} : vector<48x32xf32> to vector<16x32xf32>
    %74 = vector.extract_strided_slice %72 {offsets = [16, 0], sizes = [16, 32], strides = [1, 1]} : vector<48x32xf32> to vector<16x32xf32>
    %75 = vector.extract_strided_slice %72 {offsets = [32, 0], sizes = [16, 32], strides = [1, 1]} : vector<48x32xf32> to vector<16x32xf32>
    %76 = tpu.concatenate %69, %73, %74, %75 in 1 : vector<16x64xf32>, vector<16x32xf32>, vector<16x32xf32>, vector<16x32xf32> -> vector<16x160xf32>
    %77 = vector.extract_strided_slice %69 {offsets = [0, 16], sizes = [16, 16], strides = [1, 1]} : vector<16x64xf32> to vector<16x16xf32>
    %78 = vector.extract_strided_slice %73 {offsets = [0, 16], sizes = [16, 16], strides = [1, 1]} : vector<16x32xf32> to vector<16x16xf32>
    %79 = vector.extract_strided_slice %74 {offsets = [0, 16], sizes = [16, 16], strides = [1, 1]} : vector<16x32xf32> to vector<16x16xf32>
    %80 = vector.extract_strided_slice %75 {offsets = [0, 16], sizes = [16, 16], strides = [1, 1]} : vector<16x32xf32> to vector<16x16xf32>
    %81 = tpu.concatenate %77, %78, %79, %80 in 1 : vector<16x16xf32>, vector<16x16xf32>, vector<16x16xf32>, vector<16x16xf32> -> vector<16x64xf32>
    %cst_38 = arith.constant dense<0.000000e+00> : vector<32x160xf32>
    %82 = tpu.matmul %5, %76, %cst_38 {dimension_numbers = #tpu.dot_dimension_numbers<[1], [0], [0], [1], [0, 0, 1, 1], [], []>} : vector<32x16xf32>, vector<16x160xf32>, vector<32x160xf32> -> vector<32x160xf32>
    %cst_39 = arith.constant dense<0.000000e+00> : vector<32x64xf32>
    %83 = tpu.matmul %10, %81, %cst_39 {dimension_numbers = #tpu.dot_dimension_numbers<[1], [0], [0], [1], [0, 0, 1, 1], [], []>} : vector<32x16xf32>, vector<16x64xf32>, vector<32x64xf32> -> vector<32x64xf32>
    %84 = vector.extract_strided_slice %82 {offsets = [0, 0], sizes = [32, 16], strides = [1, 1]} : vector<32x160xf32> to vector<32x16xf32>
    %85 = vector.extract_strided_slice %82 {offsets = [0, 32], sizes = [32, 16], strides = [1, 1]} : vector<32x160xf32> to vector<32x16xf32>
    %86 = vector.extract_strided_slice %82 {offsets = [0, 48], sizes = [32, 16], strides = [1, 1]} : vector<32x160xf32> to vector<32x16xf32>
    %87 = vector.extract_strided_slice %82 {offsets = [0, 64], sizes = [32, 16], strides = [1, 1]} : vector<32x160xf32> to vector<32x16xf32>
    %88 = vector.extract_strided_slice %82 {offsets = [0, 80], sizes = [32, 16], strides = [1, 1]} : vector<32x160xf32> to vector<32x16xf32>
    %89 = vector.extract_strided_slice %82 {offsets = [0, 96], sizes = [32, 16], strides = [1, 1]} : vector<32x160xf32> to vector<32x16xf32>
    %90 = vector.extract_strided_slice %82 {offsets = [0, 112], sizes = [32, 16], strides = [1, 1]} : vector<32x160xf32> to vector<32x16xf32>
    %91 = vector.extract_strided_slice %82 {offsets = [0, 128], sizes = [32, 16], strides = [1, 1]} : vector<32x160xf32> to vector<32x16xf32>
    %92 = vector.extract_strided_slice %82 {offsets = [0, 144], sizes = [32, 16], strides = [1, 1]} : vector<32x160xf32> to vector<32x16xf32>
    %93 = vector.extract_strided_slice %83 {offsets = [0, 0], sizes = [32, 16], strides = [1, 1]} : vector<32x64xf32> to vector<32x16xf32>
    %94 = vector.extract_strided_slice %83 {offsets = [0, 16], sizes = [32, 16], strides = [1, 1]} : vector<32x64xf32> to vector<32x16xf32>
    %95 = vector.extract_strided_slice %83 {offsets = [0, 32], sizes = [32, 16], strides = [1, 1]} : vector<32x64xf32> to vector<32x16xf32>
    %96 = vector.extract_strided_slice %83 {offsets = [0, 48], sizes = [32, 16], strides = [1, 1]} : vector<32x64xf32> to vector<32x16xf32>
    %97 = arith.subf %15, %20 : vector<32x16xf32>
    %c0_40 = arith.constant 0 : index
    %c0_41 = arith.constant 0 : index
    %98 = vector.load %arg8[%c0_40, %c0_41] : memref<16x3xf32, #tpu.memory_space<vmem>>, vector<16x3xf32>
    %cst_42 = arith.constant dense<0.000000e+00> : vector<32x3xf32>
    %99 = tpu.matmul %97, %98, %cst_42 {dimension_numbers = #tpu.dot_dimension_numbers<[1], [0], [0], [1], [0, 0, 1, 1], [], []>} : vector<32x16xf32>, vector<16x3xf32>, vector<32x3xf32> -> vector<32x3xf32>
    %100 = vector.extract_strided_slice %99 {offsets = [0, 0], sizes = [32, 1], strides = [1, 1]} : vector<32x3xf32> to vector<32x1xf32>
    %101 = vector.extract_strided_slice %99 {offsets = [0, 1], sizes = [32, 1], strides = [1, 1]} : vector<32x3xf32> to vector<32x1xf32>
    %102 = vector.extract_strided_slice %99 {offsets = [0, 2], sizes = [32, 1], strides = [1, 1]} : vector<32x3xf32> to vector<32x1xf32>
    %103 = arith.mulf %100, %100 : vector<32x1xf32>
    %104 = arith.mulf %101, %101 : vector<32x1xf32>
    %105 = arith.addf %103, %104 : vector<32x1xf32>
    %106 = arith.mulf %102, %102 : vector<32x1xf32>
    %107 = arith.addf %105, %106 : vector<32x1xf32>
    %108 = math.sqrt %107 : vector<32x1xf32>
    %cst_43 = arith.constant 1.000000e-07 : f32
    %109 = vector.broadcast %cst_43 : f32 to vector<32x1xf32>
    %110 = arith.addf %108, %109 : vector<32x1xf32>
    %cst_44 = arith.constant 1.000000e+00 : f32
    %111 = vector.broadcast %cst_44 : f32 to vector<32x1xf32>
    %112 = arith.divf %111, %110 : vector<32x1xf32>
    %113 = tpu.iota {dimensions = array<i32: 1>} : vector<1x12xi32>
    %114 = arith.sitofp %113 : vector<1x12xi32> to vector<1x12xf32>
    %cst_45 = arith.constant 0.909090936 : f32
    %115 = vector.broadcast %cst_45 : f32 to vector<1x12xf32>
    %116 = arith.mulf %114, %115 : vector<1x12xf32>
    %117 = vector.broadcast %108 : vector<32x1xf32> to vector<32x12xf32>
    %118 = vector.broadcast %116 : vector<1x12xf32> to vector<32x12xf32>
    %119 = arith.subf %117, %118 : vector<32x12xf32>
    %cst_46 = arith.constant -6.050000e-01 : f32
    %120 = vector.broadcast %cst_46 : f32 to vector<32x12xf32>
    %121 = arith.mulf %120, %119 : vector<32x12xf32>
    %122 = arith.mulf %121, %119 : vector<32x12xf32>
    %123 = math.exp %122 : vector<32x12xf32>
    %124 = tpu.concatenate %100, %101, %102 in 0 : vector<32x1xf32>, vector<32x1xf32>, vector<32x1xf32> -> vector<96x1xf32>
    %125 = tpu.concatenate %112, %112, %112 in 0 : vector<32x1xf32>, vector<32x1xf32>, vector<32x1xf32> -> vector<96x1xf32>
    %126 = arith.mulf %124, %125 : vector<96x1xf32>
    %c0_47 = arith.constant 0 : index
    %c0_48 = arith.constant 0 : index
    %127 = vector.load %arg43[%c0_47, %c0_48] : memref<1x16xf32, #tpu.memory_space<vmem>>, vector<1x16xf32>
    %128 = vector.broadcast %126 : vector<96x1xf32> to vector<96x16xf32>
    %129 = vector.broadcast %127 : vector<1x16xf32> to vector<96x16xf32>
    %130 = arith.mulf %128, %129 : vector<96x16xf32>
    %131 = arith.truncf %123 : vector<32x12xf32> to vector<32x12xbf16>
    %c0_49 = arith.constant 0 : index
    %c0_50 = arith.constant 0 : index
    %132 = vector.load %arg39[%c0_49, %c0_50] : memref<12x32xbf16, #tpu.memory_space<vmem>>, vector<12x32xbf16>
    %cst_51 = arith.constant dense<0.000000e+00> : vector<32x32xf32>
    %133 = tpu.matmul %131, %132, %cst_51 {dimension_numbers = #tpu.dot_dimension_numbers<[1], [0], [0], [1], [0, 0, 1, 1], [], []>} : vector<32x12xbf16>, vector<12x32xbf16>, vector<32x32xf32> -> vector<32x32xf32>
    %c0_52 = arith.constant 0 : index
    %c0_53 = arith.constant 0 : index
    %134 = vector.load %arg9[%c0_52, %c0_53] : memref<32x4xf32, #tpu.memory_space<vmem>>, vector<32x4xf32>
    %135 = arith.truncf %134 : vector<32x4xf32> to vector<32x4xbf16>
    %c0_54 = arith.constant 0 : index
    %c0_55 = arith.constant 0 : index
    %136 = vector.load %arg40[%c0_54, %c0_55] : memref<4x32xbf16, #tpu.memory_space<vmem>>, vector<4x32xbf16>
    %cst_56 = arith.constant dense<0.000000e+00> : vector<32x32xf32>
    %137 = tpu.matmul %135, %136, %cst_56 {dimension_numbers = #tpu.dot_dimension_numbers<[1], [0], [0], [1], [0, 0, 1, 1], [], []>} : vector<32x4xbf16>, vector<4x32xbf16>, vector<32x32xf32> -> vector<32x32xf32>
    %138 = arith.addf %133, %137 : vector<32x32xf32>
    %139 = arith.truncf %130 : vector<96x16xf32> to vector<96x16xbf16>
    %c0_57 = arith.constant 0 : index
    %c0_58 = arith.constant 0 : index
    %140 = vector.load %arg15[%c0_57, %c0_58] : memref<16x16xbf16, #tpu.memory_space<vmem>>, vector<16x16xbf16>
    %cst_59 = arith.constant dense<0.000000e+00> : vector<96x16xf32>
    %141 = tpu.matmul %139, %140, %cst_59 {dimension_numbers = #tpu.dot_dimension_numbers<[1], [0], [0], [1], [0, 0, 1, 1], [], []>} : vector<96x16xbf16>, vector<16x16xbf16>, vector<96x16xf32> -> vector<96x16xf32>
    %142 = vector.extract_strided_slice %141 {offsets = [0, 0], sizes = [32, 16], strides = [1, 1]} : vector<96x16xf32> to vector<32x16xf32>
    %143 = vector.extract_strided_slice %141 {offsets = [32, 0], sizes = [32, 16], strides = [1, 1]} : vector<96x16xf32> to vector<32x16xf32>
    %144 = vector.extract_strided_slice %141 {offsets = [64, 0], sizes = [32, 16], strides = [1, 1]} : vector<96x16xf32> to vector<32x16xf32>
    %145 = arith.mulf %142, %142 : vector<32x16xf32>
    %146 = arith.mulf %143, %143 : vector<32x16xf32>
    %147 = arith.addf %145, %146 : vector<32x16xf32>
    %148 = arith.mulf %144, %144 : vector<32x16xf32>
    %149 = arith.addf %147, %148 : vector<32x16xf32>
    %150 = math.sqrt %149 : vector<32x16xf32>
    %151 = arith.truncf %150 : vector<32x16xf32> to vector<32x16xbf16>
    %c0_60 = arith.constant 0 : index
    %c0_61 = arith.constant 0 : index
    %152 = vector.load %arg18[%c0_60, %c0_61] : memref<16x32xbf16, #tpu.memory_space<vmem>>, vector<16x32xbf16>
    %cst_62 = arith.constant dense<0.000000e+00> : vector<32x32xf32>
    %153 = tpu.matmul %151, %152, %cst_62 {dimension_numbers = #tpu.dot_dimension_numbers<[1], [0], [0], [1], [0, 0, 1, 1], [], []>} : vector<32x16xbf16>, vector<16x32xbf16>, vector<32x32xf32> -> vector<32x32xf32>
    %154 = arith.addf %153, %138 : vector<32x32xf32>
    %155 = arith.truncf %141 : vector<96x16xf32> to vector<96x16xbf16>
    %c0_63 = arith.constant 0 : index
    %c0_64 = arith.constant 0 : index
    %156 = vector.load %arg16[%c0_63, %c0_64] : memref<16x8xbf16, #tpu.memory_space<vmem>>, vector<16x8xbf16>
    %cst_65 = arith.constant dense<0.000000e+00> : vector<96x8xf32>
    %157 = tpu.matmul %155, %156, %cst_65 {dimension_numbers = #tpu.dot_dimension_numbers<[1], [0], [0], [1], [0, 0, 1, 1], [], []>} : vector<96x16xbf16>, vector<16x8xbf16>, vector<96x8xf32> -> vector<96x8xf32>
    %158 = arith.truncf %154 : vector<32x32xf32> to vector<32x32xbf16>
    %c0_66 = arith.constant 0 : index
    %c0_67 = arith.constant 0 : index
    %159 = vector.load %arg17[%c0_66, %c0_67] : memref<32x8xbf16, #tpu.memory_space<vmem>>, vector<32x8xbf16>
    %cst_68 = arith.constant dense<0.000000e+00> : vector<32x8xf32>
    %160 = tpu.matmul %158, %159, %cst_68 {dimension_numbers = #tpu.dot_dimension_numbers<[1], [0], [0], [1], [0, 0, 1, 1], [], []>} : vector<32x32xbf16>, vector<32x8xbf16>, vector<32x8xf32> -> vector<32x8xf32>
    %c0_69 = arith.constant 0 : index
    %c0_70 = arith.constant 0 : index
    %161 = vector.load %arg19[%c0_69, %c0_70] : memref<1x8xf32, #tpu.memory_space<vmem>>, vector<1x8xf32>
    %162 = vector.broadcast %161 : vector<1x8xf32> to vector<32x8xf32>
    %163 = arith.addf %160, %162 : vector<32x8xf32>
    %164 = arith.negf %163 : vector<32x8xf32>
    %165 = math.exp %164 : vector<32x8xf32>
    %cst_71 = arith.constant 1.000000e+00 : f32
    %166 = vector.broadcast %cst_71 : f32 to vector<32x8xf32>
    %167 = arith.addf %166, %165 : vector<32x8xf32>
    %168 = arith.divf %166, %167 : vector<32x8xf32>
    %169 = tpu.concatenate %168, %168, %168 in 0 : vector<32x8xf32>, vector<32x8xf32>, vector<32x8xf32> -> vector<96x8xf32>
    %170 = arith.mulf %157, %169 : vector<96x8xf32>
    %171 = arith.addf %84, %93 : vector<32x16xf32>
    %c0_72 = arith.constant 0 : index
    %c0_73 = arith.constant 0 : index
    %172 = vector.load %arg44[%c0_72, %c0_73] : memref<1x16xf32, #tpu.memory_space<vmem>>, vector<1x16xf32>
    %173 = vector.broadcast %108 : vector<32x1xf32> to vector<32x16xf32>
    %174 = vector.broadcast %172 : vector<1x16xf32> to vector<32x16xf32>
    %175 = arith.mulf %173, %174 : vector<32x16xf32>
    %176 = arith.addf %171, %175 : vector<32x16xf32>
    %c0_74 = arith.constant 0 : index
    %c0_75 = arith.constant 0 : index
    %177 = vector.load %arg52[%c0_74, %c0_75] : memref<32x16xf32, #tpu.memory_space<vmem>>, vector<32x16xf32>
    tpu.vector_store %arg52[%c0_74, %c0_75], %176 {strides = array<i32>} : memref<32x16xf32, #tpu.memory_space<vmem>>, vector<32x16xf32>,
    %cst_76 = arith.constant -1.000000e+30 : f32
    %178 = vector.broadcast %cst_76 : f32 to vector<16x16xf32>
    %c0_77 = arith.constant 0 : index
    %c0_78 = arith.constant 0 : index
    %179 = vector.load %arg53[%c0_77, %c0_78] : memref<16x16xf32, #tpu.memory_space<vmem>>, vector<16x16xf32>
    tpu.vector_store %arg53[%c0_77, %c0_78], %178 {strides = array<i32>} : memref<16x16xf32, #tpu.memory_space<vmem>>, vector<16x16xf32>,
    %c0_i32 = arith.constant 0 : i32
    %c32_i32 = arith.constant 32 : i32
    %180 = arith.addi %c0_i32, %c32_i32 : i32
    %c1_i32 = arith.constant 1 : i32
    scf.for %arg54 = %c0_i32 to %180 step %c1_i32  : i32 {
      %c1_i32_169 = arith.constant 1 : i32
      %409 = arith.muli %arg54, %c1_i32_169 : i32
      %c0_i32_170 = arith.constant 0 : i32
      %410 = arith.addi %c0_i32_170, %409 : i32
      %411 = arith.index_cast %410 : i32 to index
      %412 = memref.load %arg0[%411] : memref<32xi32, #tpu.memory_space<smem>>
      %413 = arith.index_cast %412 : i32 to index
      %c0_171 = arith.constant 0 : index
      %414 = vector.load %arg53[%413, %c0_171] : memref<16x16xf32, #tpu.memory_space<vmem>>, vector<1x16xf32>
      %415 = arith.index_cast %410 : i32 to index
      %c0_172 = arith.constant 0 : index
      %416 = vector.load %arg52[%415, %c0_172] : memref<32x16xf32, #tpu.memory_space<vmem>>, vector<1x16xf32>
      %417 = arith.maximumf %414, %416 : vector<1x16xf32>
      %418 = arith.index_cast %412 : i32 to index
      %c0_173 = arith.constant 0 : index
      %419 = vector.load %arg53[%418, %c0_173] : memref<16x16xf32, #tpu.memory_space<vmem>>, vector<1x16xf32>
      tpu.vector_store %arg53[%418, %c0_173], %417 {strides = array<i32>} : memref<16x16xf32, #tpu.memory_space<vmem>>, vector<1x16xf32>,
    }
    %c32_i32_79 = arith.constant 32 : i32
    %c0_80 = arith.constant 0 : index
    %c0_81 = arith.constant 0 : index
    %181 = vector.load %arg53[%c0_80, %c0_81] : memref<16x16xf32, #tpu.memory_space<vmem>>, vector<16x16xf32>
    %cst_82 = arith.constant dense<0.000000e+00> : vector<32x16xf32>
    %182 = tpu.matmul %15, %181, %cst_82 {dimension_numbers = #tpu.dot_dimension_numbers<[1], [0], [0], [1], [0, 0, 1, 1], [], []>} : vector<32x16xf32>, vector<16x16xf32>, vector<32x16xf32> -> vector<32x16xf32>
    %183 = arith.subf %176, %182 : vector<32x16xf32>
    %184 = math.exp %183 : vector<32x16xf32>
    %cst_83 = arith.constant dense<0.000000e+00> : vector<16x16xf32>
    %185 = tpu.matmul %26, %184, %cst_83 {dimension_numbers = #tpu.dot_dimension_numbers<[1], [0], [0], [1], [0, 0, 1, 1], [], []>} : vector<16x32xf32>, vector<32x16xf32>, vector<16x16xf32> -> vector<16x16xf32>
    %cst_84 = arith.constant 1.000000e-16 : f32
    %186 = vector.broadcast %cst_84 : f32 to vector<16x16xf32>
    %187 = arith.addf %185, %186 : vector<16x16xf32>
    %cst_85 = arith.constant 1.000000e+00 : f32
    %188 = vector.broadcast %cst_85 : f32 to vector<16x16xf32>
    %189 = arith.divf %188, %187 : vector<16x16xf32>
    %cst_86 = arith.constant dense<0.000000e+00> : vector<32x16xf32>
    %190 = tpu.matmul %15, %189, %cst_86 {dimension_numbers = #tpu.dot_dimension_numbers<[1], [0], [0], [1], [0, 0, 1, 1], [], []>} : vector<32x16xf32>, vector<16x16xf32>, vector<32x16xf32> -> vector<32x16xf32>
    %191 = arith.mulf %184, %190 : vector<32x16xf32>
    %192 = arith.mulf %88, %94 : vector<32x16xf32>
    %193 = arith.mulf %90, %95 : vector<32x16xf32>
    %194 = arith.addf %192, %193 : vector<32x16xf32>
    %195 = arith.mulf %92, %96 : vector<32x16xf32>
    %196 = arith.addf %194, %195 : vector<32x16xf32>
    %cst_87 = arith.constant dense<0.000000e+00> : vector<32xf32>
    %197 = vector.multi_reduction <add>, %196, %cst_87 [1] : vector<32x16xf32> to vector<32xf32>
    %198 = vector.shape_cast %197 : vector<32xf32> to vector<32x1xf32>
    %199 = arith.negf %198 : vector<32x1xf32>
    %200 = math.exp %199 : vector<32x1xf32>
    %cst_88 = arith.constant 1.000000e+00 : f32
    %201 = vector.broadcast %cst_88 : f32 to vector<32x1xf32>
    %202 = arith.addf %201, %200 : vector<32x1xf32>
    %203 = arith.divf %201, %202 : vector<32x1xf32>
    %204 = arith.truncf %154 : vector<32x32xf32> to vector<32x32xbf16>
    %c0_89 = arith.constant 0 : index
    %c0_90 = arith.constant 0 : index
    %205 = vector.load %arg48[%c0_89, %c0_90] : memref<32x32xbf16, #tpu.memory_space<vmem>>, vector<32x32xbf16>
    %cst_91 = arith.constant dense<0.000000e+00> : vector<32x32xf32>
    %206 = tpu.matmul %204, %205, %cst_91 {dimension_numbers = #tpu.dot_dimension_numbers<[1], [0], [0], [1], [0, 0, 1, 1], [], []>} : vector<32x32xbf16>, vector<32x32xbf16>, vector<32x32xf32> -> vector<32x32xf32>
    %c0_92 = arith.constant 0 : index
    %c0_93 = arith.constant 0 : index
    %207 = vector.load %arg49[%c0_92, %c0_93] : memref<1x32xf32, #tpu.memory_space<vmem>>, vector<1x32xf32>
    %208 = vector.broadcast %207 : vector<1x32xf32> to vector<32x32xf32>
    %209 = arith.addf %206, %208 : vector<32x32xf32>
    %210 = vector.extract_strided_slice %209 {offsets = [0, 0], sizes = [32, 16], strides = [1, 1]} : vector<32x32xf32> to vector<32x16xf32>
    %211 = vector.extract_strided_slice %209 {offsets = [0, 16], sizes = [32, 16], strides = [1, 1]} : vector<32x32xf32> to vector<32x16xf32>
    %212 = arith.truncf %170 : vector<96x8xf32> to vector<96x8xbf16>
    %c0_94 = arith.constant 0 : index
    %c0_95 = arith.constant 0 : index
    %213 = vector.load %arg42[%c0_94, %c0_95] : memref<8x16xbf16, #tpu.memory_space<vmem>>, vector<8x16xbf16>
    %cst_96 = arith.constant dense<0.000000e+00> : vector<96x16xf32>
    %214 = tpu.matmul %212, %213, %cst_96 {dimension_numbers = #tpu.dot_dimension_numbers<[1], [0], [0], [1], [0, 0, 1, 1], [], []>} : vector<96x8xbf16>, vector<8x16xbf16>, vector<96x16xf32> -> vector<96x16xf32>
    %215 = vector.extract_strided_slice %214 {offsets = [0, 0], sizes = [32, 16], strides = [1, 1]} : vector<96x16xf32> to vector<32x16xf32>
    %216 = vector.extract_strided_slice %214 {offsets = [32, 0], sizes = [32, 16], strides = [1, 1]} : vector<96x16xf32> to vector<32x16xf32>
    %217 = vector.extract_strided_slice %214 {offsets = [64, 0], sizes = [32, 16], strides = [1, 1]} : vector<96x16xf32> to vector<32x16xf32>
    %218 = arith.mulf %85, %210 : vector<32x16xf32>
    %219 = arith.mulf %218, %191 : vector<32x16xf32>
    %220 = arith.mulf %86, %215 : vector<32x16xf32>
    %221 = arith.mulf %87, %211 : vector<32x16xf32>
    %222 = arith.addf %220, %221 : vector<32x16xf32>
    %223 = vector.broadcast %203 : vector<32x1xf32> to vector<32x16xf32>
    %224 = arith.mulf %222, %223 : vector<32x16xf32>
    %225 = arith.mulf %86, %216 : vector<32x16xf32>
    %226 = arith.mulf %89, %211 : vector<32x16xf32>
    %227 = arith.addf %225, %226 : vector<32x16xf32>
    %228 = vector.broadcast %203 : vector<32x1xf32> to vector<32x16xf32>
    %229 = arith.mulf %227, %228 : vector<32x16xf32>
    %230 = arith.mulf %86, %217 : vector<32x16xf32>
    %231 = arith.mulf %91, %211 : vector<32x16xf32>
    %232 = arith.addf %230, %231 : vector<32x16xf32>
    %233 = vector.broadcast %203 : vector<32x1xf32> to vector<32x16xf32>
    %234 = arith.mulf %232, %233 : vector<32x16xf32>
    %235 = tpu.concatenate %224, %229, %234 in 0 : vector<32x16xf32>, vector<32x16xf32>, vector<32x16xf32> -> vector<96x16xf32>
    %236 = arith.truncf %219 : vector<32x16xf32> to vector<32x16xbf16>
    %c0_97 = arith.constant 0 : index
    %c0_98 = arith.constant 0 : index
    %237 = vector.load %arg36[%c0_97, %c0_98] : memref<16x32xbf16, #tpu.memory_space<vmem>>, vector<16x32xbf16>
    %cst_99 = arith.constant dense<0.000000e+00> : vector<32x32xf32>
    %238 = tpu.matmul %236, %237, %cst_99 {dimension_numbers = #tpu.dot_dimension_numbers<[1], [0], [0], [1], [0, 0, 1, 1], [], []>} : vector<32x16xbf16>, vector<16x32xbf16>, vector<32x32xf32> -> vector<32x32xf32>
    %239 = arith.truncf %235 : vector<96x16xf32> to vector<96x16xbf16>
    %c0_100 = arith.constant 0 : index
    %c0_101 = arith.constant 0 : index
    %240 = vector.load %arg20[%c0_100, %c0_101] : memref<16x16xbf16, #tpu.memory_space<vmem>>, vector<16x16xbf16>
    %cst_102 = arith.constant dense<0.000000e+00> : vector<96x16xf32>
    %241 = tpu.matmul %239, %240, %cst_102 {dimension_numbers = #tpu.dot_dimension_numbers<[1], [0], [0], [1], [0, 0, 1, 1], [], []>} : vector<96x16xbf16>, vector<16x16xbf16>, vector<96x16xf32> -> vector<96x16xf32>
    %242 = vector.extract_strided_slice %241 {offsets = [0, 0], sizes = [32, 16], strides = [1, 1]} : vector<96x16xf32> to vector<32x16xf32>
    %243 = vector.extract_strided_slice %241 {offsets = [32, 0], sizes = [32, 16], strides = [1, 1]} : vector<96x16xf32> to vector<32x16xf32>
    %244 = vector.extract_strided_slice %241 {offsets = [64, 0], sizes = [32, 16], strides = [1, 1]} : vector<96x16xf32> to vector<32x16xf32>
    %245 = arith.mulf %242, %242 : vector<32x16xf32>
    %246 = arith.mulf %243, %243 : vector<32x16xf32>
    %247 = arith.addf %245, %246 : vector<32x16xf32>
    %248 = arith.mulf %244, %244 : vector<32x16xf32>
    %249 = arith.addf %247, %248 : vector<32x16xf32>
    %250 = math.sqrt %249 : vector<32x16xf32>
    %251 = arith.truncf %250 : vector<32x16xf32> to vector<32x16xbf16>
    %c0_103 = arith.constant 0 : index
    %c0_104 = arith.constant 0 : index
    %252 = vector.load %arg23[%c0_103, %c0_104] : memref<16x32xbf16, #tpu.memory_space<vmem>>, vector<16x32xbf16>
    %cst_105 = arith.constant dense<0.000000e+00> : vector<32x32xf32>
    %253 = tpu.matmul %251, %252, %cst_105 {dimension_numbers = #tpu.dot_dimension_numbers<[1], [0], [0], [1], [0, 0, 1, 1], [], []>} : vector<32x16xbf16>, vector<16x32xbf16>, vector<32x32xf32> -> vector<32x32xf32>
    %254 = arith.addf %253, %238 : vector<32x32xf32>
    %255 = arith.truncf %241 : vector<96x16xf32> to vector<96x16xbf16>
    %c0_106 = arith.constant 0 : index
    %c0_107 = arith.constant 0 : index
    %256 = vector.load %arg21[%c0_106, %c0_107] : memref<16x8xbf16, #tpu.memory_space<vmem>>, vector<16x8xbf16>
    %cst_108 = arith.constant dense<0.000000e+00> : vector<96x8xf32>
    %257 = tpu.matmul %255, %256, %cst_108 {dimension_numbers = #tpu.dot_dimension_numbers<[1], [0], [0], [1], [0, 0, 1, 1], [], []>} : vector<96x16xbf16>, vector<16x8xbf16>, vector<96x8xf32> -> vector<96x8xf32>
    %258 = arith.truncf %254 : vector<32x32xf32> to vector<32x32xbf16>
    %c0_109 = arith.constant 0 : index
    %c0_110 = arith.constant 0 : index
    %259 = vector.load %arg22[%c0_109, %c0_110] : memref<32x8xbf16, #tpu.memory_space<vmem>>, vector<32x8xbf16>
    %cst_111 = arith.constant dense<0.000000e+00> : vector<32x8xf32>
    %260 = tpu.matmul %258, %259, %cst_111 {dimension_numbers = #tpu.dot_dimension_numbers<[1], [0], [0], [1], [0, 0, 1, 1], [], []>} : vector<32x32xbf16>, vector<32x8xbf16>, vector<32x8xf32> -> vector<32x8xf32>
    %c0_112 = arith.constant 0 : index
    %c0_113 = arith.constant 0 : index
    %261 = vector.load %arg24[%c0_112, %c0_113] : memref<1x8xf32, #tpu.memory_space<vmem>>, vector<1x8xf32>
    %262 = vector.broadcast %261 : vector<1x8xf32> to vector<32x8xf32>
    %263 = arith.addf %260, %262 : vector<32x8xf32>
    %264 = arith.negf %263 : vector<32x8xf32>
    %265 = math.exp %264 : vector<32x8xf32>
    %cst_114 = arith.constant 1.000000e+00 : f32
    %266 = vector.broadcast %cst_114 : f32 to vector<32x8xf32>
    %267 = arith.addf %266, %265 : vector<32x8xf32>
    %268 = arith.divf %266, %267 : vector<32x8xf32>
    %269 = tpu.concatenate %268, %268, %268 in 0 : vector<32x8xf32>, vector<32x8xf32>, vector<32x8xf32> -> vector<96x8xf32>
    %270 = arith.mulf %257, %269 : vector<96x8xf32>
    %271 = vector.extract_strided_slice %270 {offsets = [0, 0], sizes = [32, 8], strides = [1, 1]} : vector<96x8xf32> to vector<32x8xf32>
    %272 = vector.extract_strided_slice %270 {offsets = [32, 0], sizes = [32, 8], strides = [1, 1]} : vector<96x8xf32> to vector<32x8xf32>
    %273 = vector.extract_strided_slice %270 {offsets = [64, 0], sizes = [32, 8], strides = [1, 1]} : vector<96x8xf32> to vector<32x8xf32>
    %274 = tpu.concatenate %254, %271, %272, %273 in 1 : vector<32x32xf32>, vector<32x8xf32>, vector<32x8xf32>, vector<32x8xf32> -> vector<32x56xf32>
    %cst_115 = arith.constant dense<0.000000e+00> : vector<16x56xf32>
    %275 = tpu.matmul %26, %274, %cst_115 {dimension_numbers = #tpu.dot_dimension_numbers<[1], [0], [0], [1], [0, 0, 1, 1], [], []>} : vector<16x32xf32>, vector<32x56xf32>, vector<16x56xf32> -> vector<16x56xf32>
    %276 = vector.extract_strided_slice %275 {offsets = [0, 0], sizes = [16, 32], strides = [1, 1]} : vector<16x56xf32> to vector<16x32xf32>
    %277 = vector.extract_strided_slice %275 {offsets = [0, 32], sizes = [16, 8], strides = [1, 1]} : vector<16x56xf32> to vector<16x8xf32>
    %278 = vector.extract_strided_slice %275 {offsets = [0, 40], sizes = [16, 8], strides = [1, 1]} : vector<16x56xf32> to vector<16x8xf32>
    %279 = vector.extract_strided_slice %275 {offsets = [0, 48], sizes = [16, 8], strides = [1, 1]} : vector<16x56xf32> to vector<16x8xf32>
    %280 = tpu.concatenate %277, %278, %279 in 0 : vector<16x8xf32>, vector<16x8xf32>, vector<16x8xf32> -> vector<48x8xf32>
    %281 = arith.truncf %27 : vector<16x32xf32> to vector<16x32xbf16>
    %c0_116 = arith.constant 0 : index
    %c0_117 = arith.constant 0 : index
    %282 = vector.load %arg37[%c0_116, %c0_117] : memref<32x32xbf16, #tpu.memory_space<vmem>>, vector<32x32xbf16>
    %cst_118 = arith.constant dense<0.000000e+00> : vector<16x32xf32>
    %283 = tpu.matmul %281, %282, %cst_118 {dimension_numbers = #tpu.dot_dimension_numbers<[1], [0], [0], [1], [0, 0, 1, 1], [], []>} : vector<16x32xbf16>, vector<32x32xbf16>, vector<16x32xf32> -> vector<16x32xf32>
    %284 = arith.truncf %28 : vector<48x8xf32> to vector<48x8xbf16>
    %c0_119 = arith.constant 0 : index
    %c0_120 = arith.constant 0 : index
    %285 = vector.load %arg25[%c0_119, %c0_120] : memref<8x8xbf16, #tpu.memory_space<vmem>>, vector<8x8xbf16>
    %cst_121 = arith.constant dense<0.000000e+00> : vector<48x8xf32>
    %286 = tpu.matmul %284, %285, %cst_121 {dimension_numbers = #tpu.dot_dimension_numbers<[1], [0], [0], [1], [0, 0, 1, 1], [], []>} : vector<48x8xbf16>, vector<8x8xbf16>, vector<48x8xf32> -> vector<48x8xf32>
    %287 = vector.extract_strided_slice %286 {offsets = [0, 0], sizes = [16, 8], strides = [1, 1]} : vector<48x8xf32> to vector<16x8xf32>
    %288 = vector.extract_strided_slice %286 {offsets = [16, 0], sizes = [16, 8], strides = [1, 1]} : vector<48x8xf32> to vector<16x8xf32>
    %289 = vector.extract_strided_slice %286 {offsets = [32, 0], sizes = [16, 8], strides = [1, 1]} : vector<48x8xf32> to vector<16x8xf32>
    %290 = arith.mulf %287, %287 : vector<16x8xf32>
    %291 = arith.mulf %288, %288 : vector<16x8xf32>
    %292 = arith.addf %290, %291 : vector<16x8xf32>
    %293 = arith.mulf %289, %289 : vector<16x8xf32>
    %294 = arith.addf %292, %293 : vector<16x8xf32>
    %295 = math.sqrt %294 : vector<16x8xf32>
    %296 = arith.truncf %295 : vector<16x8xf32> to vector<16x8xbf16>
    %c0_122 = arith.constant 0 : index
    %c0_123 = arith.constant 0 : index
    %297 = vector.load %arg28[%c0_122, %c0_123] : memref<8x32xbf16, #tpu.memory_space<vmem>>, vector<8x32xbf16>
    %cst_124 = arith.constant dense<0.000000e+00> : vector<16x32xf32>
    %298 = tpu.matmul %296, %297, %cst_124 {dimension_numbers = #tpu.dot_dimension_numbers<[1], [0], [0], [1], [0, 0, 1, 1], [], []>} : vector<16x8xbf16>, vector<8x32xbf16>, vector<16x32xf32> -> vector<16x32xf32>
    %299 = arith.addf %298, %283 : vector<16x32xf32>
    %300 = arith.truncf %286 : vector<48x8xf32> to vector<48x8xbf16>
    %c0_125 = arith.constant 0 : index
    %c0_126 = arith.constant 0 : index
    %301 = vector.load %arg26[%c0_125, %c0_126] : memref<8x8xbf16, #tpu.memory_space<vmem>>, vector<8x8xbf16>
    %cst_127 = arith.constant dense<0.000000e+00> : vector<48x8xf32>
    %302 = tpu.matmul %300, %301, %cst_127 {dimension_numbers = #tpu.dot_dimension_numbers<[1], [0], [0], [1], [0, 0, 1, 1], [], []>} : vector<48x8xbf16>, vector<8x8xbf16>, vector<48x8xf32> -> vector<48x8xf32>
    %303 = arith.truncf %299 : vector<16x32xf32> to vector<16x32xbf16>
    %c0_128 = arith.constant 0 : index
    %c0_129 = arith.constant 0 : index
    %304 = vector.load %arg27[%c0_128, %c0_129] : memref<32x8xbf16, #tpu.memory_space<vmem>>, vector<32x8xbf16>
    %cst_130 = arith.constant dense<0.000000e+00> : vector<16x8xf32>
    %305 = tpu.matmul %303, %304, %cst_130 {dimension_numbers = #tpu.dot_dimension_numbers<[1], [0], [0], [1], [0, 0, 1, 1], [], []>} : vector<16x32xbf16>, vector<32x8xbf16>, vector<16x8xf32> -> vector<16x8xf32>
    %c0_131 = arith.constant 0 : index
    %c0_132 = arith.constant 0 : index
    %306 = vector.load %arg29[%c0_131, %c0_132] : memref<1x8xf32, #tpu.memory_space<vmem>>, vector<1x8xf32>
    %307 = vector.broadcast %306 : vector<1x8xf32> to vector<16x8xf32>
    %308 = arith.addf %305, %307 : vector<16x8xf32>
    %309 = arith.negf %308 : vector<16x8xf32>
    %310 = math.exp %309 : vector<16x8xf32>
    %cst_133 = arith.constant 1.000000e+00 : f32
    %311 = vector.broadcast %cst_133 : f32 to vector<16x8xf32>
    %312 = arith.addf %311, %310 : vector<16x8xf32>
    %313 = arith.divf %311, %312 : vector<16x8xf32>
    %314 = tpu.concatenate %313, %313, %313 in 0 : vector<16x8xf32>, vector<16x8xf32>, vector<16x8xf32> -> vector<48x8xf32>
    %315 = arith.mulf %302, %314 : vector<48x8xf32>
    %316 = arith.addf %299, %276 : vector<16x32xf32>
    %317 = arith.addf %315, %280 : vector<48x8xf32>
    %318 = arith.truncf %316 : vector<16x32xf32> to vector<16x32xbf16>
    %c0_134 = arith.constant 0 : index
    %c0_135 = arith.constant 0 : index
    %319 = vector.load %arg38[%c0_134, %c0_135] : memref<32x32xbf16, #tpu.memory_space<vmem>>, vector<32x32xbf16>
    %cst_136 = arith.constant dense<0.000000e+00> : vector<16x32xf32>
    %320 = tpu.matmul %318, %319, %cst_136 {dimension_numbers = #tpu.dot_dimension_numbers<[1], [0], [0], [1], [0, 0, 1, 1], [], []>} : vector<16x32xbf16>, vector<32x32xbf16>, vector<16x32xf32> -> vector<16x32xf32>
    %321 = arith.truncf %317 : vector<48x8xf32> to vector<48x8xbf16>
    %c0_137 = arith.constant 0 : index
    %c0_138 = arith.constant 0 : index
    %322 = vector.load %arg30[%c0_137, %c0_138] : memref<8x8xbf16, #tpu.memory_space<vmem>>, vector<8x8xbf16>
    %cst_139 = arith.constant dense<0.000000e+00> : vector<48x8xf32>
    %323 = tpu.matmul %321, %322, %cst_139 {dimension_numbers = #tpu.dot_dimension_numbers<[1], [0], [0], [1], [0, 0, 1, 1], [], []>} : vector<48x8xbf16>, vector<8x8xbf16>, vector<48x8xf32> -> vector<48x8xf32>
    %324 = vector.extract_strided_slice %323 {offsets = [0, 0], sizes = [16, 8], strides = [1, 1]} : vector<48x8xf32> to vector<16x8xf32>
    %325 = vector.extract_strided_slice %323 {offsets = [16, 0], sizes = [16, 8], strides = [1, 1]} : vector<48x8xf32> to vector<16x8xf32>
    %326 = vector.extract_strided_slice %323 {offsets = [32, 0], sizes = [16, 8], strides = [1, 1]} : vector<48x8xf32> to vector<16x8xf32>
    %327 = arith.mulf %324, %324 : vector<16x8xf32>
    %328 = arith.mulf %325, %325 : vector<16x8xf32>
    %329 = arith.addf %327, %328 : vector<16x8xf32>
    %330 = arith.mulf %326, %326 : vector<16x8xf32>
    %331 = arith.addf %329, %330 : vector<16x8xf32>
    %332 = math.sqrt %331 : vector<16x8xf32>
    %333 = arith.truncf %332 : vector<16x8xf32> to vector<16x8xbf16>
    %c0_140 = arith.constant 0 : index
    %c0_141 = arith.constant 0 : index
    %334 = vector.load %arg33[%c0_140, %c0_141] : memref<8x32xbf16, #tpu.memory_space<vmem>>, vector<8x32xbf16>
    %cst_142 = arith.constant dense<0.000000e+00> : vector<16x32xf32>
    %335 = tpu.matmul %333, %334, %cst_142 {dimension_numbers = #tpu.dot_dimension_numbers<[1], [0], [0], [1], [0, 0, 1, 1], [], []>} : vector<16x8xbf16>, vector<8x32xbf16>, vector<16x32xf32> -> vector<16x32xf32>
    %336 = arith.addf %335, %320 : vector<16x32xf32>
    %337 = arith.truncf %323 : vector<48x8xf32> to vector<48x8xbf16>
    %c0_143 = arith.constant 0 : index
    %c0_144 = arith.constant 0 : index
    %338 = vector.load %arg31[%c0_143, %c0_144] : memref<8x8xbf16, #tpu.memory_space<vmem>>, vector<8x8xbf16>
    %cst_145 = arith.constant dense<0.000000e+00> : vector<48x8xf32>
    %339 = tpu.matmul %337, %338, %cst_145 {dimension_numbers = #tpu.dot_dimension_numbers<[1], [0], [0], [1], [0, 0, 1, 1], [], []>} : vector<48x8xbf16>, vector<8x8xbf16>, vector<48x8xf32> -> vector<48x8xf32>
    %340 = arith.truncf %336 : vector<16x32xf32> to vector<16x32xbf16>
    %c0_146 = arith.constant 0 : index
    %c0_147 = arith.constant 0 : index
    %341 = vector.load %arg32[%c0_146, %c0_147] : memref<32x8xbf16, #tpu.memory_space<vmem>>, vector<32x8xbf16>
    %cst_148 = arith.constant dense<0.000000e+00> : vector<16x8xf32>
    %342 = tpu.matmul %340, %341, %cst_148 {dimension_numbers = #tpu.dot_dimension_numbers<[1], [0], [0], [1], [0, 0, 1, 1], [], []>} : vector<16x32xbf16>, vector<32x8xbf16>, vector<16x8xf32> -> vector<16x8xf32>
    %c0_149 = arith.constant 0 : index
    %c0_150 = arith.constant 0 : index
    %343 = vector.load %arg34[%c0_149, %c0_150] : memref<1x8xf32, #tpu.memory_space<vmem>>, vector<1x8xf32>
    %344 = vector.broadcast %343 : vector<1x8xf32> to vector<16x8xf32>
    %345 = arith.addf %342, %344 : vector<16x8xf32>
    %346 = arith.negf %345 : vector<16x8xf32>
    %347 = math.exp %346 : vector<16x8xf32>
    %cst_151 = arith.constant 1.000000e+00 : f32
    %348 = vector.broadcast %cst_151 : f32 to vector<16x8xf32>
    %349 = arith.addf %348, %347 : vector<16x8xf32>
    %350 = arith.divf %348, %349 : vector<16x8xf32>
    %351 = tpu.concatenate %350, %350, %350 in 0 : vector<16x8xf32>, vector<16x8xf32>, vector<16x8xf32> -> vector<48x8xf32>
    %352 = arith.mulf %339, %351 : vector<48x8xf32>
    %353 = arith.truncf %352 : vector<48x8xf32> to vector<48x8xbf16>
    %c0_152 = arith.constant 0 : index
    %c0_153 = arith.constant 0 : index
    %354 = vector.load %arg41[%c0_152, %c0_153] : memref<8x8xbf16, #tpu.memory_space<vmem>>, vector<8x8xbf16>
    %cst_154 = arith.constant dense<0.000000e+00> : vector<48x8xf32>
    %355 = tpu.matmul %353, %354, %cst_154 {dimension_numbers = #tpu.dot_dimension_numbers<[1], [0], [0], [1], [0, 0, 1, 1], [], []>} : vector<48x8xbf16>, vector<8x8xbf16>, vector<48x8xf32> -> vector<48x8xf32>
    %356 = vector.extract_strided_slice %352 {offsets = [0, 0], sizes = [16, 8], strides = [1, 1]} : vector<48x8xf32> to vector<16x8xf32>
    %357 = vector.extract_strided_slice %352 {offsets = [16, 0], sizes = [16, 8], strides = [1, 1]} : vector<48x8xf32> to vector<16x8xf32>
    %358 = vector.extract_strided_slice %352 {offsets = [32, 0], sizes = [16, 8], strides = [1, 1]} : vector<48x8xf32> to vector<16x8xf32>
    %359 = vector.extract_strided_slice %355 {offsets = [0, 0], sizes = [16, 8], strides = [1, 1]} : vector<48x8xf32> to vector<16x8xf32>
    %360 = vector.extract_strided_slice %355 {offsets = [16, 0], sizes = [16, 8], strides = [1, 1]} : vector<48x8xf32> to vector<16x8xf32>
    %361 = vector.extract_strided_slice %355 {offsets = [32, 0], sizes = [16, 8], strides = [1, 1]} : vector<48x8xf32> to vector<16x8xf32>
    %362 = arith.mulf %356, %359 : vector<16x8xf32>
    %363 = arith.mulf %357, %360 : vector<16x8xf32>
    %364 = arith.addf %362, %363 : vector<16x8xf32>
    %365 = arith.mulf %358, %361 : vector<16x8xf32>
    %366 = arith.addf %364, %365 : vector<16x8xf32>
    %367 = arith.mulf %359, %359 : vector<16x8xf32>
    %368 = arith.mulf %360, %360 : vector<16x8xf32>
    %369 = arith.addf %367, %368 : vector<16x8xf32>
    %370 = arith.mulf %361, %361 : vector<16x8xf32>
    %371 = arith.addf %369, %370 : vector<16x8xf32>
    %cst_155 = arith.constant 9.99999997E-7 : f32
    %372 = vector.broadcast %cst_155 : f32 to vector<16x8xf32>
    %373 = arith.addf %371, %372 : vector<16x8xf32>
    %374 = arith.divf %366, %373 : vector<16x8xf32>
    %cst_156 = arith.constant 0.000000e+00 : f32
    %375 = vector.broadcast %cst_156 : f32 to vector<16x8xf32>
    %376 = arith.cmpf oge, %366, %375 : vector<16x8xf32>
    %cst_157 = arith.constant 0.000000e+00 : f32
    %377 = vector.broadcast %cst_157 : f32 to vector<16x32xf32>
    %378 = arith.cmpf oge, %336, %377 : vector<16x32xf32>
    %cst_158 = arith.constant 0.00999999977 : f32
    %379 = vector.broadcast %cst_158 : f32 to vector<16x32xf32>
    %380 = arith.mulf %379, %336 : vector<16x32xf32>
    %381 = arith.select %378, %336, %380 : vector<16x32xi1>, vector<16x32xf32>
    %c0_159 = arith.constant 0 : index
    %c0_160 = arith.constant 0 : index
    %382 = vector.load %arg50[%c0_159, %c0_160] : memref<16x32xf32, #tpu.memory_space<vmem>>, vector<16x32xf32>
    tpu.vector_store %arg50[%c0_159, %c0_160], %381 {strides = array<i32>} : memref<16x32xf32, #tpu.memory_space<vmem>>, vector<16x32xf32>,
    %383 = arith.mulf %374, %359 : vector<16x8xf32>
    %384 = arith.subf %356, %383 : vector<16x8xf32>
    %385 = arith.select %376, %356, %384 : vector<16x8xi1>, vector<16x8xf32>
    %cst_161 = arith.constant 2.000000e-01 : f32
    %386 = vector.broadcast %cst_161 : f32 to vector<16x8xf32>
    %387 = arith.mulf %386, %356 : vector<16x8xf32>
    %cst_162 = arith.constant 8.000000e-01 : f32
    %388 = vector.broadcast %cst_162 : f32 to vector<16x8xf32>
    %389 = arith.mulf %388, %385 : vector<16x8xf32>
    %390 = arith.addf %387, %389 : vector<16x8xf32>
    %391 = arith.mulf %374, %360 : vector<16x8xf32>
    %392 = arith.subf %357, %391 : vector<16x8xf32>
    %393 = arith.select %376, %357, %392 : vector<16x8xi1>, vector<16x8xf32>
    %cst_163 = arith.constant 2.000000e-01 : f32
    %394 = vector.broadcast %cst_163 : f32 to vector<16x8xf32>
    %395 = arith.mulf %394, %357 : vector<16x8xf32>
    %cst_164 = arith.constant 8.000000e-01 : f32
    %396 = vector.broadcast %cst_164 : f32 to vector<16x8xf32>
    %397 = arith.mulf %396, %393 : vector<16x8xf32>
    %398 = arith.addf %395, %397 : vector<16x8xf32>
    %399 = arith.mulf %374, %361 : vector<16x8xf32>
    %400 = arith.subf %358, %399 : vector<16x8xf32>
    %401 = arith.select %376, %358, %400 : vector<16x8xi1>, vector<16x8xf32>
    %cst_165 = arith.constant 2.000000e-01 : f32
    %402 = vector.broadcast %cst_165 : f32 to vector<16x8xf32>
    %403 = arith.mulf %402, %358 : vector<16x8xf32>
    %cst_166 = arith.constant 8.000000e-01 : f32
    %404 = vector.broadcast %cst_166 : f32 to vector<16x8xf32>
    %405 = arith.mulf %404, %401 : vector<16x8xf32>
    %406 = arith.addf %403, %405 : vector<16x8xf32>
    %407 = tpu.concatenate %390, %398, %406 in 0 : vector<16x8xf32>, vector<16x8xf32>, vector<16x8xf32> -> vector<48x8xf32>
    %c0_167 = arith.constant 0 : index
    %c0_168 = arith.constant 0 : index
    %408 = vector.load %arg51[%c0_167, %c0_168] : memref<48x8xf32, #tpu.memory_space<vmem>>, vector<48x8xf32>
    tpu.vector_store %arg51[%c0_167, %c0_168], %407 {strides = array<i32>} : memref<48x8xf32, #tpu.memory_space<vmem>>, vector<48x8xf32>,
    return
  }
}

</mosaic_0001>

<bundles_post_ra>
// kernel: tpu_custom_call.1
= control target key start
LH: loop header
LB: loop body
LE: loop exit
PB: predicated region body
PF: predicated region fallthrough
CT: control target
= control target key end

     0   :  { %s5699_s6 = smov 1   ;;  %s5700_s10 = smov 2   ;;  %s7003_s0 = inlined_call_operand.smem [shape: u32[52], index: -1, kind: input, shape index: {}] }
   0x1   :  { %s5777_s5 = sld [smem:[%s7003_s0]]   ;;  %s5701_s14 = smov 3  }
   0x2   :  { %s5782_s9 = sld [smem:[%s7003_s0 + %s5699_s6]]   ;;  %s5702_s18 = smov 4  }
   0x3   :  { %s5787_s13 = sld [smem:[%s7003_s0 + %s5700_s10]]   ;;  %s5703_s22 = smov 5  }
   0x4   :  { %s5792_s17 = sld [smem:[%s7003_s0 + %s5701_s14]]   ;;  %s5704_s26 = smov 6  }
   0x5   :  { %s5797_s21 = sld [smem:[%s7003_s0 + %s5702_s18]]   ;;  %s5705_s30 = smov 7  }
   0x6   :  { %s5802_s25 = sld [smem:[%s7003_s0 + %s5703_s22]]   ;;  %s5706_s4 = smov 8  }
   0x7   :  { %s5807_s29 = sld [smem:[%s7003_s0 + %s5704_s26]]   ;;  %s5707_s10 = smov 9  }
   0x8   :  { %s5812_s3 = sld [smem:[%s7003_s0 + %s5705_s30]]   ;;  %s5708_s15 = smov 10  }
   0x9   :  { %s5817_s8 = sld [smem:[%s7003_s0 + %s5706_s4]]   ;;  %s5709_s20 = smov 11  }
   0xa   :  { %7013 = sst [smem:[#allocation10_spill]] %s5792_s17  ;;  %s5710_s26 = smov 12  }
   0xb   :  { %7014 = sst [smem:[#allocation11_spill]] %s5797_s21  ;;  %s5711_s1 = smov 13  }
   0xc   :  { %s5822_s14 = sld [smem:[%s7003_s0 + %s5707_s10]]   ;;  %s5712_s7 = smov 14  }
   0xd   :  { %s5827_s19 = sld [smem:[%s7003_s0 + %s5708_s15]]   ;;  %s5713_s15 = smov 15  }
   0xe   :  { %s5832_s24 = sld [smem:[%s7003_s0 + %s5709_s20]]   ;;  %s5714_s22 = smov 16  }
   0xf   :  { %s5837_s30 = sld [smem:[%s7003_s0 + %s5710_s26]]   ;;  %s5715_s28 = smov 17  }
  0x10   :  { %s5842_s6 = sld [smem:[%s7003_s0 + %s5711_s1]]  }
  0x11   :  { %s5847_s12 = sld [smem:[%s7003_s0 + %s5712_s7]]   ;;  %s5716_s7 = smov 18  }
  0x12   :  { %7015 = sst [smem:[#allocation12_spill]] %s5822_s14 }
  0x13   :  { %s5852_s20 = sld [smem:[%s7003_s0 + %s5713_s15]]   ;;  %s5717_s15 = smov 19  }
  0x14   :  { %s5857_s27 = sld [smem:[%s7003_s0 + %s5714_s22]]   ;;  %s5718_s22 = smov 20  }
  0x15   :  { %s5862_s4 = sld [smem:[%s7003_s0 + %s5715_s28]]   ;;  %s5719_s28 = smov 21  }
  0x16   :  { %s5867_s14 = sld [smem:[%s7003_s0 + %s5716_s7]]   ;;  %s5720_s7 = smov 22  }
  0x17   :  { %7016 = sst [smem:[#allocation13_spill]] %s5847_s12 }
  0x18   :  { %s5872_s21 = sld [smem:[%s7003_s0 + %s5717_s15]]   ;;  %s5721_s15 = smov 23  }
  0x19   :  { %7017 = sst [smem:[#allocation14_spill]] %s5852_s20 }
  0x1a   :  { %7018 = sst [smem:[#allocation15_spill]] %s5857_s27 }
  0x1b   :  { %7019 = sst [smem:[#allocation16_spill]] %s5862_s4 }
  0x1c   :  { %7020 = sst [smem:[#allocation17_spill]] %s5867_s14 }
  0x1d   :  { %s5877_s27 = sld [smem:[%s7003_s0 + %s5718_s22]]   ;;  %s5722_s22 = smov 24  }
  0x1e   :  { %7021 = sst [smem:[#allocation18_spill]] %s5872_s21 }
  0x1f   :  { %s5882_s4 = sld [smem:[%s7003_s0 + %s5719_s28]]   ;;  %s5723_s28 = smov 25  }
  0x20   :  { %s5887_s14 = sld [smem:[%s7003_s0 + %s5720_s7]]   ;;  %s5724_s7 = smov 26  }
  0x21   :  { %s5892_s21 = sld [smem:[%s7003_s0 + %s5721_s15]]   ;;  %s5725_s15 = smov 27  }
  0x23   :  { %7022 = sst [smem:[#allocation19_spill]] %s5877_s27 }
  0x24   :  { %s5897_s27 = sld [smem:[%s7003_s0 + %s5722_s22]]   ;;  %s5726_s22 = smov 28  }
  0x25   :  { %7023 = sst [smem:[#allocation20_spill]] %s5882_s4 }
  0x26   :  { %7024 = sst [smem:[#allocation21_spill]] %s5887_s14 }
  0x27   :  { %7025 = sst [smem:[#allocation22_spill]] %s5892_s21 }
  0x28   :  { %s5902_s4 = sld [smem:[%s7003_s0 + %s5723_s28]]   ;;  %s5727_s28 = smov 29  }
  0x29   :  { %s5907_s14 = sld [smem:[%s7003_s0 + %s5724_s7]]   ;;  %s5728_s7 = smov 30  }
  0x2a   :  { %7026 = sst [smem:[#allocation23_spill]] %s5897_s27 }
  0x2b   :  { %s5912_s21 = sld [smem:[%s7003_s0 + %s5725_s15]]   ;;  %s5729_s15 = smov 31  }
  0x2c   :  { %s5917_s27 = sld [smem:[%s7003_s0 + %s5726_s22]]   ;;  %s5730_s22 = smov 32  }
  0x2e   :  { %7027 = sst [smem:[#allocation24_spill]] %s5902_s4 }
  0x2f   :  { %7028 = sst [smem:[#allocation25_spill]] %s5907_s14 }
  0x30   :  { %s5922_s4 = sld [smem:[%s7003_s0 + %s5727_s28]]   ;;  %s5731_s28 = smov 33  }
  0x31   :  { %7029 = sst [smem:[#allocation26_spill]] %s5912_s21 }
  0x32   :  { %7030 = sst [smem:[#allocation27_spill]] %s5917_s27 }
  0x33   :  { %s5927_s14 = sld [smem:[%s7003_s0 + %s5728_s7]]   ;;  %s5732_s7 = smov 34  }
  0x34   :  { %s5932_s21 = sld [smem:[%s7003_s0 + %s5729_s15]]   ;;  %s5733_s15 = smov 35  }
  0x35   :  { %s5937_s27 = sld [smem:[%s7003_s0 + %s5730_s22]]   ;;  %s5734_s22 = smov 36  }
  0x36   :  { %7031 = sst [smem:[#allocation28_spill]] %s5922_s4 }
  0x37   :  { %s5942_s4 = sld [smem:[%s7003_s0 + %s5731_s28]]   ;;  %s5735_s28 = smov 37  }
  0x39   :  { %7032 = sst [smem:[#allocation29_spill]] %s5927_s14 }
  0x3a   :  { %7033 = sst [smem:[#allocation30_spill]] %s5932_s21 }
  0x3b   :  { %7034 = sst [smem:[#allocation31_spill]] %s5937_s27 }
  0x3c   :  { %s5947_s14 = sld [smem:[%s7003_s0 + %s5732_s7]]   ;;  %s5736_s7 = smov 38  }
  0x3d   :  { %7035 = sst [smem:[#allocation32_spill]] %s5942_s4 }
  0x3e   :  { %s5952_s21 = sld [smem:[%s7003_s0 + %s5733_s15]]   ;;  %s5737_s15 = smov 39  }
  0x3f   :  { %s5957_s27 = sld [smem:[%s7003_s0 + %s5734_s22]]   ;;  %s5738_s22 = smov 40  }
  0x40   :  { %s5962_s4 = sld [smem:[%s7003_s0 + %s5735_s28]]   ;;  %s5739_s28 = smov 41  }
  0x41   :  { %s5972_s17 = sld [smem:[%s7003_s0 + %s5737_s15]]   ;;  %s5741_s15 = smov 43  }
  0x42   :  { %7036 = sst [smem:[#allocation33_spill]] %s5947_s14 }
  0x43   :  { %s5967_s14 = sld [smem:[%s7003_s0 + %s5736_s7]]   ;;  %s5740_s7 = smov 42  }
  0x45   :  { %7037 = sst [smem:[#allocation34_spill]] %s5957_s27 }
  0x46   :  { %7038 = sst [smem:[#allocation35_spill]] %s5962_s4 }
  0x47   :  { %7040 = sst [smem:[#allocation37_spill]] %s5972_s17 }
  0x48   :  { %s5977_s27 = sld [smem:[%s7003_s0 + %s5738_s22]]   ;;  %s5742_s22 = smov 44  }
  0x49   :  { %7039 = sst [smem:[#allocation36_spill]] %s5967_s14 }
  0x4a   :  { %s5982_s4 = sld [smem:[%s7003_s0 + %s5739_s28]]   ;;  %s5743_s28 = smov 45  }
  0x4b   :  { %s5987_s14 = sld [smem:[%s7003_s0 + %s5740_s7]]   ;;  %s5744_s7 = smov 46  }
  0x4c   :  { %s5992_s17 = sld [smem:[%s7003_s0 + %s5741_s15]]   ;;  %s5745_s15 = smov 47  }
  0x4e   :  { %7041 = sst [smem:[#allocation38_spill]] %s5977_s27 }
  0x4f   :  { %s5997_s27 = sld [smem:[%s7003_s0 + %s5742_s22]]   ;;  %s5746_s22 = smov 48  }
  0x50   :  { %7042 = sst [smem:[#allocation39_spill]] %s5982_s4 }
  0x51   :  { %7043 = sst [smem:[#allocation40_spill]] %s5987_s14 }
  0x52   :  { %7044 = sst [smem:[#allocation41_spill]] %s5992_s17 }
  0x53   :  { %s6002_s4 = sld [smem:[%s7003_s0 + %s5743_s28]]   ;;  %s5747_s28 = smov 49  }
  0x54   :  { %s6007_s14 = sld [smem:[%s7003_s0 + %s5744_s7]]   ;;  %s5748_s7 = smov 50  }
  0x55   :  { %7045 = sst [smem:[#allocation42_spill]] %s5997_s27 }
  0x56   :  { %s6012_s17 = sld [smem:[%s7003_s0 + %s5745_s15]]   ;;  %s5749_s15 = smov 51  }
  0x57   :  { %s6017_s27 = sld [smem:[%s7003_s0 + %s5746_s22]]  }
  0x58   :  { %s6022_s20 = sld [smem:[%s7003_s0 + %s5747_s28]]  }
  0x59   :  { %s6032_s12 = sld [smem:[%s7003_s0 + %s5749_s15]]  }
  0x5a   :  { %7046 = sst [smem:[#allocation43_spill]] %s6007_s14 }
  0x5b   :  { %s6027_s14 = sld [smem:[%s7003_s0 + %s5748_s7]]  }
  0x5c   :  { %109 = vsyncpa [#allocation6], 0 }
  0x5d   :  { %110 = vsyncpa [#allocation5], 0  ;;  %s117_s22 = sshll.u32 %s5777_s5, 4  ;;  %s118_s22 = int_to_ptr.vmem [resolvable:$true] %s117_s22 }
  0x5e   :  { %s5653_s23 = scalar_lea.vmem %s118_s22, 16  ;;  %p5658_p1 = scmp.lt.s32.totalorder %s118_s22, %s118_s22 }
  0x5f   :  { %p5654_p0 = scmp.ne.s32.totalorder %s118_s22, %s5653_s23  ;;  %p5659_p2 = scmp.lt.s32.totalorder %s5653_s23, %s5653_s23 }
  0x61   :  { %p5660_p3 = por %p5659_p2, %p5658_p1 }
  0x63   :  { %p5661_p4 = pnand %p5660_p3, %p5654_p0 }
  0x65   :  { %5664 = shalt.err (!%p5661_p4)
}
  0x66   :  { %s5750_s26 = smov [#allocation4]  }
  0x67   :  { %120 = dma.vmem_to_smem %s118_s22, 16, %s5750_s26, [#allocation6]  }
  0x68   :  { %5691 = dma.done.wait [#allocation6], 16  }
  0x69   :  { %5692 = vsyncadd [#allocation6], 4294967280 }
  0x6a   :  { %222 = sfence }
  0x6b   :  { %v5455_v0 = vld [vmem:[%s5952_s21] sm:$0xff]   ;;  %v5751_v1 = vmov 0.0   ;;  %v5456_v2 = vld [vmem:[%s5952_s21 + $0x8] sm:$0xff]   ;;  %vm5752_vm0 = vmmov 0   ;;  %vm436_vm1 = vcmask 1043456   ;;  %vm377_vm2 = vcmask 261120  }
  0x6c   :  { %4917 = vmatprep.subr.bf16.mxu1 %v5751_v1  ;;  %4939 = vmatprep.subr.bf16.mxu0 %v5751_v1  ;;  %v352_v3 = vld [vmem:[%s5807_s29] sm:$0xff]  ;;  %v353_v4 = vld [vmem:[%s5807_s29 + $0x8] sm:$0xff]  ;;  %vm426_vm3 = vcmask 64512   ;;  %v356_v11 = vld [vmem:[%s5812_s3 + $0x10] sm:$0xff]  ;;  %s7047_s0 = sld [smem:[#allocation13_spill]]  ;;  %vm910_vm12 = vcmask 130048  }
  0x6d   :  { %4918 = vmatpush3.bf16.msra.mxu1 %v5455_v0  ;;  %4921 = vmatprep.mubr.msk.bf16.mxu1 %vm5752_vm0, %v5751_v1  ;;  %v425_v5 = vld [vmem:[%s5827_s19] sm:$0xf]  ;;  %v6048_v7 = vpack.c.bf16 %v353_v4, %v352_v3  ;;  %v355_v9 = vld [vmem:[%s5812_s3 + $0x8] sm:$0xff]  ;;  %v357_v12 = vld [vmem:[%s5812_s3 + $0x18] sm:$0xff]  ;;  %s5754_s5 = smov 127   ;;  %s7050_s21 = sld [smem:[#allocation11_spill]] }
  0x6e   :  { %4919 = vmatprep.subr.bf16.mxu1 %v5751_v1  ;;  %4941 = vmatprep.mubr.msk.bf16.mxu0 %vm5752_vm0, %v5751_v1  ;;  %v438_v6 = vsel %vm436_vm1, %v425_v5, 0  ;;  %v354_v8 = vld [vmem:[%s5812_s3] sm:$0xff]  ;;  %v6066_v13 = vpack.c.bf16 %v357_v12, %v356_v11  ;;  %v359_v15 = vld [vmem:[%s5812_s3 + $0x28] sm:$0xff]  ;;  %v312_v5 = vld [vmem:[%s5787_s13 + $0x10] sm:$0xff]  ;;  %s5756_s29 = smov 64   ;;  %s5758_s19 = smov 112  }
  0x6f   :  { %v6058_v10 = vpack.c.bf16 %v355_v9, %v354_v8  ;;  %v358_v14 = vld [vmem:[%s5812_s3 + $0x20] sm:$0xff]  ;;  %v5458_v20 = vld [vmem:[%s5837_s30 + $0x8] sm:$0xff]   ;;  %v313_v8 = vld [vmem:[%s5787_s13 + $0x18] sm:$0xff]  ;;  %s5757_s3 = smov 96   ;;  %s7055_s28 = sld [smem:[#allocation37_spill]] }
  0x70   :  { %v6074_v16 = vpack.c.bf16 %v359_v15, %v358_v14  ;;  %v522_v17 = vld [vmem:[%s5842_s6] sm:$0xf]  ;;  %v283_v63 = vld [vmem:[%s5782_s9 + $0x8] sm:$0xff]  ;;  %v285_v9 = vld [vmem:[%s5782_s9 + $0x18] sm:$0xff]  ;;  %s7053_s6 = sld [smem:[#allocation38_spill]]  ;;  %s7056_s1 = sld [smem:[#allocation17_spill]] }
  0x71   :  { %4920 = vmatpush3.bf16.msra.mxu1 %v5456_v2  ;;  %v527_v18 = vsel %vm436_vm1, %v522_v17, 0  ;;  %v5457_v19 = vld [vmem:[%s5837_s30] sm:$0xff]   ;;  %v5753_v2 = vmov 0   ;;  %v311_v3 = vld [vmem:[%s5787_s13 + $0x8] sm:$0xff]  ;;  %s5760_s30 = smov 32   ;;  %s7057_s2 = sld [smem:[#allocation15_spill]] }
  0x72   :  { %4925 = vmatprep.subr.bf16.mxu1 %v5751_v1  ;;  %4940 = vmatpush3.bf16.msra.mxu0 %v527_v18  ;;  %v573_v57 = vld [vmem:[%s5832_s24] sm:$0xf]  ;;  %s5759_s24 = smov 16   ;;  %s7058_s7 = sld [smem:[#allocation16_spill]] }
  0x73   :  { %4945 = vmatprep.subr.bf16.mxu0 %v5751_v1  ;;  %v584_v62 = vsel %vm436_vm1, %v573_v57, 0  ;;  %v282_v0 = vld [vmem:[%s5782_s9] sm:$0xff]  ;;  %5429 = vset.pattern.permute.xlu1 %v5753_v2  ;;  %s7059_s10 = sld [smem:[#allocation42_spill]]  ;;  %s5695_s15 = smov 0  }
  0x74   :  { %4922 = vmatmul.mubr.msk.bf16.vlgmr.msra.gmra.mrb[0].mxu1 %vm377_vm2, %v6048_v7  ;;  %5428 = vset.pattern.permute.xlu0 %v5753_v2  ;;  %v310_v4 = vld [vmem:[%s5787_s13] sm:$0xff]  ;;  %s7048_s13 = sld [smem:[#allocation14_spill]]  ;;  %s7060_s11 = sld [smem:[#allocation18_spill]] }
  0x75   :  { %4926 = vmatpush3.bf16.msra.mxu1 %v438_v6  ;;  %4927 = vmatprep.mubr.msk.bf16.mxu1 %vm5752_vm0, %v5751_v1  ;;  %v284_v6 = vld [vmem:[%s5782_s9 + $0x10] sm:$0xff]  ;;  %s5755_s9 = smov 126  }
  0x76   :  { %4959 = vmatprep.subr.bf16.mxu1 %v5751_v1  ;;  %290 = vperm.xlu1 %5429, %v283_v63  }
  0x77   :  { %287 = vperm.xlu0 %5428, %v282_v0  }
  0x7a   :  { %318 = vperm.xlu1 %5429, %v311_v3  }
  0x7b   :  { %315 = vperm.xlu0 %5428, %v310_v4  }
  0x7c   :  { %4928 = vmatmul.mubr.msk.bf16.vlgmr.msra.gmra.mrb[4].mxu1 %vm426_vm3, %v6058_v10 }
  0x7d   :  { %4931 = vmatprep.mubr.msk.bf16.mxu1 %vm5752_vm0, %v5751_v1  ;;  %4960 = vmatpush3.bf16.msra.mxu1 %v5457_v19  ;;  %v5459_v19 = vld [vmem:[%s6002_s4] sm:$0xff]  }
  0x7e   :  { %4961 = vmatprep.subr.bf16.mxu1 %v5751_v1  ;;  %321 = vperm.xlu1 %5429, %v312_v5  }
  0x7f   :  { %293 = vperm.xlu0 %5428, %v284_v6  }
  0x81   :  { %4962 = vmatpush3.bf16.msra.mxu1 %v5458_v20 }
  0x82   :  { %4967 = vmatprep.subr.bf16.mxu1 %v5751_v1  ;;  %324 = vperm.xlu1 %5429, %v313_v8  }
  0x83   :  { %296 = vperm.xlu0 %5428, %v285_v9  }
  0x84   :  { %4932 = vmatmul.mubr.msk.bf16.gmra.mrb[8].mxu1 %vm426_vm3, %v6066_v13 }
  0x85   :  { %4935 = vmatprep.mubr.msk.bf16.mxu1 %vm5752_vm0, %v5751_v1 }
  0x8c   :  { %4936 = vmatmul.mubr.msk.bf16.gmra.mrb[12].mxu1 %vm426_vm3, %v6074_v16 }
  0x8d   :  { %4963 = vmatprep.mubr.msk.bf16.mxu1 %vm5752_vm0, %v5751_v1 }
 0x147   :  { %v6087_v21 = vpop.f32.mrb[0].mxu1 }
 0x148   :  { %v4923_v22 = vpop.f32.mrb[1].mxu1 }
 0x149   :  { %v6089_v23 = vpop.f32.mrb[2].mxu1 }
 0x14a   :  { %v4924_v24 = vpop.f32.mrb[3].mxu1 }
 0x14b   :  { %v5460_v24 = vld [vmem:[%s6002_s4 + $0x8] sm:$0xff]   ;;  %s7054_s4 = sld [smem:[#allocation12_spill]] }
 0x14f   :  { %v474_v25 = vpop.f32.mrb[4].mxu1 }
 0x150   :  { %v4929_v26 = vpop.f32.mrb[5].mxu1  ;;  %v497_v31 = vmul.f32 %v474_v25, %v474_v25 }
 0x151   :  { %v477_v27 = vpop.f32.mrb[6].mxu1 }
 0x152   :  { %v570_v28 = vpack.c.bf16 %v477_v27, %v474_v25  ;;  %v4930_v29 = vpop.f32.mrb[7].mxu1  ;;  %v498_v35 = vmul.f32 %v477_v27, %v477_v27 }
 0x157   :  { %v482_v30 = vpop.f32.mrb[8].mxu1 }
 0x158   :  { %v499_v32 = vmul.f32 %v482_v30, %v482_v30  ;;  %v4933_v33 = vpop.f32.mrb[9].mxu1 }
 0x159   :  { %v485_v34 = vpop.f32.mrb[10].mxu1 }
 0x15a   :  { %v501_v36 = vadd.f32 %v499_v32, %v497_v31  ;;  %v500_v37 = vmul.f32 %v485_v34, %v485_v34  ;;  %v571_v38 = vpack.c.bf16 %v485_v34, %v482_v30  ;;  %v4934_v39 = vpop.f32.mrb[11].mxu1  ;;  %v796_v34 = vld [vmem:[%s6012_s17] sm:$0xf]  ;;  %s7049_s17 = sld [smem:[#allocation10_spill]] }
 0x15b   :  { %v224_v39 = vlaneseq }
 0x15c   :  { %v502_v40 = vadd.f32 %v500_v37, %v498_v35  ;;  %v807_v35 = vsel %vm436_vm1, %v796_v34, 0  ;;  %v1121_v37 = vld [vmem:[%s5817_s8 + $0x8] sm:$0xff] }
 0x15f   :  { %v490_v41 = vpop.f32.mrb[12].mxu1 }
 0x160   :  { %v503_v42 = vmul.f32 %v490_v41, %v490_v41  ;;  %v4937_v43 = vpop.f32.mrb[13].mxu1 }
 0x161   :  { %v493_v44 = vpop.f32.mrb[14].mxu1 }
 0x162   :  { %v505_v45 = vadd.f32 %v503_v42, %v501_v36  ;;  %v504_v46 = vmul.f32 %v493_v44, %v493_v44  ;;  %v572_v47 = vpack.c.bf16 %v493_v44, %v490_v41  ;;  %v4938_v48 = vpop.f32.mrb[15].mxu1  ;;  %v1120_v36 = vld [vmem:[%s5817_s8] sm:$0xff]  ;;  %v339_v41 = vshrl.u32 %v224_v39, 7  ;;  %s7052_s8 = sld [smem:[#allocation41_spill]] }
 0x164   :  { %5467 = vrsqrt.f32 %v505_v45  ;;  %v506_v49 = vadd.f32 %v504_v46, %v502_v40  ;;  %vm509_vm4 = vcmp.eq.f32.partialorder %v505_v45, inf  ;;  %v512_v55 = vand.u32 2147483648, %v505_v45  ;;  %v4598_v40 = vld [vmem:[%s5802_s25] ss:$0 sm:$0xff]  ;;  %s7051_s25 = sld [smem:[#allocation43_spill]] }
 0x165   :  { %vm511_vm6 = vcmp.eq.f32.partialorder %v505_v45, 0.0  ;;  %v340_v42 = vadd.s32 8, %v339_v41  ;;  %vm346_vm8 = vcmp.eq.s32.totalorder %v339_v41, %v4598_v40 }
 0x166   :  { %5469 = vrsqrt.f32 %v506_v49  ;;  %vm516_vm5 = vcmp.eq.f32.partialorder %v506_v49, inf  ;;  %v519_v56 = vand.u32 2147483648, %v506_v49  ;;  %vm518_vm7 = vcmp.eq.f32.partialorder %v506_v49, 0.0 }
 0x167   :  { %v6130_v43 = vsel %vm346_vm8, 1.0, %v5751_v1  ;;  %vm347_vm9 = vcmp.eq.s32.totalorder %v340_v42, %v4598_v40 }
 0x168   :  { %v6133_v44 = vsel %vm347_vm9, 1.0, %v5751_v1 }
 0x16e   :  { %v5468_v50 = vpop.eup %5467 }
 0x16f   :  { %v508_v51 = vmul.f32 %v5468_v50, %v505_v45 }
 0x170   :  { %v5470_v52 = vpop.eup %5469 }
 0x171   :  { %v510_v53 = vsel %vm509_vm4, %v505_v45, %v508_v51  ;;  %v515_v54 = vmul.f32 %v5470_v52, %v506_v49  ;;  %v4611_v45 = vld [vmem:[%s7047_s0] ss:$0 sm:$0xff] }
 0x172   :  { %v513_v59 = vsel %vm511_vm6, %v512_v55, %v510_v53 }
 0x173   :  { %v517_v58 = vsel %vm516_vm5, %v506_v49, %v515_v54 }
 0x174   :  { %v520_v60 = vsel %vm518_vm7, %v519_v56, %v517_v58 }
 0x175   :  { %v521_v61 = vpack.c.bf16 %v520_v60, %v513_v59 }
 0x177   :  { %4942 = vmatmul.mubr.msk.bf16.vlgmr.msra.gmra.mrb[0].mxu0 %vm426_vm3, %v521_v61 }
 0x178   :  { %4946 = vmatpush3.bf16.msra.mxu0 %v584_v62  ;;  %4947 = vmatprep.mubr.msk.bf16.mxu0 %vm5752_vm0, %v5751_v1 }
 0x17f   :  { %4948 = vmatmul.mubr.msk.bf16.vlgmr.msra.gmra.mrb[4].mxu0 %vm426_vm3, %v570_v28 }
 0x180   :  { %4951 = vmatprep.mubr.msk.bf16.mxu0 %vm5752_vm0, %v5751_v1 }
 0x187   :  { %4952 = vmatmul.mubr.msk.bf16.gmra.mrb[8].mxu0 %vm426_vm3, %v571_v38  ;;  %v5297_v38 = vpack.c.bf16 %v1121_v37, %v1120_v36 }
 0x188   :  { %4955 = vmatprep.mubr.msk.bf16.mxu0 %vm5752_vm0, %v5751_v1 }
 0x18f   :  { %4956 = vmatmul.mubr.msk.bf16.gmra.mrb[12].mxu0 %vm426_vm3, %v572_v47 }
 0x190   :  { %994 = vmatprep.mubr.f32.mxu0 %v5751_v1 }
 0x24a   :  { %v563_v11 = vpop.f32.mrb[0].mxu0 }
 0x24b   :  { %v564_v12 = vadd.f32 %v563_v11, %v6087_v21  ;;  %v4943_v14 = vpop.f32.mrb[1].mxu0 }
 0x24c   :  { %v566_v15 = vpop.f32.mrb[2].mxu0  ;;  %v288_v14 = vpop.permute.xlu0 %287 }
 0x24d   :  { %v567_v17 = vadd.f32 %v566_v15, %v6089_v23  ;;  %v4944_v18 = vpop.f32.mrb[3].mxu0  ;;  %v6143_v15 = vand.u32 127, %v224_v39 }
 0x24f   :  { %v643_v20 = vpack.c.bf16 %v567_v17, %v564_v12  ;;  %v291_v12 = vpop.permute.xlu1 %290  ;;  %vm298_vm10 = vcmp.eq.s32.totalorder %v6143_v15, %v288_v14 }
 0x250   :  { %v316_v18 = vpop.permute.xlu0 %315  ;;  %vm299_vm13 = vcmp.eq.s32.totalorder %v6143_v15, %v291_v12 }
 0x251   :  { %4964 = vmatmul.mubr.msk.bf16.vlgmr.msra.gmra.mrb[16].mxu1 %vm377_vm2, %v643_v20  ;;  %vm326_vm11 = vcmp.eq.s32.totalorder %v6143_v15, %v316_v18 }
 0x252   :  { %v620_v22 = vpop.f32.mrb[4].mxu0  ;;  %4968 = vmatpush3.bf16.msra.mxu1 %v5459_v19  ;;  %4971 = vmatprep.mubr.msk.bf16.mxu1 %vm5752_vm0, %v5751_v1  ;;  %v6151_v19 = vsel %vm298_vm10, 1.0, %v5751_v1 }
 0x253   :  { %v4949_v25 = vpop.f32.mrb[5].mxu0  ;;  %4969 = vmatprep.subr.bf16.mxu1 %v5751_v1  ;;  %v319_v17 = vpop.permute.xlu1 %318 }
 0x254   :  { %v623_v21 = vpop.f32.mrb[6].mxu0  ;;  %vm327_vm14 = vcmp.eq.s32.totalorder %v6143_v15, %v319_v17 }
 0x255   :  { %v4950_v26 = vpop.f32.mrb[7].mxu0 }
 0x256   :  { %4970 = vmatpush3.bf16.msra.mxu1 %v5460_v24  ;;  %v294_v24 = vpop.permute.xlu0 %293 }
 0x257   :  { %4975 = vmatprep.subr.bf16.mxu1 %v5751_v1  ;;  %vm300_vm4 = vcmp.eq.s32.totalorder %v6143_v15, %v294_v24 }
 0x259   :  { %4972 = vmatmul.mubr.msk.bf16.vlgmr.msra.gmra.mrb[20].mxu1 %vm377_vm2, %v643_v20  ;;  %v4594_v20 = vsel %vm326_vm11, 1.0, %v5751_v1 }
 0x25a   :  { %v628_v23 = vpop.f32.mrb[8].mxu0  ;;  %4977 = vmatprep.mubr.msk.bf16.mxu1 %vm5752_vm0, %v5751_v1  ;;  %4976 = vmatpush3.bf16.msra.mxu1 %v807_v35  ;;  %v1116_v25 = vsub.f32 %v6151_v19, %v4594_v20  ;;  %v297_v26 = vpop.permute.xlu0 %296 }
 0x25b   :  { %v4953_v27 = vpop.f32.mrb[9].mxu0  ;;  %5298 = vmatprep.subr.bf16.mxu1 %v5297_v38  ;;  %vm301_vm6 = vcmp.eq.s32.totalorder %v6143_v15, %v297_v26 }
 0x25c   :  { %v631_v28 = vpop.f32.mrb[10].mxu0  ;;  %v4595_v27 = vsel %vm327_vm14, 1.0, %v5751_v1 }
 0x25d   :  { %v4954_v29 = vpop.f32.mrb[11].mxu0 }
 0x25e   :  { %v6167_v29 = vsel %vm300_vm4, 1.0, %v5751_v1  ;;  %vm882_vm4 = vcmask 523264  }
 0x262   :  { %v636_v30 = vpop.f32.mrb[12].mxu0 }
 0x263   :  { %v4957_v31 = vpop.f32.mrb[13].mxu0 }
 0x264   :  { %v639_v32 = vpop.f32.mrb[14].mxu0 }
 0x265   :  { %v4958_v33 = vpop.f32.mrb[15].mxu0 }
 0x266   :  { %v6175_v33 = vsel %vm301_vm6, 1.0, %v5751_v1 }
 0x324   :  { %v704_v46 = vpop.f32.mrb[16].mxu1 }
 0x325   :  { %v705_v47 = vadd.f32 %v4611_v45, %v704_v46  ;;  %v4965_v48 = vpop.f32.mrb[17].mxu1 }
 0x326   :  { %v707_v49 = vpop.f32.mrb[18].mxu1 }
 0x327   :  { %v4615_v50 = vmul.f32 -1.442695, %v705_v47  ;;  %v708_v51 = vadd.f32 %v4611_v45, %v707_v49  ;;  %v4966_v52 = vpop.f32.mrb[19].mxu1 }
 0x329   :  { %5471 = vpow2.f32 %v4615_v50  ;;  %v4616_v53 = vmul.f32 -1.442695, %v708_v51 }
 0x32b   :  { %5473 = vpow2.f32 %v4616_v53 }
 0x32c   :  { %v6136_v54 = vpop.f32.mrb[20].mxu1 }
 0x32d   :  { %v4973_v55 = vpop.f32.mrb[21].mxu1 }
 0x32e   :  { %v6138_v56 = vpop.f32.mrb[22].mxu1 }
 0x32f   :  { %v4974_v57 = vpop.f32.mrb[23].mxu1 }
 0x333   :  { %v5472_v58 = vpop.eup %5471 }
 0x334   :  { %v717_v59 = vadd.f32 1.0, %v5472_v58 }
 0x335   :  { %v5474_v60 = vpop.eup %5473 }
 0x336   :  { %5475 = vrcp.f32 %v717_v59  ;;  %v718_v61 = vadd.f32 1.0, %v5474_v60 }
 0x338   :  { %5477 = vrcp.f32 %v718_v61 }
 0x340   :  { %v5476_v62 = vpop.eup %5475 }
 0x341   :  { %v723_v63 = vmul.f32 %v5476_v62, %v620_v22  ;;  %v725_v0 = vmul.f32 %v5476_v62, %v628_v23  ;;  %v727_v2 = vmul.f32 %v5476_v62, %v636_v30  ;;  %v322_v22 = vpop.permute.xlu1 %321  ;;  %v6162_v23 = vsel %vm299_vm13, 1.0, %v5751_v1 }
 0x342   :  { %v5478_v3 = vpop.eup %5477  ;;  %vm328_vm15 = vcmp.eq.s32.totalorder %v6143_v15, %v322_v22  ;;  %v1117_v30 = vsub.f32 %v6162_v23, %v4595_v27 }
 0x343   :  { %v724_v4 = vmul.f32 %v5478_v3, %v623_v21  ;;  %v726_v5 = vmul.f32 %v5478_v3, %v631_v28  ;;  %v728_v6 = vmul.f32 %v5478_v3, %v639_v32  ;;  %v4596_v28 = vsel %vm328_vm15, 1.0, %v5751_v1 }
 0x344   :  { %v1118_v31 = vsub.f32 %v6167_v29, %v4596_v28 }
 0x345   :  { %v793_v8 = vpack.c.bf16 %v724_v4, %v723_v63  ;;  %v794_v9 = vpack.c.bf16 %v726_v5, %v725_v0  ;;  %v795_v11 = vpack.c.bf16 %v728_v6, %v727_v2  ;;  %v325_v21 = vpop.permute.xlu1 %324 }
 0x346   :  { %vm329_vm5 = vcmp.eq.s32.totalorder %v6143_v15, %v325_v21 }
 0x347   :  { %4978 = vmatmul.mubr.msk.bf16.vlgmr.msra.gmra.mrb[24].mxu1 %vm426_vm3, %v793_v8  ;;  %v4597_v32 = vsel %vm329_vm5, 1.0, %v5751_v1  ;;  %vm885_vm5 = vcmask 785408  }
 0x348   :  { %5300 = vmatpush3.bf16.msra.mxu1 %v5297_v38  ;;  %4981 = vmatprep.mubr.msk.bf16.mxu1 %vm5752_vm0, %v5751_v1  ;;  %v1119_v34 = vsub.f32 %v6175_v33, %v4597_v32 }
 0x34f   :  { %4982 = vmatmul.mubr.msk.bf16.gmra.mrb[28].mxu1 %vm426_vm3, %v794_v9 }
 0x350   :  { %4985 = vmatprep.mubr.msk.bf16.mxu1 %vm5752_vm0, %v5751_v1 }
 0x357   :  { %4986 = vmatmul.mubr.msk.bf16.gmra.mrb[32].mxu1 %vm426_vm3, %v795_v11 }
 0x358   :  { %5003 = vmatprep.mubr.msk.f32.mxu1 %vm910_vm12, %v1116_v25 }
 0x35f   :  { %5004 = vmatmul.mubr.msk.f32.vlgmr.msra.gmra.mrb[36].mxu1 %vm910_vm12, %v1117_v30 }
 0x360   :  { %5006 = vmatprep.mubr.msk.f32.mxu1 %vm910_vm12, %v1118_v31 }
 0x363   :  { %5007 = vmatmul.mubr.msk.f32.gmra.mrb[38].mxu1 %vm910_vm12, %v1119_v34 }
 0x41a   :  { %v6181_v35 = vpop.f32.mrb[24].mxu1 }
 0x41b   :  { %v4979_v36 = vpop.f32.mrb[25].mxu1 }
 0x41c   :  { %v6183_v37 = vpop.f32.mrb[26].mxu1 }
 0x41d   :  { %v5430_v38 = vpack.i.bf16 %v6183_v37, %v6181_v35  ;;  %v4980_v39 = vpop.f32.mrb[27].mxu1 }
 0x422   :  { %v851_v40 = vpop.f32.mrb[28].mxu1 }
 0x423   :  { %v4983_v41 = vpop.f32.mrb[29].mxu1 }
 0x424   :  { %v854_v42 = vpop.f32.mrb[30].mxu1 }
 0x425   :  { %v6187_v45 = vpack.i.bf16 %v854_v42, %v851_v40  ;;  %v4984_v46 = vpop.f32.mrb[31].mxu1 }
 0x42a   :  { %v6189_v47 = vpop.f32.mrb[32].mxu1 }
 0x42b   :  { %v4987_v48 = vpop.f32.mrb[33].mxu1 }
 0x42c   :  { %v6191_v49 = vpop.f32.mrb[34].mxu1 }
 0x42d   :  { %v5450_v50 = vpack.i.bf16 %v6191_v49, %v6189_v47  ;;  %v5289_v51 = vpack.c.bf16 %v6191_v49, %v6189_v47  ;;  %v4988_v52 = vpop.f32.mrb[35].mxu1 }
 0x42f   :  { %5290 = vmatprep.subr.bf16.mxu0 %v5289_v51 }
 0x432   :  { %v6197_v53 = vpop.f32.mrb[36].mxu1 }
 0x433   :  { %v6199_v55 = vpop.f32.mrb[37].mxu1  ;;  %v1220_v57 = vmul.f32 %v6197_v53, %v6197_v53 }
 0x434   :  { %v1219_v58 = vmul.f32 %v6199_v55, %v6199_v55 }
 0x435   :  { %1229 = vrot.lane.b32.xlu1 %v1220_v57, %s5754_s5 }
 0x436   :  { %1227 = vrot.lane.b32.xlu0 %v1219_v58, %s5754_s5  ;;  %v6205_v59 = vpop.f32.mrb[38].mxu1 }
 0x437   :  { %v6207_v60 = vpop.f32.mrb[39].mxu1  ;;  %v1222_v61 = vmul.f32 %v6205_v59, %v6205_v59 }
 0x438   :  { %v1221_v62 = vmul.f32 %v6207_v60, %v6207_v60 }
 0x439   :  { %1245 = vrot.lane.b32.xlu1 %v1220_v57, %s5755_s9 }
 0x43a   :  { %1243 = vrot.lane.b32.xlu0 %v1219_v58, %s5755_s9 }
 0x43d   :  { %1233 = vrot.lane.b32.xlu1 %v1222_v61, %s5754_s5 }
 0x43e   :  { %1231 = vrot.lane.b32.xlu0 %v1221_v62, %s5754_s5 }
 0x441   :  { %1249 = vrot.lane.b32.xlu1 %v1222_v61, %s5755_s9 }
 0x442   :  { %1247 = vrot.lane.b32.xlu0 %v1221_v62, %s5755_s9 }
 0x445   :  { %1347 = vrot.lane.b32.xlu1 %v6197_v53, %s5754_s5 }
 0x446   :  { %1345 = vrot.lane.b32.xlu0 %v6199_v55, %s5754_s5 }
 0x449   :  { %1351 = vrot.lane.b32.xlu1 %v6205_v59, %s5754_s5 }
 0x44a   :  { %1349 = vrot.lane.b32.xlu0 %v6207_v60, %s5754_s5 }
 0x44d   :  { %1359 = vrot.lane.b32.xlu1 %v6197_v53, %s5755_s9 }
 0x44e   :  { %1357 = vrot.lane.b32.xlu0 %v6199_v55, %s5755_s9 }
 0x451   :  { %1363 = vrot.lane.b32.xlu1 %v6205_v59, %s5755_s9 }
 0x452   :  { %1361 = vrot.lane.b32.xlu0 %v6207_v60, %s5755_s9 }
 0x4a7   :  { %v1230_v63 = vpop.permute.xlu1 %1229 }
 0x4a8   :  { %v1228_v0 = vpop.permute.xlu0 %1227  ;;  %v1240_v2 = vadd.f32 %v1230_v63, %v1220_v57 }
 0x4a9   :  { %v1239_v3 = vadd.f32 %v1228_v0, %v1219_v58 }
 0x4ab   :  { %v1246_v4 = vpop.permute.xlu1 %1245 }
 0x4ac   :  { %v1256_v5 = vadd.f32 %v1246_v4, %v1240_v2  ;;  %v1244_v6 = vpop.permute.xlu0 %1243 }
 0x4ad   :  { %v1255_v8 = vadd.f32 %v1244_v6, %v1239_v3  ;;  %v5461_v6 = vld [vmem:[%s7048_s13] sm:$0xff]  }
 0x4ae   :  { %5479 = vrsqrt.f32 %v1256_v5  ;;  %vm1268_vm7 = vcmp.eq.f32.partialorder %v1256_v5, inf  ;;  %v1271_v26 = vand.u32 2147483648, %v1256_v5  ;;  %vm1270_vm8 = vcmp.eq.f32.partialorder %v1256_v5, 0.0  ;;  %5021 = vmatprep.subr.bf16.mxu1 %v5461_v6 }
 0x4af   :  { %5481 = vrsqrt.f32 %v1255_v8  ;;  %v1234_v9 = vpop.permute.xlu1 %1233  ;;  %vm1261_vm9 = vcmp.eq.f32.partialorder %v1255_v8, inf  ;;  %v1264_v30 = vand.u32 2147483648, %v1255_v8  ;;  %vm1263_vm10 = vcmp.eq.f32.partialorder %v1255_v8, 0.0  ;;  %5022 = vmatpush3.bf16.msra.mxu1 %v5461_v6 }
 0x4b0   :  { %v1232_v11 = vpop.permute.xlu0 %1231  ;;  %v1242_v12 = vadd.f32 %v1234_v9, %v1222_v61 }
 0x4b1   :  { %v1241_v14 = vadd.f32 %v1232_v11, %v1221_v62 }
 0x4b3   :  { %v1250_v17 = vpop.permute.xlu1 %1249 }
 0x4b4   :  { %v1258_v18 = vadd.f32 %v1250_v17, %v1242_v12  ;;  %v1248_v20 = vpop.permute.xlu0 %1247 }
 0x4b5   :  { %v1257_v22 = vadd.f32 %v1248_v20, %v1241_v14 }
 0x4b6   :  { %5483 = vrsqrt.f32 %v1258_v18  ;;  %vm1282_vm11 = vcmp.eq.f32.partialorder %v1258_v18, inf  ;;  %v1285_v46 = vand.u32 2147483648, %v1258_v18  ;;  %vm1284_vm13 = vcmp.eq.f32.partialorder %v1258_v18, 0.0 }
 0x4b7   :  { %5485 = vrsqrt.f32 %v1257_v22  ;;  %vm1275_vm14 = vcmp.eq.f32.partialorder %v1257_v22, inf  ;;  %v1278_v52 = vand.u32 2147483648, %v1257_v22  ;;  %vm1277_vm15 = vcmp.eq.f32.partialorder %v1257_v22, 0.0 }
 0x4b8   :  { %v5480_v24 = vpop.eup %5479 }
 0x4b9   :  { %v5482_v25 = vpop.eup %5481  ;;  %v1267_v21 = vmul.f32 %v5480_v24, %v1256_v5 }
 0x4ba   :  { %v1260_v27 = vmul.f32 %v5482_v25, %v1255_v8 }
 0x4bb   :  { %v1269_v28 = vsel %vm1268_vm7, %v1256_v5, %v1267_v21  ;;  %v1348_v5 = vpop.permute.xlu1 %1347 }
 0x4bc   :  { %v6221_v31 = vsel %vm1270_vm8, %v1271_v26, %v1269_v28  ;;  %v1262_v32 = vsel %vm1261_vm9, %v1255_v8, %v1260_v27  ;;  %v1346_v8 = vpop.permute.xlu0 %1345 }
 0x4bd   :  { %v1288_v34 = vadd.f32 1e-07, %v6221_v31  ;;  %v6224_v36 = vsel %vm1263_vm10, %v1264_v30, %v1262_v32  ;;  %v226_v30 = vld [vmem:[%s7049_s17] sm:$0xff]  ;;  %v227_v32 = vld [vmem:[%s7049_s17 + $0x8] sm:$0xff] }
 0x4be   :  { %v1287_v39 = vadd.f32 1e-07, %v6224_v36 }
 0x4bf   :  { %5487 = vrcp.f32 %v1288_v34  ;;  %v1352_v17 = vpop.permute.xlu1 %1351  ;;  %v229_v34 = vld [vmem:[%s7049_s17 + $0x18] sm:$0xff] }
 0x4c0   :  { %v5484_v40 = vpop.eup %5483  ;;  %5489 = vrcp.f32 %v1287_v39  ;;  %v228_v39 = vld [vmem:[%s7049_s17 + $0x10] sm:$0xff] }
 0x4c1   :  { %v5486_v41 = vpop.eup %5485  ;;  %v1281_v42 = vmul.f32 %v5484_v40, %v1258_v18  ;;  %v255_v40 = vld [vmem:[%s7050_s21 + $0x8] sm:$0xff] }
 0x4c2   :  { %v1274_v48 = vmul.f32 %v5486_v41, %v1257_v22  ;;  %v4617_v41 = vld [vmem:[%s7051_s25] ss:$0 sm:$0xff] }
 0x4c3   :  { %v1283_v51 = vsel %vm1282_vm11, %v1258_v18, %v1281_v42  ;;  %v1360_v24 = vpop.permute.xlu1 %1359  ;;  %v254_v42 = vld [vmem:[%s7050_s21] sm:$0xff]  ;;  %vm915_vm11 = vcmask 392192  }
 0x4c4   :  { %v6227_v57 = vsel %vm1284_vm13, %v1285_v46, %v1283_v51  ;;  %v1276_v58 = vsel %vm1275_vm14, %v1257_v22, %v1274_v48  ;;  %v6252_v46 = vadd.f32 %v4617_v41, %v6138_v56  ;;  %v257_v56 = vld [vmem:[%s7050_s21 + $0x18] sm:$0xff]  ;;  %vm1478_vm13 = vcmask 1041408  }
 0x4c5   :  { %v1290_v61 = vadd.f32 1e-07, %v6227_v57  ;;  %v6230_v62 = vsel %vm1277_vm15, %v1278_v52, %v1276_v58 }
 0x4c6   :  { %v1289_v63 = vadd.f32 1e-07, %v6230_v62 }
 0x4c7   :  { %5491 = vrcp.f32 %v1290_v61 }
 0x4c8   :  { %5493 = vrcp.f32 %v1289_v63 }
 0x4c9   :  { %v5488_v0 = vpop.eup %5487 }
 0x4ca   :  { %v5490_v2 = vpop.eup %5489  ;;  %v1370_v3 = vmul.f32 %v5488_v0, %v6197_v53  ;;  %v1374_v18 = vmul.f32 %v5488_v0, %v1348_v5  ;;  %v1350_v53 = vpop.permute.xlu0 %1349 }
 0x4cb   :  { %v1369_v4 = vmul.f32 %v5490_v2, %v6199_v55  ;;  %v1373_v20 = vmul.f32 %v5490_v2, %v1346_v8 }
 0x4cc   :  { %1389 = vperm.xlu1 %5429, %v1370_v3  }
 0x4cd   :  { %1384 = vperm.xlu0 %5428, %v1369_v4  }
 0x4ce   :  { %v1358_v25 = vpop.permute.xlu0 %1357 }
 0x4cf   :  { %v1377_v21 = vmul.f32 %v5490_v2, %v1358_v25 }
 0x4d1   :  { %v5492_v9 = vpop.eup %5491 }
 0x4d2   :  { %v5494_v11 = vpop.eup %5493  ;;  %v1372_v12 = vmul.f32 %v5492_v9, %v6205_v59  ;;  %v1376_v55 = vmul.f32 %v5492_v9, %v1352_v17  ;;  %v1378_v59 = vmul.f32 %v5488_v0, %v1360_v24  ;;  %v1362_v27 = vpop.permute.xlu0 %1361 }
 0x4d3   :  { %v1371_v14 = vmul.f32 %v5494_v11, %v6207_v60  ;;  %v1375_v22 = vmul.f32 %v5494_v11, %v1350_v53  ;;  %v1364_v60 = vpop.permute.xlu1 %1363  ;;  %v1379_v28 = vmul.f32 %v5494_v11, %v1362_v27 }
 0x4d4   :  { %1399 = vperm.xlu1 %5429, %v1372_v12   ;;  %v1380_v26 = vmul.f32 %v5492_v9, %v1364_v60 }
 0x4d5   :  { %1394 = vperm.xlu0 %5428, %v1371_v14  }
 0x4d8   :  { %1409 = vperm.xlu1 %5429, %v1374_v18  }
 0x4d9   :  { %1404 = vperm.xlu0 %5428, %v1373_v20  }
 0x4dc   :  { %1419 = vperm.xlu1 %5429, %v1376_v55  }
 0x4dd   :  { %1414 = vperm.xlu0 %5428, %v1375_v22  }
 0x4e0   :  { %1429 = vperm.xlu1 %5429, %v1378_v59  }
 0x4e1   :  { %1424 = vperm.xlu0 %5428, %v1377_v21  }
 0x4e4   :  { %1439 = vperm.xlu1 %5429, %v1380_v26  }
 0x4e5   :  { %1434 = vperm.xlu0 %5428, %v1379_v28  }
 0x4e8   :  { %5431 = vrot.lane.b32.xlu1 %v5430_v38, %s5756_s29  ;;  %v6255_v38 = vadd.f32 %v4617_v41, %v6136_v54  ;;  %v256_v54 = vld [vmem:[%s7050_s21 + $0x10] sm:$0xff] }
 0x4e9   :  { %231 = vperm.xlu0 %5428, %v226_v30  }
 0x4ea   :  { %v5440_v48 = vpack.i.bf16 %v6252_v46, %v6255_v38 }
 0x4ec   :  { %234 = vperm.xlu1 %5429, %v227_v32  }
 0x4ed   :  { %5436 = vrot.lane.b32.xlu0 %v6187_v45, %s5757_s3 }
 0x4f0   :  { %240 = vperm.xlu1 %5429, %v229_v34  }
 0x4f1   :  { %237 = vperm.xlu0 %5428, %v228_v39  }
 0x4f4   :  { %262 = vperm.xlu1 %5429, %v255_v40  }
 0x4f5   :  { %259 = vperm.xlu0 %5428, %v254_v42  }
 0x4f8   :  { %1303 = vperm.xlu1 %5429, %v6224_v36   ;;  %v4636_v36 = vld [vmem:[%s7052_s8] ss:$0 sm:$0xff] }
 0x4f9   :  { %5441 = vrot.lane.b32.xlu0 %v5440_v48, %s5758_s19 }
 0x4fc   :  { %5446 = vrot.lane.b32.xlu1 %v6187_v45, %s5759_s24 }
 0x4fd   :  { %1308 = vperm.xlu0 %5428, %v6221_v31  }
 0x500   :  { %1318 = vperm.xlu1 %5429, %v6227_v57  }
 0x501   :  { %1313 = vperm.xlu0 %5428, %v6230_v62  }
 0x504   :  { %265 = vperm.xlu1 %5429, %v256_v54  }
 0x505   :  { %5451 = vrot.lane.b32.xlu0 %v5450_v50, %s5760_s30 }
 0x509   :  { %268 = vperm.xlu0 %5428, %v257_v56   ;;  %v1299_v56 = vcvt.s32.f32 %v6143_v15 }
 0x54b   :  { %v1390_v51 = vpop.permute.xlu1 %1389 }
 0x54c   :  { %v1449_v52 = vmul.f32 %v4636_v36, %v1390_v51  ;;  %v1385_v45 = vpop.permute.xlu0 %1384 }
 0x54d   :  { %v1448_v58 = vmul.f32 %v4636_v36, %v1385_v45 }
 0x54f   :  { %v1596_v31 = vpack.c.bf16 %v1449_v52, %v1448_v58 }
 0x551   :  { %5023 = vmatprep.mubr.msk.bf16.mxu1 %vm910_vm12, %v1596_v31 }
 0x553   :  { %v1400_v57 = vpop.permute.xlu1 %1399 }
 0x554   :  { %v1451_v61 = vmul.f32 %v4636_v36, %v1400_v57  ;;  %v1395_v62 = vpop.permute.xlu0 %1394 }
 0x555   :  { %v1450_v63 = vmul.f32 %v4636_v36, %v1395_v62 }
 0x557   :  { %v1597_v0 = vpack.c.bf16 %v1451_v61, %v1450_v63  ;;  %v1410_v2 = vpop.permute.xlu1 %1409 }
 0x558   :  { %v1453_v3 = vmul.f32 %v4636_v36, %v1410_v2  ;;  %v1405_v4 = vpop.permute.xlu0 %1404 }
 0x559   :  { %v1452_v47 = vmul.f32 %v4636_v36, %v1405_v4  ;;  %5024 = vmatmul.mubr.msk.bf16.vlgmr.msra.gmra.mrb[40].mxu1 %vm910_vm12, %v1597_v0 }
 0x55b   :  { %v1598_v49 = vpack.c.bf16 %v1453_v3, %v1452_v47  ;;  %v1420_v50 = vpop.permute.xlu1 %1419 }
 0x55c   :  { %v1455_v5 = vmul.f32 %v4636_v36, %v1420_v50  ;;  %v1415_v6 = vpop.permute.xlu0 %1414 }
 0x55d   :  { %v1454_v8 = vmul.f32 %v4636_v36, %v1415_v6  ;;  %5027 = vmatprep.mubr.msk.bf16.mxu1 %vm910_vm12, %v1598_v49 }
 0x55f   :  { %v1599_v9 = vpack.c.bf16 %v1455_v5, %v1454_v8  ;;  %v1430_v11 = vpop.permute.xlu1 %1429 }
 0x560   :  { %v1457_v12 = vmul.f32 %v4636_v36, %v1430_v11  ;;  %v1425_v14 = vpop.permute.xlu0 %1424 }
 0x561   :  { %v1456_v17 = vmul.f32 %v4636_v36, %v1425_v14  ;;  %5028 = vmatmul.mubr.msk.bf16.gmra.mrb[44].mxu1 %vm910_vm12, %v1599_v9 }
 0x563   :  { %v1600_v18 = vpack.c.bf16 %v1457_v12, %v1456_v17  ;;  %v1440_v53 = vpop.permute.xlu1 %1439 }
 0x564   :  { %v1459_v20 = vmul.f32 %v4636_v36, %v1440_v53  ;;  %v1435_v55 = vpop.permute.xlu0 %1434 }
 0x565   :  { %v1458_v22 = vmul.f32 %v4636_v36, %v1435_v55  ;;  %5031 = vmatprep.mubr.msk.bf16.mxu1 %vm910_vm12, %v1600_v18 }
 0x567   :  { %v1601_v24 = vpack.c.bf16 %v1459_v20, %v1458_v22  ;;  %v5432_v25 = vpop.permute.xlu1 %5431 }
 0x568   :  { %v232_v59 = vpop.permute.xlu0 %231  ;;  %v5434_v21 = vunpack.i.h.bf16 %v5432_v25  ;;  %v5433_v60 = vunpack.i.l.bf16 %v5432_v25 }
 0x569   :  { %5032 = vmatmul.mubr.msk.bf16.gmra.mrb[48].mxu1 %vm910_vm12, %v1601_v24  ;;  %vm242_vm6 = vcmp.eq.s32.totalorder %v6143_v15, %v232_v59 }
 0x56a   :  { %v884_v32 = vsel %vm882_vm4, %v6252_v46, %v5434_v21  ;;  %v883_v34 = vsel %vm882_vm4, %v6255_v38, %v5433_v60  ;;  %v4582_v36 = vsel %vm242_vm6, 1.0, %v5751_v1  ;;  %v1300_v46 = vmul.f32 0.90909094, %v1299_v56 }
 0x56b   :  { %v235_v26 = vpop.permute.xlu1 %234  ;;  %vm1543_vm4 = vcmask 1045504   ;;  %vm1471_vm6 = vcmask 31744  }
 0x56c   :  { %v5437_v27 = vpop.permute.xlu0 %5436  ;;  %vm243_vm7 = vcmp.eq.s32.totalorder %v6143_v15, %v235_v26 }
 0x56d   :  { %v5439_v28 = vunpack.i.h.bf16 %v5437_v27  ;;  %v5438_v30 = vunpack.i.l.bf16 %v5437_v27  ;;  %v4583_v52 = vsel %vm243_vm7, 1.0, %v5751_v1  ;;  %vm1536_vm7 = vcmask 97280  }
 0x56f   :  { %v887_v39 = vsel %vm885_vm5, %v884_v32, %v5439_v28  ;;  %v886_v40 = vsel %vm885_vm5, %v883_v34, %v5438_v30  ;;  %v241_v41 = vpop.permute.xlu1 %240  ;;  %v1470_v28 = vld [vmem:[%s7053_s6] sm:$0x3] }
 0x570   :  { %v5291_v42 = vpack.c.bf16 %v887_v39, %v886_v40  ;;  %v238_v48 = vpop.permute.xlu0 %237  ;;  %vm245_vm9 = vcmp.eq.s32.totalorder %v6143_v15, %v241_v41  ;;  %v1480_v34 = vsel %vm1478_vm13, %v1470_v28, 0  ;;  %v1464_v39 = vld [vmem:[%s7054_s4] sm:$0xff]  ;;  %v1465_v40 = vld [vmem:[%s7054_s4 + $0x8] sm:$0xff] }
 0x571   :  { %vm244_vm8 = vcmp.eq.s32.totalorder %v6143_v15, %v238_v48  ;;  %v4585_v2 = vsel %vm245_vm9, 1.0, %v5751_v1  ;;  %v5462_v41 = vld [vmem:[%s7055_s28] sm:$0x3f]  }
 0x572   :  { %5292 = vmatpush1.bf16.msra.mxu0 %v5291_v42  ;;  %v4584_v57 = vsel %vm244_vm8, 1.0, %v5751_v1 }
 0x573   :  { %v6281_v54 = vpop.permute.xlu1 %262 }
 0x574   :  { %v260_v51 = vpop.permute.xlu0 %259  ;;  %vm271_vm14 = vcmp.eq.s32.totalorder %v6143_v15, %v6281_v54 }
 0x575   :  { %4624 = vmatmul.mubr.msk.f32.vlgmr.msra.gmra.mrb[16].mxu0 %vm910_vm12, %v4582_v36  ;;  %vm270_vm10 = vcmp.eq.s32.totalorder %v6143_v15, %v260_v51  ;;  %v4587_v42 = vsel %vm271_vm14, 1.0, %v5751_v1  ;;  %v1468_v36 = vpack.c.bf16 %v1465_v40, %v1464_v39  ;;  %v1466_v51 = vld [vmem:[%s7054_s4 + $0x10] sm:$0xff] }
 0x576   :  { %1000 = vmatprep.mubr.f32.mxu0 %v5751_v1  ;;  %v4586_v47 = vsel %vm270_vm10, 1.0, %v5751_v1 }
 0x577   :  { %v6288_v38 = vpop.permute.xlu1 %1303 }
 0x578   :  { %v5442_v45 = vpop.permute.xlu0 %5441  ;;  %v1321_v58 = vsub.f32 %v6288_v38, %v1300_v46 }
 0x579   :  { %4625 = vmatmul.mubr.msk.f32.gmra.mrb[18].mxu0 %vm910_vm12, %v4583_v52  ;;  %v5444_v49 = vunpack.i.h.bf16 %v5442_v45  ;;  %v5443_v5 = vunpack.i.l.bf16 %v5442_v45 }
 0x57a   :  { %1006 = vmatprep.mubr.f32.mxu0 %v5751_v1  ;;  %v1325_v63 = vmul.f32 -0.605, %v1321_v58 }
 0x57b   :  { %v5447_v31 = vpop.permute.xlu1 %5446  ;;  %v912_v17 = vsel %vm910_vm12, %v5444_v49, %v6183_v37  ;;  %v911_v20 = vsel %vm910_vm12, %v5443_v5, %v6181_v35  ;;  %v5465_v49 = vld [vmem:[%s7058_s7] sm:$0xff]  }
 0x57c   :  { %v6296_v61 = vpop.permute.xlu0 %1308  ;;  %v5449_v6 = vunpack.i.h.bf16 %v5447_v31  ;;  %v1329_v8 = vmul.f32 %v1325_v63, %v1321_v58  ;;  %v5448_v9 = vunpack.i.l.bf16 %v5447_v31  ;;  %v1545_v31 = vsel %vm1543_vm4, %v5462_v41, 0  ;;  %5055 = vmatprep.subr.bf16.mxu1 %v5465_v49 }
 0x57d   :  { %v1322_v62 = vsub.f32 %v6296_v61, %v1300_v46  ;;  %4626 = vmatmul.mubr.msk.f32.gmra.mrb[20].mxu0 %vm910_vm12, %v4584_v57  ;;  %5056 = vmatpush3.bf16.msra.mxu1 %v5465_v49 }
 0x57e   :  { %1012 = vmatprep.mubr.f32.mxu0 %v5751_v1  ;;  %v914_v55 = vsel %vm377_vm2, %v912_v17, %v5449_v6  ;;  %v1333_v24 = vmul.f32 1.442695, %v1329_v8  ;;  %v913_v25 = vsel %vm377_vm2, %v911_v20, %v5448_v9 }
 0x57f   :  { %v1326_v0 = vmul.f32 -0.605, %v1322_v62  ;;  %v6304_v3 = vpop.permute.xlu1 %1318 }
 0x580   :  { %v6306_v4 = vpop.permute.xlu0 %1313  ;;  %v1324_v11 = vsub.f32 %v6304_v3, %v1300_v46 }
 0x581   :  { %v1330_v50 = vmul.f32 %v1326_v0, %v1322_v62  ;;  %4627 = vmatmul.mubr.msk.f32.gmra.mrb[22].mxu0 %vm910_vm12, %v4585_v2  ;;  %v1323_v12 = vsub.f32 %v6306_v4, %v1300_v46  ;;  %v1467_v46 = vld [vmem:[%s7054_s4 + $0x18] sm:$0xff]  ;;  %v5463_v2 = vld [vmem:[%s7056_s1] sm:$0xff]  }
 0x582   :  { %4993 = vmatprep.mubr.msk.f32.mxu0 %vm910_vm12, %v4586_v47  ;;  %v1328_v59 = vmul.f32 -0.605, %v1324_v11  ;;  %v6341_v47 = vld [vmem:[%s7057_s2] sm:$0xff]  }
 0x583   :  { %v1335_v18 = vmul.f32 1.442695, %v1330_v50  ;;  %v1327_v60 = vmul.f32 -0.605, %v1323_v12  ;;  %v266_v37 = vpop.permute.xlu1 %265  ;;  %v5466_v50 = vld [vmem:[%s7058_s7 + $0x8] sm:$0xff]  }
 0x584   :  { %v5452_v14 = vpop.permute.xlu0 %5451  ;;  %v1332_v35 = vmul.f32 %v1328_v59, %v1324_v11  ;;  %vm272_vm15 = vcmp.eq.s32.totalorder %v6143_v15, %v266_v37  ;;  %5057 = vmatprep.subr.bf16.mxu1 %v5466_v50 }
 0x585   :  { %v5454_v53 = vunpack.i.h.bf16 %v5452_v14  ;;  %v5453_v22 = vunpack.i.l.bf16 %v5452_v14  ;;  %5495 = vpow2.f32 %v1335_v18  ;;  %v1331_v30 = vmul.f32 %v1327_v60, %v1323_v12  ;;  %5058 = vmatpush3.bf16.msra.mxu1 %v5466_v50 }
 0x586   :  { %5497 = vpow2.f32 %v1333_v24  ;;  %v1339_v48 = vmul.f32 1.442695, %v1332_v35  ;;  %v4588_v54 = vsel %vm272_vm15, 1.0, %v5751_v1 }
 0x587   :  { %v917_v21 = vsel %vm915_vm11, %v914_v55, %v5454_v53  ;;  %v916_v26 = vsel %vm915_vm11, %v913_v25, %v5453_v22  ;;  %v1337_v56 = vmul.f32 1.442695, %v1331_v30 }
 0x588   :  { %v5293_v27 = vpack.c.bf16 %v917_v21, %v916_v26  ;;  %v269_v32 = vpop.permute.xlu0 %268  ;;  %5499 = vpow2.f32 %v1339_v48 }
 0x589   :  { %vm273_vm5 = vcmp.eq.s32.totalorder %v6143_v15, %v269_v32  ;;  %v1469_v15 = vpack.c.bf16 %v1467_v46, %v1466_v51  ;;  %5501 = vpow2.f32 %v1337_v56 }
 0x58a   :  { %5294 = vmatprep.subr.bf16.mxu0 %v5293_v27  ;;  %v4589_v52 = vsel %vm273_vm5, 1.0, %v5751_v1 }
 0x58b   :  { %5296 = vmatpush3.bf16.msra.mxu0 %v5293_v27 }
 0x58c   :  { %5347 = vmatprep.subr.msk.bf16.mxu0 %vm1478_vm13, %v1470_v28 }
 0x58e   :  { %4994 = vmatmul.mubr.msk.f32.vlgmr.msra.gmra.mrb[24].mxu0 %vm910_vm12, %v4587_v42 }
 0x58f   :  { %4996 = vmatprep.mubr.msk.f32.mxu0 %vm910_vm12, %v4588_v54  ;;  %5010 = vmatpush3.bf16.msra.mxu0 %v1480_v34  ;;  %v5496_v45 = vpop.eup %5495 }
 0x590   :  { %5348 = vmatprep.subr.msk.bf16.mxu0 %vm1543_vm4, %v5462_v41  ;;  %v5498_v58 = vpop.eup %5497 }
 0x591   :  { %v1460_v57 = vpack.c.bf16 %v5496_v45, %v5498_v58 }
 0x592   :  { %4997 = vmatmul.mubr.msk.f32.gmra.mrb[26].mxu0 %vm910_vm12, %v4589_v52  ;;  %v5500_v62 = vpop.eup %5499 }
 0x593   :  { %5011 = vmatprep.mubr.msk.bf16.mxu0 %vm1471_vm6, %v1468_v36  ;;  %v5502_v63 = vpop.eup %5501 }
 0x594   :  { %v1461_v0 = vpack.c.bf16 %v5500_v62, %v5502_v63 }
 0x596   :  { %5012 = vmatmul.mubr.msk.bf16.vlgmr.msra.gmra.mrb[28].mxu0 %vm1471_vm6, %v1469_v15 }
 0x597   :  { %5017 = vmatprep.mubr.msk.bf16.mxu0 %vm1536_vm7, %v1460_v57  ;;  %5016 = vmatpush3.bf16.msra.mxu0 %v1545_v31 }
 0x598   :  { %5035 = vmatprep.subr.bf16.mxu0 %v5463_v2 }
 0x5a2   :  { %5018 = vmatmul.mubr.msk.bf16.vlgmr.msra.gmra.mrb[28].mxu0 %vm1536_vm7, %v1461_v0 }
 0x5a3   :  { %5036 = vmatpush3.bf16.msra.mxu0 %v5463_v2 }
 0x5a4   :  { %5041 = vmatprep.subr.bf16.mxu0 %v6341_v47 }
 0x62c   :  { %v6346_v5 = vpop.f32.mrb[40].mxu1 }
 0x62d   :  { %v6348_v6 = vpop.f32.mrb[41].mxu1  ;;  %v1711_v17 = vmul.f32 %v6346_v5, %v6346_v5 }
 0x62e   :  { %v6350_v8 = vpop.f32.mrb[42].mxu1  ;;  %v1709_v20 = vmul.f32 %v6348_v6, %v6348_v6 }
 0x62f   :  { %v1823_v9 = vpack.c.bf16 %v6350_v8, %v6346_v5  ;;  %v6354_v11 = vpop.f32.mrb[43].mxu1  ;;  %v1712_v24 = vmul.f32 %v6350_v8, %v6350_v8 }
 0x630   :  { %v1822_v12 = vpack.c.bf16 %v6354_v11, %v6348_v6  ;;  %v1710_v26 = vmul.f32 %v6354_v11, %v6354_v11 }
 0x634   :  { %v6358_v14 = vpop.f32.mrb[44].mxu1 }
 0x635   :  { %v1715_v18 = vmul.f32 %v6358_v14, %v6358_v14  ;;  %v6364_v53 = vpop.f32.mrb[45].mxu1 }
 0x636   :  { %v1713_v55 = vmul.f32 %v6364_v53, %v6364_v53  ;;  %v6370_v22 = vpop.f32.mrb[46].mxu1 }
 0x637   :  { %v1719_v25 = vadd.f32 %v1715_v18, %v1711_v17  ;;  %v1716_v59 = vmul.f32 %v6370_v22, %v6370_v22  ;;  %v1825_v21 = vpack.c.bf16 %v6370_v22, %v6358_v14  ;;  %v6378_v60 = vpop.f32.mrb[47].mxu1 }
 0x638   :  { %v1717_v37 = vadd.f32 %v1713_v55, %v1709_v20  ;;  %v1714_v27 = vmul.f32 %v6378_v60, %v6378_v60  ;;  %v1824_v28 = vpack.c.bf16 %v6378_v60, %v6364_v53 }
 0x639   :  { %v1720_v35 = vadd.f32 %v1716_v59, %v1712_v24 }
 0x63a   :  { %v1718_v30 = vadd.f32 %v1714_v27, %v1710_v26 }
 0x63c   :  { %v6386_v32 = vpop.f32.mrb[48].mxu1 }
 0x63d   :  { %v1723_v34 = vmul.f32 %v6386_v32, %v6386_v32  ;;  %v6390_v39 = vpop.f32.mrb[49].mxu1 }
 0x63e   :  { %v1721_v40 = vmul.f32 %v6390_v39, %v6390_v39  ;;  %v6394_v41 = vpop.f32.mrb[50].mxu1 }
 0x63f   :  { %v1727_v42 = vadd.f32 %v1723_v34, %v1719_v25  ;;  %v1724_v48 = vmul.f32 %v6394_v41, %v6394_v41  ;;  %v1827_v54 = vpack.c.bf16 %v6394_v41, %v6386_v32  ;;  %v6400_v56 = vpop.f32.mrb[51].mxu1 }
 0x640   :  { %v1725_v36 = vadd.f32 %v1721_v40, %v1717_v37  ;;  %v1722_v51 = vmul.f32 %v6400_v56, %v6400_v56  ;;  %v1826_v46 = vpack.c.bf16 %v6400_v56, %v6390_v39 }
 0x641   :  { %5503 = vrsqrt.f32 %v1727_v42  ;;  %v1728_v52 = vadd.f32 %v1724_v48, %v1720_v35  ;;  %vm1745_vm8 = vcmp.eq.f32.partialorder %v1727_v42, inf  ;;  %vm1747_vm13 = vcmp.eq.f32.partialorder %v1727_v42, 0.0 }
 0x642   :  { %5505 = vrsqrt.f32 %v1725_v36  ;;  %v1726_v45 = vadd.f32 %v1722_v51, %v1718_v30  ;;  %vm1731_vm9 = vcmp.eq.f32.partialorder %v1725_v36, inf  ;;  %vm1733_vm10 = vcmp.eq.f32.partialorder %v1725_v36, 0.0 }
 0x643   :  { %5507 = vrsqrt.f32 %v1728_v52  ;;  %v1734_v17 = vand.u32 2147483648, %v1725_v36  ;;  %v1748_v20 = vand.u32 2147483648, %v1727_v42  ;;  %vm1752_vm14 = vcmp.eq.f32.partialorder %v1728_v52, inf }
 0x644   :  { %5509 = vrsqrt.f32 %v1726_v45  ;;  %v1755_v59 = vand.u32 2147483648, %v1728_v52  ;;  %vm1738_vm15 = vcmp.eq.f32.partialorder %v1726_v45, inf  ;;  %v1741_v37 = vand.u32 2147483648, %v1726_v45 }
 0x645   :  { %vm1754_vm4 = vcmp.eq.f32.partialorder %v1728_v52, 0.0  ;;  %vm1740_vm5 = vcmp.eq.f32.partialorder %v1726_v45, 0.0 }
 0x648   :  { %v6406_v15 = vpop.f32.mrb[16].mxu0 }
 0x649   :  { %v6408_v58 = vpop.f32.mrb[17].mxu0 }
 0x64b   :  { %v5504_v31 = vpop.eup %5503 }
 0x64c   :  { %v5506_v57 = vpop.eup %5505  ;;  %v6410_v62 = vpop.f32.mrb[18].mxu0  ;;  %v1744_v63 = vmul.f32 %v5504_v31, %v1727_v42 }
 0x64d   :  { %v5508_v0 = vpop.eup %5507  ;;  %v6412_v2 = vpop.f32.mrb[19].mxu0  ;;  %v1730_v49 = vmul.f32 %v5506_v57, %v1725_v36 }
 0x64e   :  { %v5510_v50 = vpop.eup %5509  ;;  %v1746_v18 = vsel %vm1745_vm8, %v1727_v42, %v1744_v63  ;;  %v1751_v55 = vmul.f32 %v5508_v0, %v1728_v52  ;;  %v4668_v42 = vld [vmem:[%s7059_s10] ss:$0 sm:$0xff] }
 0x64f   :  { %v1732_v24 = vsel %vm1731_vm9, %v1725_v36, %v1730_v49  ;;  %v1737_v25 = vmul.f32 %v5510_v50, %v1726_v45  ;;  %v1749_v34 = vsel %vm1747_vm13, %v1748_v20, %v1746_v18  ;;  %v2064_v60 = vmul.f32 %v4668_v42, %v6306_v4 }
 0x650   :  { %v6414_v26 = vpop.f32.mrb[20].mxu0  ;;  %v1753_v27 = vsel %vm1752_vm14, %v1728_v52, %v1751_v55  ;;  %v1735_v48 = vsel %vm1733_vm10, %v1734_v17, %v1732_v24  ;;  %v2063_v52 = vmul.f32 %v4668_v42, %v6296_v61  ;;  %v2065_v61 = vmul.f32 %v4668_v42, %v6304_v3 }
 0x651   :  { %v6416_v35 = vpop.f32.mrb[21].mxu0  ;;  %v1739_v30 = vsel %vm1738_vm15, %v1726_v45, %v1737_v25  ;;  %v1756_v40 = vsel %vm1754_vm4, %v1755_v59, %v1753_v27  ;;  %v5761_v59 = vmov -1e+30  }
 0x652   :  { %v1742_v51 = vsel %vm1740_vm5, %v1741_v37, %v1739_v30  ;;  %v1758_v31 = vpack.c.bf16 %v1756_v40, %v1749_v34  ;;  %2074 = vst.msk [vmem:[#allocation3] sm:$0xff] %vm910_vm12, %v5761_v59  ;;  %2075 = vst.msk [vmem:[#allocation3 + $0x8] sm:$0xff] %vm910_vm12, %v5761_v59  ;;  %v4659_v37 = vld [vmem:[%s7060_s11] ss:$0 sm:$0xff] }
 0x653   :  { %v1757_v57 = vpack.c.bf16 %v1742_v51, %v1735_v48 }
 0x654   :  { %v6420_v63 = vpop.f32.mrb[22].mxu0 }
 0x655   :  { %v6422_v0 = vpop.f32.mrb[23].mxu0  ;;  %5037 = vmatprep.mubr.msk.bf16.mxu0 %vm910_vm12, %v1757_v57 }
 0x656   :  { %5038 = vmatmul.mubr.msk.bf16.vlgmr.msra.gmra.mrb[28].mxu0 %vm910_vm12, %v1758_v31 }
 0x657   :  { %5043 = vmatprep.mubr.msk.bf16.mxu0 %vm910_vm12, %v1822_v12  ;;  %5042 = vmatpush3.bf16.msra.mxu0 %v6341_v47  ;;  %v2062_v47 = vmul.f32 %v4668_v42, %v6288_v38 }
 0x65e   :  { %5044 = vmatmul.mubr.msk.bf16.vlgmr.msra.gmra.mrb[32].mxu0 %vm910_vm12, %v1823_v9 }
 0x65f   :  { %5047 = vmatprep.mubr.msk.bf16.mxu0 %vm910_vm12, %v1824_v28 }
 0x661   :  { %v6440_v36 = vpop.f32.mrb[24].mxu0 }
 0x662   :  { %v2052_v6 = vadd.f32 %v6440_v36, %v6410_v62  ;;  %v6445_v11 = vpop.f32.mrb[25].mxu0 }
 0x663   :  { %v2051_v5 = vadd.f32 %v6445_v11, %v6406_v15 }
 0x664   :  { %v6450_v8 = vadd.f32 %v2063_v52, %v2052_v6 }
 0x665   :  { %v6452_v9 = vadd.f32 %v2062_v47, %v2051_v5  ;;  %v6454_v12 = vpop.f32.mrb[26].mxu0 }
 0x666   :  { %5048 = vmatmul.mubr.msk.bf16.gmra.mrb[36].mxu0 %vm910_vm12, %v1825_v21  ;;  %2071 = vst.msk [vmem:[#allocation2 + $0x8] sm:$0xff] %vm910_vm12, %v6450_v8  ;;  %v2054_v38 = vadd.f32 %v6454_v12, %v6420_v63  ;;  %v6465_v53 = vpop.f32.mrb[27].mxu0 }
 0x667   :  { %5051 = vmatprep.mubr.msk.bf16.mxu0 %vm910_vm12, %v1826_v46  ;;  %2070 = vst.msk [vmem:[#allocation2] sm:$0xff] %vm910_vm12, %v6452_v9  ;;  %v2053_v3 = vadd.f32 %v6465_v53, %v6414_v26 }
 0x668   :  { %v6476_v14 = vadd.f32 %v2065_v61, %v2054_v38 }
 0x669   :  { %v6478_v22 = vadd.f32 %v2064_v60, %v2053_v3 }
 0x66a   :  { %2073 = vst.msk [vmem:[#allocation2 + $0x18] sm:$0xff] %vm910_vm12, %v6476_v14 }
 0x66b   :  { %2072 = vst.msk [vmem:[#allocation2 + $0x10] sm:$0xff] %vm910_vm12, %v6478_v22 }
 0x66e   :  { %5052 = vmatmul.mubr.msk.bf16.gmra.mrb[40].mxu0 %vm910_vm12, %v1827_v54 }
 0x729   :  { %v5039_v4 = vpop.f32.mrb[28].mxu0 }
 0x72a   :  { %v1807_v21 = vpop.f32.mrb[29].mxu0 }
 0x72b   :  { %v5040_v28 = vpop.f32.mrb[30].mxu0 }
 0x72c   :  { %v6488_v39 = vpack.c.bf16 %v5040_v28, %v5039_v4  ;;  %v1810_v56 = vpop.f32.mrb[31].mxu0 }
 0x72d   :  { %v6490_v46 = vpack.c.bf16 %v1810_v56, %v1807_v21 }
 0x72f   :  { %5059 = vmatprep.mubr.msk.bf16.mxu1 %vm377_vm2, %v6490_v46 }
 0x730   :  { %5060 = vmatmul.mubr.msk.bf16.vlgmr.msra.gmra.mrb[52].mxu1 %vm377_vm2, %v6488_v39 }
 0x731   :  { %v5045_v45 = vpop.f32.mrb[32].mxu0 }
 0x732   :  { %v1888_v49 = vpop.f32.mrb[33].mxu0 }
 0x733   :  { %v5046_v32 = vpop.f32.mrb[34].mxu0 }
 0x734   :  { %v1891_v41 = vpop.f32.mrb[35].mxu0 }
 0x739   :  { %v5049_v54 = vpop.f32.mrb[36].mxu0 }
 0x73a   :  { %v1904_v50 = vpop.f32.mrb[37].mxu0 }
 0x73b   :  { %v5050_v17 = vpop.f32.mrb[38].mxu0 }
 0x73c   :  { %v1907_v18 = vpop.f32.mrb[39].mxu0 }
 0x741   :  { %v5053_v20 = vpop.f32.mrb[40].mxu0 }
 0x742   :  { %v1920_v55 = vpop.f32.mrb[41].mxu0 }
 0x743   :  { %v5054_v24 = vpop.f32.mrb[42].mxu0 }
 0x744   :  { %v1923_v25 = vpop.f32.mrb[43].mxu0 }
 0x803   :  { %v5061_v27 = vpop.f32.mrb[52].mxu1 }
 0x804   :  { %v2009_v30 = vadd.f32 %v5061_v27, %v4659_v37  ;;  %v2000_v34 = vpop.f32.mrb[53].mxu1 }
 0x805   :  { %v2001_v40 = vadd.f32 %v4659_v37, %v2000_v34  ;;  %v5062_v48 = vpop.f32.mrb[54].mxu1 }
 0x806   :  { %v4666_v51 = vmul.f32 -1.442695, %v2009_v30  ;;  %v2012_v31 = vadd.f32 %v5062_v48, %v4659_v37  ;;  %v2003_v57 = vpop.f32.mrb[55].mxu1 }
 0x807   :  { %v4664_v42 = vmul.f32 -1.442695, %v2001_v40  ;;  %v2004_v52 = vadd.f32 %v4659_v37, %v2003_v57 }
 0x808   :  { %5511 = vpow2.f32 %v4666_v51  ;;  %v4667_v6 = vmul.f32 -1.442695, %v2012_v31 }
 0x809   :  { %5513 = vpow2.f32 %v4664_v42  ;;  %v4665_v47 = vmul.f32 -1.442695, %v2004_v52 }
 0x80a   :  { %5515 = vpow2.f32 %v4667_v6 }
 0x80b   :  { %5517 = vpow2.f32 %v4665_v47 }
 0x812   :  { %v5512_v5 = vpop.eup %5511 }
 0x813   :  { %v5514_v61 = vpop.eup %5513  ;;  %v2029_v38 = vadd.f32 1.0, %v5512_v5 }
 0x814   :  { %v5516_v60 = vpop.eup %5515  ;;  %v2027_v3 = vadd.f32 1.0, %v5514_v61 }
 0x815   :  { %v5518_v4 = vpop.eup %5517  ;;  %5519 = vrcp.f32 %v2029_v38  ;;  %v2030_v21 = vadd.f32 1.0, %v5516_v60 }
 0x816   :  { %5521 = vrcp.f32 %v2027_v3  ;;  %v2028_v28 = vadd.f32 1.0, %v5518_v4 }
 0x817   :  { %5523 = vrcp.f32 %v2030_v21 }
 0x818   :  { %5525 = vrcp.f32 %v2028_v28 }
 0x81f   :  { %v5520_v56 = vpop.eup %5519 }
 0x820   :  { %v5522_v59 = vpop.eup %5521  ;;  %v6499_v37 = vmul.f32 %v5520_v56, %v5045_v45  ;;  %v6501_v27 = vmul.f32 %v5520_v56, %v5049_v54  ;;  %v6503_v30 = vmul.f32 %v5520_v56, %v5053_v20 }
 0x821   :  { %v5524_v34 = vpop.eup %5523  ;;  %v6505_v40 = vmul.f32 %v5522_v59, %v1888_v49  ;;  %v6507_v48 = vmul.f32 %v5522_v59, %v1904_v50  ;;  %v6509_v51 = vmul.f32 %v5522_v59, %v1920_v55 }
 0x822   :  { %v5526_v31 = vpop.eup %5525  ;;  %v6511_v57 = vmul.f32 %v5524_v34, %v5046_v32  ;;  %v6513_v42 = vmul.f32 %v5524_v34, %v5050_v17  ;;  %v6515_v52 = vmul.f32 %v5524_v34, %v5054_v24 }
 0x823   :  { %v6517_v45 = vmul.f32 %v5526_v31, %v1891_v41  ;;  %v6519_v54 = vmul.f32 %v5526_v31, %v1907_v18  ;;  %v6521_v20 = vmul.f32 %v5526_v31, %v1923_v25 }
 0x824 LB: > { %s2082_s16 = sld [smem:[#allocation4 + %s5697_s15]]  ;;  %s2085_s18 = scalar_lea.vmem [#allocation2], %s5697_s15  ;;  %vm2088_vm6 = vcmask 122880   ;;  %s5697_s15 = sphi %s5695_s15, %s2081_s15  }
 0x825   : > { %v2086_v49 = vld [vmem:[%s2085_s18] sm:$0x1]  ;;  %s2081_s15 = sadd.s32 1, %s5697_s15  }
 0x826   : > { %p2078_p5 = scmp.ge.s32.totalorder %s2081_s15, 32  }
 0x827   :  { %5067 = vmatprep.mubr.msk.f32.mxu1 (%p2078_p5), %vm910_vm12, %v6151_v19  ;;  %5088 = vmatprep.mubr.msk.f32.mxu0 (%p2078_p5), %vm910_vm12, %v6151_v19  ;;  %s5762_s23 = smov (%p2078_p5), 80   ;;  %s7061_s26 = sld [smem:[#allocation40_spill]] (%p2078_p5) }
 0x828   :  { %2080 = sbr.rel (!%p2078_p5) target bundleno = 2084 (0x824), region = 292  ;;  %2395 = vrot.lane.b32.xlu0 (%p2078_p5), %v6445_v11, %s5762_s23  ;;  %2399 = vrot.lane.b32.xlu1 (%p2078_p5), %v6465_v53, %s5762_s23  ;;  %s7063_s0 = sld [smem:[#allocation19_spill]] (%p2078_p5) }
 0x829   :  { %s7064_s5 = sld [smem:[#allocation20_spill]] (%p2078_p5)  ;;  %s7065_s9 = sld [smem:[#allocation22_spill]] (%p2078_p5) }
 0x82a   : > { %s2083_s22 = scalar_lea.vmem [#allocation3], %s2082_s16  ;;  %s7066_s13 = sld [smem:[#allocation21_spill]] (%p2078_p5) }
 0x82b   : > { %v2084_v32 = vld [vmem:[%s2083_s22] sm:$0x1]  ;;  %s7067_s17 = sld [smem:[#allocation23_spill]] (%p2078_p5)  ;;  %s5764_s21 = smov (%p2078_p5), 40  }
 0x82c   : > { %v2087_v50 = vmax.f32 %v2084_v32, %v2086_v49  ;;  %2397 = vrot.lane.b32.xlu0 (%p2078_p5), %v6440_v36, %s5762_s23  ;;  %2401 = vrot.lane.b32.xlu1 (%p2078_p5), %v6454_v12, %s5762_s23  ;;  %s7068_s25 = sld [smem:[#allocation24_spill]] (%p2078_p5)  ;;  %s7070_s8 = sld [smem:[#allocation27_spill]] (%p2078_p5) }
 0x82d   :  { %s5765_s24 = smov (%p2078_p5), 120   ;;  %s7073_s6 = sld [smem:[#allocation36_spill]] (%p2078_p5) }
 0x82e   : > { %2089 = vst.msk [vmem:[%s2083_s22] sm:$0x1] %vm2088_vm6, %v2087_v50  ;;  %s7075_s4 = sld [smem:[#allocation28_spill]] (%p2078_p5)  ;;  %s7076_s28 = sld [smem:[#allocation30_spill]] (%p2078_p5) }
 0x82f   :  { %s7077_s1 = sld [smem:[#allocation32_spill]]  ;;  %s7078_s2 = sld [smem:[#allocation31_spill]] }
 0x830   :  { %2431 = vrot.lane.b32.xlu0 %v6445_v11, %s5757_s3  ;;  %2433 = vrot.lane.b32.xlu1 %v6440_v36, %s5757_s3  ;;  %s7079_s7 = sld [smem:[#allocation39_spill]]  ;;  %s7080_s10 = sld [smem:[#allocation33_spill]] }
 0x831   :  { %s5766_s11 = smov [#allocation7]  }
 0x832   :  { %s4508_s15 = sshll.u32 %s5766_s11, 4  ;;  %s4509_s15 = int_to_ptr.vmem [resolvable:$true] %s4508_s15 }
 0x833   :  { %s5665_s16 = scalar_lea.vmem %s4509_s15, 256  ;;  %p5670_p7 = scmp.lt.s32.totalorder %s4509_s15, %s4509_s15 }
 0x834   :  { %2435 = vrot.lane.b32.xlu0 %v6465_v53, %s5757_s3  ;;  %2437 = vrot.lane.b32.xlu1 %v6454_v12, %s5757_s3  ;;  %p5666_p6 = scmp.ne.s32.totalorder %s4509_s15, %s5665_s16  ;;  %p5671_p8 = scmp.lt.s32.totalorder %s5665_s16, %s5665_s16 }
 0x835   :  { %v2090_v41 = vld [vmem:[#allocation3] sm:$0xff]  ;;  %v2091_v17 = vld [vmem:[#allocation3 + $0x8] sm:$0xff] }
 0x836   :  { %v5301_v18 = vpack.c.bf16 %v2091_v17, %v2090_v41  ;;  %p5672_p9 = por %p5671_p8, %p5670_p7 }
 0x838   :  { %5302 = vmatprep.subr.bf16.mxu1 %v5301_v18  ;;  %2379 = vrot.lane.b32.xlu0 %v6445_v11, %s5756_s29  ;;  %p5673_p10 = pnand %p5672_p9, %p5666_p6 }
 0x839   :  { %5304 = vmatpush3.bf16.msra.mxu1 %v5301_v18  ;;  %2381 = vrot.lane.b32.xlu1 %v6440_v36, %s5756_s29 }
 0x83c   :  { %5068 = vmatmul.mubr.msk.f32.vlgmr.msra.gmra.mrb[56].mxu1 %vm910_vm12, %v6162_v23  ;;  %2383 = vrot.lane.b32.xlu0 %v6465_v53, %s5756_s29 }
 0x83d   :  { %5070 = vmatprep.mubr.msk.f32.mxu1 %vm910_vm12, %v6167_v29  ;;  %2385 = vrot.lane.b32.xlu1 %v6454_v12, %s5756_s29 }
 0x840   :  { %5071 = vmatmul.mubr.msk.f32.gmra.mrb[58].mxu1 %vm910_vm12, %v6175_v33 }
 0x841   :  { %5081 = vmatprep.mubr.msk.f32.mxu1 %vm377_vm2, %v6130_v43 }
 0x89a   :  { %v2396_v19 = vpop.permute.xlu0 %2395  ;;  %v2400_v6 = vpop.permute.xlu1 %2399 }
 0x89b   :  { %v2407_v36 = vmul.f32 %v2396_v19, %v6406_v15  ;;  %v2409_v12 = vmul.f32 %v2400_v6, %v6414_v26 }
 0x89e   :  { %v2398_v55 = vpop.permute.xlu0 %2397  ;;  %v2402_v5 = vpop.permute.xlu1 %2401 }
 0x89f   :  { %v2408_v38 = vmul.f32 %v2398_v55, %v6410_v62  ;;  %v2410_v60 = vmul.f32 %v2402_v5, %v6420_v63  ;;  %v5558_v5 = vld [vmem:[%s6017_s27 + $0x8] sm:$0xff]  }
 0x8a2   :  { %v2432_v24 = vpop.permute.xlu0 %2431  ;;  %v2434_v53 = vpop.permute.xlu1 %2433 }
 0x8a3   :  { %v2443_v25 = vmul.f32 %v2432_v24, %v6408_v58  ;;  %v2444_v61 = vmul.f32 %v2434_v53, %v6412_v2 }
 0x8a5   :  { %2451 = vrot.lane.b32.xlu0 %v2443_v25, %s5756_s29  ;;  %2453 = vrot.lane.b32.xlu1 %v2444_v61, %s5756_s29 }
 0x8a6   :  { %v2436_v47 = vpop.permute.xlu0 %2435  ;;  %v2438_v3 = vpop.permute.xlu1 %2437 }
 0x8a7   :  { %v2445_v11 = vmul.f32 %v2436_v47, %v6416_v35  ;;  %v2446_v4 = vmul.f32 %v2438_v3, %v6422_v0  ;;  %v5557_v47 = vld [vmem:[%s6017_s27] sm:$0xff]   ;;  %s5763_s27 = smov 48  }
 0x8a9   :  { %2455 = vrot.lane.b32.xlu0 %v2445_v11, %s5756_s29  ;;  %2417 = vrot.lane.b32.xlu1 %v2408_v38, %s5757_s3 }
 0x8aa   :  { %v2380_v19 = vpop.permute.xlu0 %2379 }
 0x8ad   :  { %2415 = vrot.lane.b32.xlu0 %v2407_v36, %s5757_s3  ;;  %2421 = vrot.lane.b32.xlu1 %v2410_v60, %s5757_s3 }
 0x8ae   :  { %v2384_v55 = vpop.permute.xlu0 %2383 }
 0x8af   :  { %v2393_v38 = vmul.f32 %v2384_v55, %v6414_v26 }
 0x8b1   :  { %2419 = vrot.lane.b32.xlu0 %v2409_v12, %s5757_s3  ;;  %2457 = vrot.lane.b32.xlu1 %v2446_v4, %s5756_s29  ;;  %v2391_v12 = vmul.f32 %v2380_v19, %v6406_v15  ;;  %s7069_s29 = sld [smem:[#allocation35_spill]] }
 0x90f   :  { %v5069_v21 = vpop.f32.mrb[56].mxu1 }
 0x910   :  { %v2190_v28 = vsub.f32 %v6450_v8, %v5069_v21  ;;  %v2170_v56 = vpop.f32.mrb[57].mxu1 }
 0x911   :  { %v2189_v59 = vsub.f32 %v6452_v9, %v2170_v56 }
 0x912   :  { %v2195_v34 = vmul.f32 1.442695, %v2190_v28 }
 0x913   :  { %v2193_v31 = vmul.f32 1.442695, %v2189_v59  ;;  %v5072_v49 = vpop.f32.mrb[58].mxu1 }
 0x914   :  { %5573 = vpow2.f32 %v2195_v34  ;;  %v2192_v32 = vsub.f32 %v6476_v14, %v5072_v49  ;;  %v2180_v50 = vpop.f32.mrb[59].mxu1 }
 0x915   :  { %5575 = vpow2.f32 %v2193_v31  ;;  %v2191_v41 = vsub.f32 %v6478_v22, %v2180_v50  ;;  %v2382_v22 = vpop.permute.xlu1 %2381 }
 0x916   :  { %v2199_v17 = vmul.f32 1.442695, %v2192_v32  ;;  %v2392_v21 = vmul.f32 %v2382_v22, %v6410_v62 }
 0x917   :  { %v2197_v18 = vmul.f32 1.442695, %v2191_v41  ;;  %v2452_v11 = vpop.permute.xlu0 %2451 }
 0x918   :  { %5577 = vpow2.f32 %v2199_v17 }
 0x919   :  { %5579 = vpow2.f32 %v2197_v18  ;;  %v2386_v53 = vpop.permute.xlu1 %2385 }
 0x91b   :  { %v2456_v36 = vpop.permute.xlu0 %2455 }
 0x91d   :  { %v2454_v3 = vpop.permute.xlu1 %2453 }
 0x91e   :  { %v6579_v8 = vpop.eup %5573 }
 0x91f   :  { %v6581_v9 = vpop.eup %5575  ;;  %v2416_v61 = vpop.permute.xlu0 %2415 }
 0x920   :  { %v5305_v24 = vpack.c.bf16 %v6579_v8, %v6581_v9  ;;  %v2427_v60 = vadd.f32 %v2416_v61, %v2391_v12 }
 0x921   :  { %v2418_v59 = vpop.permute.xlu1 %2417 }
 0x922   :  { %v6585_v14 = vpop.eup %5577  ;;  %5306 = vmatprep.subr.bf16.mxu1 %v5305_v24  ;;  %v2463_v4 = vadd.f32 %v2452_v11, %v2427_v60  ;;  %v2428_v34 = vadd.f32 %v2418_v59, %v2392_v21  ;;  %v2592_v59 = vpack.c.bf16 %v6511_v57, %v6499_v37  ;;  %v2596_v37 = vpack.c.bf16 %v6515_v52, %v6503_v30 }
 0x923   :  { %v6587_v25 = vpop.eup %5579  ;;  %5308 = vmatpush3.bf16.msra.mxu1 %v5305_v24  ;;  %v2420_v28 = vpop.permute.xlu0 %2419 }
 0x924   :  { %v5309_v6 = vpack.c.bf16 %v6585_v14, %v6587_v25  ;;  %2471 = vrot.lane.b32.xlu0 %v2463_v4, %s5763_s27  ;;  %v2429_v56 = vadd.f32 %v2420_v28, %v2393_v38  ;;  %v2464_v49 = vadd.f32 %v2454_v3, %v2428_v34  ;;  %v2597_v3 = vld [vmem:[%s7061_s26] sm:$0xf] }
 0x925   :  { %v2422_v32 = vpop.permute.xlu1 %2421  ;;  %v2617_v21 = vsel %vm436_vm1, %v2597_v3, 0 }
 0x926   :  { %5310 = vmatprep.subr.bf16.mxu1 %v5309_v6  ;;  %v2465_v31 = vadd.f32 %v2456_v36, %v2429_v56  ;;  %2473 = vrot.lane.b32.xlu1 %v2464_v49, %s5763_s27  ;;  %v2591_v56 = vpack.c.bf16 %v6517_v45, %v6505_v40 }
 0x927   :  { %5312 = vmatpush3.bf16.msra.mxu1 %v5309_v6  ;;  %v4683_v6 = vld [vmem:[%s6022_s20] ss:$0 sm:$0xff]  ;;  %s7062_s20 = sld [smem:[#allocation34_spill]] }
 0x928   :  { %5094 = vmatprep.subr.bf16.mxu1 %v5557_v47  ;;  %2475 = vrot.lane.b32.xlu0 %v2465_v31, %s5763_s27 }
 0x929   :  { %v2458_v41 = vpop.permute.xlu1 %2457 }
 0x92a   :  { %5082 = vmatmul.mubr.msk.f32.vlgmr.msra.gmra.mrb[60].mxu1 %vm377_vm2, %v6133_v44 }
 0x92b   :  { %5095 = vmatpush3.bf16.msra.mxu1 %v5557_v47  ;;  %5098 = vmatprep.mubr.msk.bf16.mxu1 %vm377_vm2, %v6490_v46  ;;  %v2394_v46 = vmul.f32 %v2386_v53, %v6420_v63 }
 0x92c   :  { %5096 = vmatprep.subr.bf16.mxu1 %v5558_v5 }
 0x92d   :  { %v2430_v50 = vadd.f32 %v2422_v32, %v2394_v46 }
 0x92f   :  { %5097 = vmatpush3.bf16.msra.mxu1 %v5558_v5  ;;  %v2466_v17 = vadd.f32 %v2458_v41, %v2430_v50 }
 0x931   :  { %2477 = vrot.lane.b32.xlu1 %v2466_v17, %s5763_s27 }
 0x932   :  { %5099 = vmatmul.mubr.msk.bf16.vlgmr.msra.gmra.mrb[64].mxu1 %vm377_vm2, %v6488_v39 }
 0x996   :  { %v2472_v39 = vpop.permute.xlu0 %2471 }
 0x997   :  { %v2483_v18 = vsel %vm910_vm12, %v2472_v39, 0.0 }
 0x998   :  { %2484 = vadd.xlane.f32.xlu0 %v2483_v18  ;;  %v2474_v40 = vpop.permute.xlu1 %2473 }
 0x999   :  { %v2486_v57 = vsel %vm910_vm12, %v2474_v40, 0.0 }
 0x9a3   :  { %v2478_v45 = vpop.permute.xlu1 %2477 }
 0x9fd   :  { %v5083_v19 = vpop.f32.mrb[60].mxu1 }
 0x9fe   :  { %v2279_v55 = vadd.f32 1e-16, %v5083_v19  ;;  %v2273_v24 = vpop.f32.mrb[61].mxu1 }
 0x9ff   :  { %v2274_v22 = vadd.f32 1e-16, %v2273_v24 }
 0xa00   :  { %5581 = vrcp.f32 %v2279_v55 }
 0xa01   :  { %5583 = vrcp.f32 %v2274_v22 }
 0xa05   :  { %v5100_v47 = vpop.f32.mrb[64].mxu1 }
 0xa06   :  { %v2585_v11 = vadd.f32 %v5100_v47, %v4683_v6  ;;  %v2576_v5 = vpop.f32.mrb[65].mxu1 }
 0xa07   :  { %v5101_v36 = vpop.f32.mrb[66].mxu1  ;;  %v2577_v4 = vadd.f32 %v4683_v6, %v2576_v5 }
 0xa08   :  { %v2588_v53 = vadd.f32 %v5101_v36, %v4683_v6  ;;  %2764 = vrot.lane.b32.xlu0 %v2585_v11, %s5763_s27  ;;  %v2579_v12 = vpop.f32.mrb[67].mxu1 }
 0xa09   :  { %v2580_v28 = vadd.f32 %v4683_v6, %v2579_v12 }
 0xa0a   :  { %v5582_v61 = vpop.eup %5581  ;;  %2766 = vrot.lane.b32.xlu1 %v2588_v53, %s5763_s27 }
 0xa0b   :  { %v5584_v38 = vpop.eup %5583 }
 0xa0c   :  { %2824 = vrot.lane.b32.xlu0 %v2585_v11, %s5762_s23  ;;  %v5313_v60 = vpack.c.bf16 %v5582_v61, %v5584_v38 }
 0xa0e   :  { %2826 = vrot.lane.b32.xlu1 %v2588_v53, %s5762_s23  ;;  %5314 = vmatprep.subr.bf16.mxu0 %v5313_v60 }
 0xa0f   :  { %5316 = vmatpush3.bf16.msra.mxu0 %v5313_v60 }
 0xa10   :  { %2884 = vrot.lane.b32.xlu0 %v2585_v11, %s5758_s19  ;;  %5349 = vmatprep.subr.msk.bf16.mxu0 %vm436_vm1, %v2597_v3 }
 0xa12   :  { %2886 = vrot.lane.b32.xlu1 %v2588_v53, %s5758_s19  ;;  %5089 = vmatmul.mubr.msk.f32.vlgmr.msra.gmra.mrb[44].mxu0 %vm910_vm12, %v6162_v23  ;;  %v2593_v23 = vpack.c.bf16 %v6519_v54, %v6507_v48  ;;  %v2476_v48 = vpop.permute.xlu0 %2475 }
 0xa13   :  { %5091 = vmatprep.mubr.msk.f32.mxu0 %vm910_vm12, %v6167_v29  ;;  %5103 = vmatpush3.bf16.msra.mxu0 %v2617_v21  ;;  %v2594_v29 = vpack.c.bf16 %v6513_v42, %v6501_v27  ;;  %v2489_v27 = vsel %vm910_vm12, %v2476_v48, 0.0 }
 0xa14   :  { %2760 = vrot.lane.b32.xlu0 %v2577_v4, %s5763_s27 }
 0xa16   :  { %2762 = vrot.lane.b32.xlu1 %v2580_v28, %s5763_s27  ;;  %5092 = vmatmul.mubr.msk.f32.gmra.mrb[46].mxu0 %vm910_vm12, %v6175_v33  ;;  %v2595_v33 = vpack.c.bf16 %v6521_v20, %v6509_v51  ;;  %v2492_v51 = vsel %vm910_vm12, %v2478_v45, 0.0 }
 0xa17   :  { %5104 = vmatprep.mubr.msk.bf16.mxu0 %vm426_vm3, %v2591_v56 }
 0xa18   :  { %2820 = vrot.lane.b32.xlu0 %v2577_v4, %s5762_s23 }
 0xa1a   :  { %5105 = vmatmul.mubr.msk.bf16.vlgmr.msra.gmra.mrb[48].mxu0 %vm426_vm3, %v2592_v59 }
 0xa1b   :  { %5108 = vmatprep.mubr.msk.bf16.mxu0 %vm426_vm3, %v2593_v23 }
 0xa1c   :  { %2880 = vrot.lane.b32.xlu0 %v2577_v4, %s5758_s19 }
 0xa22   :  { %5109 = vmatmul.mubr.msk.bf16.gmra.mrb[52].mxu0 %vm426_vm3, %v2594_v29 }
 0xa23   :  { %5112 = vmatprep.mubr.msk.bf16.mxu0 %vm426_vm3, %v2595_v33 }
 0xa25   :  { %v6655_v30 = vpop.xlane.xlu0 %2484 }
 0xa2a   :  { %5113 = vmatmul.mubr.msk.bf16.gmra.mrb[56].mxu0 %vm426_vm3, %v2596_v37 }
 0xa3a   :  { %2487 = vadd.xlane.f32.xlu1 %v2486_v57 }
 0xa3b   :  { %2490 = vadd.xlane.f32.xlu0 %v2489_v27 }
 0xa3f   :  { %2493 = vadd.xlane.f32.xlu0 %v2492_v51 }
 0xa4b   :  { %2822 = vrot.lane.b32.xlu1 %v2580_v28, %s5762_s23 }
 0xa4f   :  { %2704 = vrot.lane.b32.xlu1 %v2577_v4, %s5760_s30 }
 0xa53   :  { %2882 = vrot.lane.b32.xlu1 %v2580_v28, %s5758_s19 }
 0xa55   :  { %2706 = vrot.lane.b32.xlu0 %v2580_v28, %s5760_s30 }
 0xa57   :  { %2708 = vrot.lane.b32.xlu1 %v2585_v11, %s5760_s30 }
 0xa5b   :  { %2710 = vrot.lane.b32.xlu1 %v2588_v53, %s5760_s30 }
 0xa7a   :  { %v2765_v42 = vpop.permute.xlu0 %2764 }
 0xa7b   :  { %v2774_v52 = vmul.f32 %v2765_v42, %v6414_v26 }
 0xa7c   :  { %v2767_v54 = vpop.permute.xlu1 %2766 }
 0xa7d   :  { %v2775_v20 = vmul.f32 %v2767_v54, %v6420_v63  ;;  %2784 = vrot.lane.b32.xlu0 %v2774_v52, %s5758_s19 }
 0xa7e   :  { %v2825_v46 = vpop.permute.xlu0 %2824 }
 0xa7f   :  { %v2834_v34 = vmul.f32 %v2825_v46, %v6414_v26  ;;  %2786 = vrot.lane.b32.xlu1 %v2775_v20, %s5758_s19 }
 0xa80   :  { %v2827_v31 = vpop.permute.xlu1 %2826 }
 0xa81   :  { %v2835_v49 = vmul.f32 %v2827_v31, %v6420_v63  ;;  %2844 = vrot.lane.b32.xlu0 %v2834_v34, %s5762_s23 }
 0xa82   :  { %v2885_v32 = vpop.permute.xlu0 %2884 }
 0xa83   :  { %2846 = vrot.lane.b32.xlu1 %v2835_v49, %s5762_s23  ;;  %v2894_v48 = vmul.f32 %v2885_v32, %v6416_v35  ;;  %v4679_v49 = vmul.f32 -1.442695, %v6655_v30 }
 0xa84   :  { %v2887_v50 = vpop.permute.xlu1 %2886 }
 0xa85   :  { %v2895_v40 = vmul.f32 %v2887_v50, %v6422_v0 }
 0xa86   :  { %v2761_v41 = vpop.permute.xlu0 %2760 }
 0xa87   :  { %v2772_v17 = vmul.f32 %v2761_v41, %v6406_v15  ;;  %v5559_v41 = vld [vmem:[%s7062_s20] sm:$0xff]  }
 0xa88   :  { %v2763_v39 = vpop.permute.xlu1 %2762  ;;  %5116 = vmatprep.subr.bf16.mxu1 %v5559_v41 }
 0xa89   :  { %v2773_v18 = vmul.f32 %v2763_v39, %v6410_v62  ;;  %2780 = vrot.lane.b32.xlu0 %v2772_v17, %s5758_s19  ;;  %5117 = vmatpush3.bf16.msra.mxu1 %v5559_v41 }
 0xa8a   :  { %v2821_v19 = vpop.permute.xlu0 %2820 }
 0xa8b   :  { %v2832_v55 = vmul.f32 %v2821_v19, %v6406_v15  ;;  %2782 = vrot.lane.b32.xlu1 %v2773_v18, %s5758_s19 }
 0xa8d   :  { %2840 = vrot.lane.b32.xlu0 %v2832_v55, %s5762_s23 }
 0xa8e   :  { %v2881_v24 = vpop.permute.xlu0 %2880 }
 0xa8f   :  { %v2892_v22 = vmul.f32 %v2881_v24, %v6408_v58 }
 0xa91   :  { %2900 = vrot.lane.b32.xlu0 %v2892_v22, %s5763_s27 }
 0xac7   :  { %v2488_v6 = vpop.xlane.xlu1 %2487 }
 0xac8   :  { %v2491_v57 = vpop.xlane.xlu0 %2490  ;;  %v4680_v0 = vmul.f32 -1.442695, %v2488_v6 }
 0xac9   :  { %v4681_v34 = vmul.f32 -1.442695, %v2491_v57 }
 0xacb   :  { %v2823_v47 = vpop.permute.xlu1 %2822 }
 0xacc   :  { %v2833_v11 = vmul.f32 %v2823_v47, %v6410_v62  ;;  %v2494_v45 = vpop.xlane.xlu0 %2493 }
 0xacd   :  { %v4682_v46 = vmul.f32 -1.442695, %v2494_v45 }
 0xace   :  { %2842 = vrot.lane.b32.xlu1 %v2833_v11, %s5762_s23 }
 0xacf   :  { %v6675_v5 = vpop.permute.xlu1 %2704  ;;  %5585 = vpow2.f32 %v4682_v46 }
 0xad0   :  { %v2707_v51 = vpop.permute.xlu0 %2706  ;;  %5587 = vpow2.f32 %v4681_v34  ;;  %v2716_v11 = vmul.f32 %v6675_v5, %v6406_v15 }
 0xad1   :  { %5589 = vpow2.f32 %v4680_v0  ;;  %v2717_v6 = vmul.f32 %v2707_v51, %v6410_v62 }
 0xad2   :  { %5591 = vpow2.f32 %v4679_v49 }
 0xad3   :  { %v2883_v36 = vpop.permute.xlu1 %2882 }
 0xad4   :  { %v2893_v53 = vmul.f32 %v2883_v36, %v6412_v2 }
 0xad6   :  { %2902 = vrot.lane.b32.xlu1 %v2893_v53, %s5763_s27 }
 0xad7   :  { %v2709_v27 = vpop.permute.xlu1 %2708 }
 0xad9   :  { %v5586_v39 = vpop.eup %5585 }
 0xada   :  { %v5588_v18 = vpop.eup %5587  ;;  %v2510_v24 = vadd.f32 1.0, %v5586_v39 }
 0xadb   :  { %v2711_v42 = vpop.permute.xlu1 %2710  ;;  %v5590_v22 = vpop.eup %5589  ;;  %v2509_v30 = vadd.f32 1.0, %v5588_v18 }
 0xadc   :  { %v5592_v47 = vpop.eup %5591  ;;  %5593 = vrcp.f32 %v2510_v24 }
 0xadd   :  { %5595 = vrcp.f32 %v2509_v30 }
 0xae5   :  { %v5090_v12 = vpop.f32.mrb[44].mxu0 }
 0xae6   :  { %v2372_v61 = vmul.f32 %v6579_v8, %v5090_v12  ;;  %v2352_v38 = vpop.f32.mrb[45].mxu0 }
 0xae7   :  { %v2371_v58 = vmul.f32 %v6581_v9, %v2352_v38 }
 0xae8   :  { %2726 = vrot.lane.b32.xlu1 %v2372_v61, %s5760_s30  ;;  %v2508_v61 = vadd.f32 1.0, %v5590_v22 }
 0xae9   :  { %2724 = vrot.lane.b32.xlu0 %v2371_v58, %s5760_s30  ;;  %v5093_v60 = vpop.f32.mrb[46].mxu0  ;;  %v2507_v58 = vadd.f32 1.0, %v5592_v47 }
 0xaea   :  { %v2374_v3 = vmul.f32 %v6585_v14, %v5093_v60  ;;  %v2362_v4 = vpop.f32.mrb[47].mxu0  ;;  %v2719_v60 = vmul.f32 %v2711_v42, %v6420_v63  ;;  %5597 = vrcp.f32 %v2508_v61 }
 0xaeb   :  { %v2373_v21 = vmul.f32 %v6587_v25, %v2362_v4  ;;  %5599 = vrcp.f32 %v2507_v58 }
 0xaec   :  { %2730 = vrot.lane.b32.xlu1 %v2374_v3, %s5760_s30  ;;  %v2718_v3 = vmul.f32 %v2709_v27, %v6414_v26 }
 0xaed   :  { %v5106_v2 = vpop.f32.mrb[48].mxu0  ;;  %2728 = vrot.lane.b32.xlu0 %v2373_v21, %s5760_s30 }
 0xaee   :  { %v2653_v28 = vpop.f32.mrb[49].mxu0 }
 0xaef   :  { %v5107_v8 = vpop.f32.mrb[50].mxu0  ;;  %v2785_v52 = vpop.permute.xlu0 %2784 }
 0xaf0   :  { %2750 = vrot.lane.b32.xlu1 %v5107_v8, %s5763_s27  ;;  %v2656_v9 = vpop.f32.mrb[51].mxu0 }
 0xaf1   :  { %2748 = vrot.lane.b32.xlu0 %v5106_v2, %s5763_s27  ;;  %v2787_v54 = vpop.permute.xlu1 %2786  ;;  %v6723_v2 = vld [vmem:[%s7063_s0] sm:$0xff]  }
 0xaf2   :  { %5122 = vmatprep.subr.bf16.mxu1 %v6723_v2 }
 0xaf3   :  { %v6703_v20 = vpop.permute.xlu0 %2844 }
 0xaf4   :  { %2746 = vrot.lane.b32.xlu1 %v2656_v9, %s5763_s27 }
 0xaf5   :  { %v5110_v56 = vpop.f32.mrb[52].mxu0  ;;  %2744 = vrot.lane.b32.xlu0 %v2653_v28, %s5763_s27  ;;  %v6705_v31 = vpop.permute.xlu1 %2846 }
 0xaf6   :  { %v2669_v14 = vpop.f32.mrb[53].mxu0 }
 0xaf7   :  { %v5111_v59 = vpop.f32.mrb[54].mxu0 }
 0xaf8   :  { %2810 = vrot.lane.b32.xlu1 %v5111_v59, %s5763_s27  ;;  %v2672_v25 = vpop.f32.mrb[55].mxu0 }
 0xaf9   :  { %2808 = vrot.lane.b32.xlu0 %v5110_v56, %s5763_s27 }
 0xafb   :  { %v2781_v35 = vpop.permute.xlu0 %2780 }
 0xafc   :  { %2806 = vrot.lane.b32.xlu1 %v2672_v25, %s5763_s27 }
 0xafd   :  { %v5114_v23 = vpop.f32.mrb[56].mxu0  ;;  %2804 = vrot.lane.b32.xlu0 %v2669_v14, %s5763_s27  ;;  %v2783_v32 = vpop.permute.xlu1 %2782 }
 0xafe   :  { %v2685_v29 = vpop.f32.mrb[57].mxu0 }
 0xaff   :  { %v5115_v33 = vpop.f32.mrb[58].mxu0  ;;  %v6708_v50 = vpop.permute.xlu0 %2840 }
 0xb00   :  { %2870 = vrot.lane.b32.xlu1 %v5115_v33, %s5763_s27  ;;  %v2688_v37 = vpop.f32.mrb[59].mxu0 }
 0xb01   :  { %2868 = vrot.lane.b32.xlu0 %v5114_v23, %s5763_s27 }
 0xb03   :  { %v6715_v55 = vpop.permute.xlu0 %2900 }
 0xb04   :  { %2866 = vrot.lane.b32.xlu1 %v2688_v37, %s5763_s27 }
 0xb05   :  { %2864 = vrot.lane.b32.xlu0 %v2685_v29, %s5763_s27  ;;  %v5594_v29 = vpop.eup %5593 }
 0xb08   :  { %2906 = vrot.lane.b32.xlu1 %v2895_v40, %s5763_s27  ;;  %v5596_v40 = vpop.eup %5595 }
 0xb09   :  { %2904 = vrot.lane.b32.xlu0 %v2894_v48, %s5763_s27  ;;  %v5598_v46 = vpop.eup %5597 }
 0xb0a   :  { %v5600_v41 = vpop.eup %5599 }
 0xb40   :  { %v6711_v17 = vpop.permute.xlu1 %2842 }
 0xb48   :  { %v6713_v19 = vpop.permute.xlu1 %2902 }
 0xb5a   :  { %v2727_v36 = vpop.permute.xlu1 %2726 }
 0xb5b   :  { %v2737_v53 = vmul.f32 %v2727_v36, %v2717_v6  ;;  %v2725_v12 = vpop.permute.xlu0 %2724 }
 0xb5c   :  { %v2736_v38 = vmul.f32 %v2725_v12, %v2716_v11 }
 0xb5e   :  { %v2731_v4 = vpop.permute.xlu1 %2730  ;;  %v2920_v21 = vpack.c.bf16 %v2737_v53, %v2736_v38 }
 0xb5f   :  { %v2739_v28 = vmul.f32 %v2731_v4, %v2719_v60  ;;  %v2729_v8 = vpop.permute.xlu0 %2728 }
 0xb60   :  { %v2738_v5 = vmul.f32 %v2729_v8, %v2718_v3  ;;  %2926 = vrot.lane.b32.xlu0 %v2920_v21, %s5757_s3 }
 0xb62   :  { %v2751_v9 = vpop.permute.xlu1 %2750  ;;  %v2921_v56 = vpack.c.bf16 %v2739_v28, %v2738_v5 }
 0xb63   :  { %v2759_v14 = vmul.f32 %v2751_v9, %v6420_v63  ;;  %v2749_v59 = vpop.permute.xlu0 %2748 }
 0xb64   :  { %v2758_v25 = vmul.f32 %v2749_v59, %v6414_v26  ;;  %2928 = vrot.lane.b32.xlu1 %v2921_v56, %s5757_s3 }
 0xb65   :  { %v2795_v23 = vadd.f32 %v2787_v54, %v2759_v14 }
 0xb66   :  { %v2794_v33 = vadd.f32 %v2785_v52, %v2758_v25  ;;  %v2747_v37 = vpop.permute.xlu1 %2746 }
 0xb67   :  { %v2799_v48 = vmul.f32 %v5594_v29, %v2795_v23  ;;  %v2757_v57 = vmul.f32 %v2747_v37, %v6410_v62  ;;  %v2745_v45 = vpop.permute.xlu0 %2744 }
 0xb68   :  { %v2798_v27 = vmul.f32 %v5596_v40, %v2794_v33  ;;  %v2756_v51 = vmul.f32 %v2745_v45, %v6406_v15 }
 0xb69   :  { %v2793_v42 = vadd.f32 %v2783_v32, %v2757_v57 }
 0xb6a   :  { %v2792_v34 = vadd.f32 %v2781_v35, %v2756_v51  ;;  %v2811_v0 = vpop.permute.xlu1 %2810  ;;  %v2992_v49 = vpack.c.bf16 %v2799_v48, %v2798_v27  ;;  %v5562_v27 = vld [vmem:[%s7065_s9] sm:$0xff]  }
 0xb6b   :  { %v2797_v39 = vmul.f32 %v5598_v46, %v2793_v42  ;;  %v2819_v54 = vmul.f32 %v2811_v0, %v6420_v63  ;;  %v2809_v18 = vpop.permute.xlu0 %2808 }
 0xb6c   :  { %v2796_v52 = vmul.f32 %v5600_v41, %v2792_v34  ;;  %v2818_v24 = vmul.f32 %v2809_v18, %v6414_v26  ;;  %3007 = vrot.lane.b32.xlu1 %v2992_v49, %s5762_s23 }
 0xb6d   :  { %v2855_v22 = vadd.f32 %v6705_v31, %v2819_v54 }
 0xb6e   :  { %v2854_v30 = vadd.f32 %v6703_v20, %v2818_v24  ;;  %v2807_v6 = vpop.permute.xlu1 %2806  ;;  %v2991_v32 = vpack.c.bf16 %v2797_v39, %v2796_v52 }
 0xb6f   :  { %v2859_v47 = vmul.f32 %v5594_v29, %v2855_v22  ;;  %v2817_v35 = vmul.f32 %v2807_v6, %v6410_v62  ;;  %v2805_v11 = vpop.permute.xlu0 %2804 }
 0xb70   :  { %v2858_v36 = vmul.f32 %v5596_v40, %v2854_v30  ;;  %v2816_v53 = vmul.f32 %v2805_v11, %v6406_v15  ;;  %3005 = vrot.lane.b32.xlu0 %v2991_v32, %s5762_s23 }
 0xb71   :  { %v2853_v12 = vadd.f32 %v6711_v17, %v2817_v35 }
 0xb72   :  { %v2852_v61 = vadd.f32 %v6708_v50, %v2816_v53  ;;  %v2871_v38 = vpop.permute.xlu1 %2870  ;;  %v2994_v58 = vpack.c.bf16 %v2859_v47, %v2858_v36 }
 0xb73   :  { %v2857_v31 = vmul.f32 %v5598_v46, %v2853_v12  ;;  %v2869_v60 = vpop.permute.xlu0 %2868  ;;  %v2879_v17 = vmul.f32 %v2871_v38, %v6420_v63 }
 0xb74   :  { %v2856_v20 = vmul.f32 %v5600_v41, %v2852_v61  ;;  %3011 = vrot.lane.b32.xlu1 %v2994_v58, %s5762_s23  ;;  %v2878_v5 = vmul.f32 %v2869_v60, %v6414_v26 }
 0xb76   :  { %v2867_v3 = vpop.permute.xlu1 %2866  ;;  %v2993_v4 = vpack.c.bf16 %v2857_v31, %v2856_v20 }
 0xb77   :  { %v2877_v21 = vmul.f32 %v2867_v3, %v6410_v62  ;;  %v2865_v28 = vpop.permute.xlu0 %2864 }
 0xb78   :  { %v2876_v8 = vmul.f32 %v2865_v28, %v6406_v15  ;;  %3009 = vrot.lane.b32.xlu0 %v2993_v4, %s5762_s23 }
 0xb79   :  { %v2913_v50 = vadd.f32 %v6713_v19, %v2877_v21 }
 0xb7a   :  { %v2912_v9 = vadd.f32 %v6715_v55, %v2876_v8  ;;  %v2907_v56 = vpop.permute.xlu1 %2906 }
 0xb7b   :  { %v2917_v14 = vmul.f32 %v5598_v46, %v2913_v50  ;;  %v2915_v59 = vadd.f32 %v2907_v56, %v2879_v17  ;;  %v2905_v25 = vpop.permute.xlu0 %2904 }
 0xb7c   :  { %v2916_v23 = vmul.f32 %v5600_v41, %v2912_v9  ;;  %v2914_v33 = vadd.f32 %v2905_v25, %v2878_v5 }
 0xb7d   :  { %v2919_v62 = vmul.f32 %v5594_v29, %v2915_v59 }
 0xb7e   :  { %v2918_v37 = vmul.f32 %v5596_v40, %v2914_v33  ;;  %v2995_v48 = vpack.c.bf16 %v2917_v14, %v2916_v23 }
 0xb80   :  { %3013 = vrot.lane.b32.xlu0 %v2995_v48, %s5762_s23  ;;  %v2996_v15 = vpack.c.bf16 %v2919_v62, %v2918_v37 }
 0xb82   :  { %3015 = vrot.lane.b32.xlu1 %v2996_v15, %s5762_s23 }
 0xbd2   :  { %v2927_v63 = vpop.permute.xlu0 %2926 }
 0xbd3   :  { %5118 = vmatprep.mubr.msk.bf16.mxu1 %vm910_vm12, %v2927_v63 }
 0xbd6   :  { %v2929_v26 = vpop.permute.xlu1 %2928 }
 0xbd7   :  { %5119 = vmatmul.mubr.msk.bf16.vlgmr.msra.gmra.mrb[68].mxu1 %vm910_vm12, %v2929_v26 }
 0xbd8   :  { %5123 = vmatpush3.bf16.msra.mxu1 %v6723_v2  ;;  %v5561_v2 = vld [vmem:[%s7064_s5] sm:$0xff]  }
 0xbd9   :  { %5142 = vmatprep.subr.bf16.mxu0 %v5561_v2  ;;  %5136 = vmatprep.subr.bf16.mxu1 %v5562_v27 }
 0xbda   :  { %5143 = vmatpush3.bf16.msra.mxu0 %v5561_v2 }
 0xbde   :  { %v3008_v55 = vpop.permute.xlu1 %3007 }
 0xbe2   :  { %v3006_v19 = vpop.permute.xlu0 %3005 }
 0xbe3   :  { %5124 = vmatprep.mubr.msk.bf16.mxu1 %vm910_vm12, %v3006_v19 }
 0xbe4   :  { %5125 = vmatmul.mubr.msk.bf16.vlgmr.msra.gmra.mrb[72].mxu1 %vm910_vm12, %v3008_v55 }
 0xbe5   :  { %5137 = vmatpush3.bf16.msra.mxu1 %v5562_v27 }
 0xbe6   :  { %v3012_v40 = vpop.permute.xlu1 %3011 }
 0xbea   :  { %v3010_v29 = vpop.permute.xlu0 %3009 }
 0xbeb   :  { %5128 = vmatprep.mubr.msk.bf16.mxu1 %vm910_vm12, %v3010_v29 }
 0xbec   :  { %5129 = vmatmul.mubr.msk.bf16.gmra.mrb[76].mxu1 %vm910_vm12, %v3012_v40 }
 0xbf2   :  { %v3014_v57 = vpop.permute.xlu0 %3013 }
 0xbf3   :  { %5132 = vmatprep.mubr.msk.bf16.mxu1 %vm910_vm12, %v3014_v57 }
 0xbf4   :  { %v3016_v45 = vpop.permute.xlu1 %3015 }
 0xbf5   :  { %5133 = vmatmul.mubr.msk.bf16.gmra.mrb[80].mxu1 %vm910_vm12, %v3016_v45 }
 0xcb7   :  { %v5126_v51 = vpop.f32.mrb[72].mxu1 }
 0xcb8   :  { %v3075_v42 = vpop.f32.mrb[73].mxu1  ;;  %v3124_v39 = vmul.f32 %v5126_v51, %v5126_v51 }
 0xcb9   :  { %v5127_v46 = vpop.f32.mrb[74].mxu1  ;;  %v3122_v52 = vmul.f32 %v3075_v42, %v3075_v42 }
 0xcba   :  { %v3236_v34 = vpack.c.bf16 %v5127_v46, %v5126_v51  ;;  %v3078_v0 = vpop.f32.mrb[75].mxu1  ;;  %v3125_v30 = vmul.f32 %v5127_v46, %v5127_v46  ;;  %v5563_v46 = vld [vmem:[%s7066_s13] sm:$0xff]  }
 0xcbb   :  { %v3235_v49 = vpack.c.bf16 %v3078_v0, %v3075_v42  ;;  %v3123_v11 = vmul.f32 %v3078_v0, %v3078_v0  ;;  %5156 = vmatprep.subr.bf16.mxu1 %v5563_v46 }
 0xcbd   :  { %5144 = vmatprep.mubr.msk.bf16.mxu0 %vm910_vm12, %v3235_v49 }
 0xcbe   :  { %5145 = vmatmul.mubr.msk.bf16.vlgmr.msra.gmra.mrb[60].mxu0 %vm910_vm12, %v3236_v34  ;;  %v5564_v34 = vld [vmem:[%s7066_s13 + $0x8] sm:$0xff]  }
 0xcbf   :  { %v5130_v41 = vpop.f32.mrb[76].mxu1 }
 0xcc0   :  { %v3128_v54 = vmul.f32 %v5130_v41, %v5130_v41  ;;  %v3091_v18 = vpop.f32.mrb[77].mxu1 }
 0xcc1   :  { %v3126_v24 = vmul.f32 %v3091_v18, %v3091_v18  ;;  %v5131_v22 = vpop.f32.mrb[78].mxu1 }
 0xcc2   :  { %v3132_v6 = vadd.f32 %v3128_v54, %v3124_v39  ;;  %v3129_v32 = vmul.f32 %v5131_v22, %v5131_v22  ;;  %v3238_v47 = vpack.c.bf16 %v5131_v22, %v5130_v41  ;;  %v3094_v35 = vpop.f32.mrb[79].mxu1 }
 0xcc3   :  { %v3130_v36 = vadd.f32 %v3126_v24, %v3122_v52  ;;  %v3127_v53 = vmul.f32 %v3094_v35, %v3094_v35  ;;  %v3237_v12 = vpack.c.bf16 %v3094_v35, %v3091_v18 }
 0xcc4   :  { %v3133_v61 = vadd.f32 %v3129_v32, %v3125_v30 }
 0xcc5   :  { %v3131_v38 = vadd.f32 %v3127_v53, %v3123_v11  ;;  %5148 = vmatprep.mubr.msk.bf16.mxu0 %vm910_vm12, %v3237_v12 }
 0xcc6   :  { %5149 = vmatmul.mubr.msk.bf16.gmra.mrb[64].mxu0 %vm910_vm12, %v3238_v47 }
 0xcc8   :  { %v5134_v58 = vpop.f32.mrb[80].mxu1 }
 0xcc9   :  { %v3136_v31 = vmul.f32 %v5134_v58, %v5134_v58  ;;  %v3107_v60 = vpop.f32.mrb[81].mxu1 }
 0xcca   :  { %v3134_v20 = vmul.f32 %v3107_v60, %v3107_v60  ;;  %v5135_v3 = vpop.f32.mrb[82].mxu1 }
 0xccb   :  { %v3140_v4 = vadd.f32 %v3136_v31, %v3132_v6  ;;  %v3137_v21 = vmul.f32 %v5135_v3, %v5135_v3  ;;  %v3240_v28 = vpack.c.bf16 %v5135_v3, %v5134_v58  ;;  %v3110_v8 = vpop.f32.mrb[83].mxu1 }
 0xccc   :  { %v3138_v17 = vadd.f32 %v3134_v20, %v3130_v36  ;;  %v3135_v50 = vmul.f32 %v3110_v8, %v3110_v8  ;;  %v3239_v5 = vpack.c.bf16 %v3110_v8, %v3107_v60 }
 0xccd   :  { %5601 = vrsqrt.f32 %v3140_v4  ;;  %v3141_v9 = vadd.f32 %v3137_v21, %v3133_v61  ;;  %vm3158_vm7 = vcmp.eq.f32.partialorder %v3140_v4, inf  ;;  %vm3160_vm10 = vcmp.eq.f32.partialorder %v3140_v4, 0.0  ;;  %v4714_v61 = vld [vmem:[%s7067_s17] ss:$0 sm:$0xff] }
 0xcce   :  { %5603 = vrsqrt.f32 %v3138_v17  ;;  %v3139_v56 = vadd.f32 %v3135_v50, %v3131_v38  ;;  %5152 = vmatprep.mubr.msk.bf16.mxu0 %vm910_vm12, %v3239_v5  ;;  %vm3144_vm8 = vcmp.eq.f32.partialorder %v3138_v17, inf  ;;  %vm3146_vm9 = vcmp.eq.f32.partialorder %v3138_v17, 0.0 }
 0xccf   :  { %5605 = vrsqrt.f32 %v3141_v9  ;;  %5153 = vmatmul.mubr.msk.bf16.gmra.mrb[68].mxu0 %vm910_vm12, %v3240_v28  ;;  %v3147_v37 = vand.u32 2147483648, %v3138_v17  ;;  %v3161_v15 = vand.u32 2147483648, %v3140_v4  ;;  %vm3165_vm13 = vcmp.eq.f32.partialorder %v3141_v9, inf }
 0xcd0   :  { %5607 = vrsqrt.f32 %v3139_v56  ;;  %5172 = vmatprep.mubr.msk.f32.mxu0 %vm377_vm2, %v6130_v43  ;;  %v3168_v55 = vand.u32 2147483648, %v3141_v9  ;;  %vm3151_vm14 = vcmp.eq.f32.partialorder %v3139_v56, inf  ;;  %v3154_v43 = vand.u32 2147483648, %v3139_v56 }
 0xcd1   :  { %vm3167_vm15 = vcmp.eq.f32.partialorder %v3141_v9, 0.0  ;;  %vm3153_vm4 = vcmp.eq.f32.partialorder %v3139_v56, 0.0 }
 0xcd7   :  { %v5602_v14 = vpop.eup %5601 }
 0xcd8   :  { %v5604_v59 = vpop.eup %5603  ;;  %v3157_v25 = vmul.f32 %v5602_v14, %v3140_v4 }
 0xcd9   :  { %v5606_v23 = vpop.eup %5605  ;;  %v3143_v33 = vmul.f32 %v5604_v59, %v3138_v17 }
 0xcda   :  { %v5608_v62 = vpop.eup %5607  ;;  %v3159_v48 = vsel %vm3158_vm7, %v3140_v4, %v3157_v25  ;;  %v3164_v63 = vmul.f32 %v5606_v23, %v3141_v9 }
 0xcdb   :  { %v3145_v26 = vsel %vm3144_vm8, %v3138_v17, %v3143_v33  ;;  %v3150_v19 = vmul.f32 %v5608_v62, %v3139_v56  ;;  %v3162_v57 = vsel %vm3160_vm10, %v3161_v15, %v3159_v48 }
 0xcdc   :  { %v3166_v29 = vsel %vm3165_vm13, %v3141_v9, %v3164_v63  ;;  %v3148_v2 = vsel %vm3146_vm9, %v3147_v37, %v3145_v26 }
 0xcdd   :  { %v3152_v40 = vsel %vm3151_vm14, %v3139_v56, %v3150_v19  ;;  %v3169_v45 = vsel %vm3167_vm15, %v3168_v55, %v3166_v29 }
 0xcde   :  { %v3155_v27 = vsel %vm3153_vm4, %v3154_v43, %v3152_v40  ;;  %v3171_v51 = vpack.c.bf16 %v3169_v45, %v3162_v57 }
 0xcdf   :  { %v3170_v42 = vpack.c.bf16 %v3155_v27, %v3148_v2 }
 0xce1   :  { %5138 = vmatprep.mubr.msk.bf16.mxu1 %vm910_vm12, %v3170_v42 }
 0xce2   :  { %5139 = vmatmul.mubr.msk.bf16.vlgmr.msra.gmra.mrb[68].mxu1 %vm910_vm12, %v3171_v51  ;;  %vm3516_vm12 = vcmask 326656  }
 0xce3   :  { %5157 = vmatpush3.bf16.msra.mxu1 %v5563_v46 }
 0xce4   :  { %5158 = vmatprep.subr.bf16.mxu1 %v5564_v34 }
 0xce7   :  { %5159 = vmatpush3.bf16.msra.mxu1 %v5564_v34 }
 0xce8   :  { %5175 = vmatprep.subr.bf16.mxu1 %v5751_v1 }
 0xd91   :  { %v5146_v0 = vpop.f32.mrb[60].mxu0 }
 0xd92   :  { %v3301_v49 = vpop.f32.mrb[61].mxu0 }
 0xd93   :  { %v5147_v41 = vpop.f32.mrb[62].mxu0 }
 0xd94   :  { %v3304_v39 = vpop.f32.mrb[63].mxu0 }
 0xd99   :  { %v5150_v54 = vpop.f32.mrb[64].mxu0 }
 0xd9a   :  { %v3317_v18 = vpop.f32.mrb[65].mxu0 }
 0xd9b   :  { %v5151_v52 = vpop.f32.mrb[66].mxu0 }
 0xd9c   :  { %v3320_v24 = vpop.f32.mrb[67].mxu0 }
 0xda2   :  { %v5154_v22 = vpop.f32.mrb[68].mxu0 }
 0xda3   :  { %v3333_v30 = vpop.f32.mrb[69].mxu0 }
 0xda4   :  { %v5155_v6 = vpop.f32.mrb[70].mxu0 }
 0xda5   :  { %v3336_v32 = vpop.f32.mrb[71].mxu0 }
 0xdb5   :  { %v6778_v47 = vpop.f32.mrb[68].mxu1 }
 0xdb6   :  { %v6780_v35 = vpop.f32.mrb[69].mxu1 }
 0xdb7   :  { %v6782_v11 = vpop.f32.mrb[70].mxu1 }
 0xdb8   :  { %v3349_v36 = vpack.c.bf16 %v6782_v11, %v6778_v47  ;;  %v6786_v53 = vpop.f32.mrb[71].mxu1 }
 0xdb9   :  { %v3348_v12 = vpack.c.bf16 %v6786_v53, %v6780_v35 }
 0xdbb   :  { %5160 = vmatprep.mubr.msk.bf16.mxu1 %vm377_vm2, %v3348_v12 }
 0xdbc   :  { %5161 = vmatmul.mubr.msk.bf16.vlgmr.msra.gmra.mrb[84].mxu1 %vm377_vm2, %v3349_v36 }
 0xdbd   :  { %5179 = vmatprep.mubr.msk.bf16.mxu1 %vm5752_vm0, %v5751_v1 }
 0xe8f   :  { %v5162_v38 = vpop.f32.mrb[84].mxu1 }
 0xe90   :  { %v3422_v58 = vadd.f32 %v5162_v38, %v4714_v61  ;;  %v3413_v31 = vpop.f32.mrb[85].mxu1 }
 0xe91   :  { %v3414_v60 = vadd.f32 %v4714_v61, %v3413_v31  ;;  %v5163_v20 = vpop.f32.mrb[86].mxu1 }
 0xe92   :  { %v4721_v3 = vmul.f32 -1.442695, %v3422_v58  ;;  %v3425_v4 = vadd.f32 %v5163_v20, %v4714_v61  ;;  %v3416_v21 = vpop.f32.mrb[87].mxu1 }
 0xe93   :  { %v4719_v28 = vmul.f32 -1.442695, %v3414_v60  ;;  %v3417_v8 = vadd.f32 %v4714_v61, %v3416_v21 }
 0xe94   :  { %5609 = vpow2.f32 %v4721_v3  ;;  %v4722_v17 = vmul.f32 -1.442695, %v3425_v4 }
 0xe95   :  { %5611 = vpow2.f32 %v4719_v28  ;;  %v4720_v50 = vmul.f32 -1.442695, %v3417_v8 }
 0xe96   :  { %5613 = vpow2.f32 %v4722_v17 }
 0xe97   :  { %5615 = vpow2.f32 %v4720_v50 }
 0xe9e   :  { %v5610_v5 = vpop.eup %5609 }
 0xe9f   :  { %v5612_v9 = vpop.eup %5611  ;;  %v3442_v56 = vadd.f32 1.0, %v5610_v5 }
 0xea0   :  { %v5614_v14 = vpop.eup %5613  ;;  %v3440_v59 = vadd.f32 1.0, %v5612_v9 }
 0xea1   :  { %v5616_v25 = vpop.eup %5615  ;;  %5617 = vrcp.f32 %v3442_v56  ;;  %v3443_v23 = vadd.f32 1.0, %v5614_v14 }
 0xea2   :  { %5619 = vrcp.f32 %v3440_v59  ;;  %v3441_v33 = vadd.f32 1.0, %v5616_v25 }
 0xea3   :  { %5621 = vrcp.f32 %v3443_v23  ;;  %v3667_v23 = vld [vmem:[%s7068_s25] sm:$0xf] }
 0xea4   :  { %5623 = vrcp.f32 %v3441_v33 }
 0xeab   :  { %v5618_v62 = vpop.eup %5617 }
 0xeac   :  { %v5620_v37 = vpop.eup %5619  ;;  %v3454_v48 = vmul.f32 %v5618_v62, %v5146_v0  ;;  %v3462_v15 = vmul.f32 %v5618_v62, %v5154_v22  ;;  %v3458_v63 = vmul.f32 %v5618_v62, %v5150_v54 }
 0xead   :  { %v5622_v26 = vpop.eup %5621  ;;  %v3456_v19 = vmul.f32 %v5620_v37, %v3317_v18  ;;  %v3452_v55 = vmul.f32 %v5620_v37, %v3301_v49  ;;  %v3460_v43 = vmul.f32 %v5620_v37, %v3333_v30 }
 0xeae   :  { %v5624_v29 = vpop.eup %5623  ;;  %v3455_v40 = vmul.f32 %v5622_v26, %v5147_v41  ;;  %v3463_v57 = vmul.f32 %v5622_v26, %v5155_v6  ;;  %v3459_v45 = vmul.f32 %v5622_v26, %v5151_v52 }
 0xeaf   :  { %v3457_v2 = vmul.f32 %v5624_v29, %v3320_v24  ;;  %v3453_v27 = vmul.f32 %v5624_v29, %v3304_v39  ;;  %v3461_v51 = vmul.f32 %v5624_v29, %v3336_v32 }
 0xeb0   :  { %v5537_v42 = vpack.i.bf16 %v3455_v40, %v3454_v48  ;;  %v5552_v46 = vpack.i.bf16 %v3463_v57, %v3462_v15  ;;  %v5547_v34 = vpack.i.bf16 %v3459_v45, %v3458_v63 }
 0xeb1   :  { %v5532_v36 = vpack.i.bf16 %v3457_v2, %v3456_v19  ;;  %v5527_v12 = vpack.i.bf16 %v3453_v27, %v3452_v55  ;;  %v5542_v61 = vpack.i.bf16 %v3461_v51, %v3460_v43 }
 0xeb3   :  { %5533 = vrot.lane.b32.xlu1 %v5532_v36, %s5764_s21  ;;  %5528 = vrot.lane.b32.xlu0 %v5527_v12, %s5760_s30 }
 0xeb7   :  { %5538 = vrot.lane.b32.xlu1 %v5537_v42, %s5760_s30  ;;  %5543 = vrot.lane.b32.xlu0 %v5542_v61, %s5763_s27  ;;  %s7072_s30 = sld [smem:[#allocation26_spill]] }
 0xebb   :  { %5553 = vrot.lane.b32.xlu1 %v5552_v46, %s5763_s27  ;;  %5548 = vrot.lane.b32.xlu0 %v5547_v34, %s5764_s21 }
 0xf25   :  { %v5534_v0 = vpop.permute.xlu1 %5533  ;;  %v5529_v49 = vpop.permute.xlu0 %5528 }
 0xf26   :  { %v5531_v41 = vunpack.i.h.bf16 %v5529_v49  ;;  %v5530_v39 = vunpack.i.l.bf16 %v5529_v49  ;;  %v5536_v54 = vunpack.i.h.bf16 %v5534_v0  ;;  %v5535_v18 = vunpack.i.l.bf16 %v5534_v0 }
 0xf28   :  { %v3513_v52 = vsel %vm377_vm2, %v6786_v53, %v5531_v41  ;;  %v3512_v24 = vsel %vm377_vm2, %v6780_v35, %v5530_v39 }
 0xf29   :  { %v5539_v22 = vpop.permute.xlu1 %5538  ;;  %v5544_v30 = vpop.permute.xlu0 %5543  ;;  %v3517_v31 = vsel %vm3516_vm12, %v3512_v24, %v5535_v18  ;;  %v3518_v60 = vsel %vm3516_vm12, %v3513_v52, %v5536_v54 }
 0xf2a   :  { %v5546_v6 = vunpack.i.h.bf16 %v5544_v30  ;;  %v5545_v32 = vunpack.i.l.bf16 %v5544_v30  ;;  %v5541_v38 = vunpack.i.h.bf16 %v5539_v22  ;;  %v5540_v58 = vunpack.i.l.bf16 %v5539_v22 }
 0xf2c   :  { %v3521_v20 = vsel %vm915_vm11, %v3517_v31, %v5545_v32  ;;  %v3522_v3 = vsel %vm915_vm11, %v3518_v60, %v5546_v6  ;;  %v3515_v50 = vsel %vm377_vm2, %v6782_v11, %v5541_v38  ;;  %v3514_v5 = vsel %vm377_vm2, %v6778_v47, %v5540_v58  ;;  %v5566_v11 = vld [vmem:[%s7069_s29 + $0x8] sm:$0xff]   ;;  %v5567_v60 = vld [vmem:[%s7072_s30] sm:$0xff]  }
 0xf2d   :  { %v5554_v4 = vpop.permute.xlu1 %5553  ;;  %v5549_v53 = vpop.permute.xlu0 %5548  ;;  %v5317_v21 = vpack.c.bf16 %v3522_v3, %v3521_v20  ;;  %v3669_v47 = vsel %vm436_vm1, %v3667_v23, 0 }
 0xf2e   :  { %v5556_v35 = vunpack.i.h.bf16 %v5554_v4  ;;  %v5555_v28 = vunpack.i.l.bf16 %v5554_v4  ;;  %v5551_v8 = vunpack.i.h.bf16 %v5549_v53  ;;  %v5550_v17 = vunpack.i.l.bf16 %v5549_v53 }
 0xf2f   :  { %5318 = vmatprep.subr.bf16.mxu0 %v5317_v21 }
 0xf30   :  { %5320 = vmatpush3.bf16.msra.mxu0 %v5317_v21  ;;  %v3519_v9 = vsel %vm3516_vm12, %v3514_v5, %v5550_v17  ;;  %v3520_v56 = vsel %vm3516_vm12, %v3515_v50, %v5551_v8  ;;  %v5568_v21 = vld [vmem:[%s7072_s30 + $0x8] sm:$0xff]   ;;  %v5569_v50 = vld [vmem:[%s7073_s6] sm:$0xff]  }
 0xf31   :  { %v3523_v14 = vsel %vm915_vm11, %v3519_v9, %v5555_v28  ;;  %v3524_v59 = vsel %vm915_vm11, %v3520_v56, %v5556_v35 }
 0xf32   :  { %v5321_v25 = vpack.c.bf16 %v3524_v59, %v3523_v14  ;;  %v5570_v59 = vld [vmem:[%s7073_s6 + $0x8] sm:$0xff]  }
 0xf34   :  { %5322 = vmatprep.subr.bf16.mxu0 %v5321_v25 }
 0xf35   :  { %5324 = vmatpush3.bf16.msra.mxu0 %v5321_v25 }
 0xf36   :  { %5183 = vmatprep.subr.bf16.mxu0 %v5751_v1 }
 0xf38   :  { %5173 = vmatmul.mubr.msk.f32.vlgmr.msra.gmra.mrb[72].mxu0 %vm377_vm2, %v6133_v44  ;;  %v5565_v44 = vld [vmem:[%s7069_s29] sm:$0xff]  }
 0xf39   :  { %5184 = vmatpush3.bf16.msra.mxu0 %v3669_v47  ;;  %5185 = vmatprep.mubr.msk.bf16.mxu0 %vm5752_vm0, %v5751_v1 }
 0xf3a   :  { %5217 = vmatprep.subr.bf16.mxu0 %v5751_v1  ;;  %5176 = vmatpush3.bf16.msra.mxu1 %v5565_v44 }
 0xf3b   :  { %5177 = vmatprep.subr.bf16.mxu1 %v5751_v1 }
 0xf3c   :  { %5186 = vmatmul.mubr.msk.bf16.vlgmr.msra.gmra.mrb[76].mxu0 %vm426_vm3, %v6058_v10  ;;  %v3753_v10 = vld [vmem:[%s7070_s8] sm:$0xf] }
 0xf3d   :  { %5189 = vmatprep.mubr.msk.bf16.mxu0 %vm5752_vm0, %v5751_v1  ;;  %5218 = vmatpush3.bf16.msra.mxu0 %v5567_v60 }
 0xf3e   :  { %5178 = vmatpush3.bf16.msra.mxu1 %v5566_v11  ;;  %5219 = vmatprep.subr.bf16.mxu0 %v5751_v1 }
 0xf3f   :  { %5197 = vmatprep.subr.bf16.mxu1 %v5751_v1 }
 0xf41   :  { %5180 = vmatmul.mubr.msk.bf16.vlgmr.msra.gmra.mrb[88].mxu1 %vm377_vm2, %v6048_v7  ;;  %5220 = vmatpush3.bf16.msra.mxu0 %v5568_v21  ;;  %v4145_v21 = vld [vmem:[%s7077_s1] sm:$0xf] }
 0xf42   :  { %5199 = vmatprep.mubr.msk.bf16.mxu1 %vm5752_vm0, %v5751_v1  ;;  %5225 = vmatprep.subr.bf16.mxu0 %v5751_v1 }
 0xf44   :  { %5190 = vmatmul.mubr.msk.bf16.gmra.mrb[80].mxu0 %vm426_vm3, %v6066_v13  ;;  %v3758_v13 = vsel %vm436_vm1, %v3753_v10, 0 }
 0xf45   :  { %5193 = vmatprep.mubr.msk.bf16.mxu0 %vm5752_vm0, %v5751_v1  ;;  %5198 = vmatpush3.bf16.msra.mxu1 %v3758_v13 }
 0xf46   :  { %5203 = vmatprep.subr.bf16.mxu1 %v5751_v1 }
 0xf4c   :  { %5194 = vmatmul.mubr.msk.bf16.gmra.mrb[84].mxu0 %vm426_vm3, %v6074_v16 }
 0xf4d   :  { %5221 = vmatprep.mubr.msk.bf16.mxu0 %vm5752_vm0, %v5751_v1 }
0x100b   :  { %v6846_v16 = vpop.f32.mrb[72].mxu0 }
0x100c   :  { %v6848_v33 = vpop.f32.mrb[73].mxu0  ;;  %3604 = vrot.lane.b32.xlu1 %v6846_v16, %s5765_s24 }
0x100d   :  { %3602 = vrot.lane.b32.xlu0 %v6848_v33, %s5765_s24 }
0x100f   :  { %v3705_v62 = vpop.f32.mrb[76].mxu0 }
0x1010   :  { %3608 = vrot.lane.b32.xlu1 %v6846_v16, %s5758_s19  ;;  %v5187_v7 = vpop.f32.mrb[77].mxu0  ;;  %v3728_v26 = vmul.f32 %v3705_v62, %v3705_v62 }
0x1011   :  { %3606 = vrot.lane.b32.xlu0 %v6848_v33, %s5758_s19  ;;  %v3708_v37 = vpop.f32.mrb[78].mxu0  ;;  %s7071_s19 = sld [smem:[#allocation25_spill]] }
0x1012   :  { %v3801_v48 = vpack.c.bf16 %v3708_v37, %v3705_v62  ;;  %v5188_v15 = vpop.f32.mrb[79].mxu0  ;;  %v3729_v29 = vmul.f32 %v3708_v37, %v3708_v37 }
0x1014   :  { %3964 = vrot.lane.b32.xlu1 %v6846_v16, %s5757_s3 }
0x1015   :  { %3962 = vrot.lane.b32.xlu0 %v6848_v33, %s5757_s3 }
0x1017   :  { %v3713_v63 = vpop.f32.mrb[80].mxu0  ;;  %v3804_v30 = vld [vmem:[%s7071_s19] sm:$0xf] }
0x1018   :  { %v3730_v19 = vmul.f32 %v3713_v63, %v3713_v63  ;;  %v5191_v55 = vpop.f32.mrb[81].mxu0  ;;  %v3815_v31 = vsel %vm436_vm1, %v3804_v30, 0 }
0x1019   :  { %v3716_v43 = vpop.f32.mrb[82].mxu0 }
0x101a   :  { %v3732_v40 = vadd.f32 %v3730_v19, %v3728_v26  ;;  %v3731_v57 = vmul.f32 %v3716_v43, %v3716_v43  ;;  %v3802_v45 = vpack.c.bf16 %v3716_v43, %v3713_v63  ;;  %v5192_v2 = vpop.f32.mrb[83].mxu0  ;;  %v4735_v63 = vld [vmem:[%s7075_s4] ss:$0 sm:$0xff] }
0x101c   :  { %v3733_v27 = vadd.f32 %v3731_v57, %v3729_v29 }
0x101f   :  { %v3721_v51 = vpop.f32.mrb[84].mxu0 }
0x1020   :  { %v3734_v42 = vmul.f32 %v3721_v51, %v3721_v51  ;;  %v5195_v46 = vpop.f32.mrb[85].mxu0 }
0x1021   :  { %v3724_v34 = vpop.f32.mrb[86].mxu0 }
0x1022   :  { %v3736_v36 = vadd.f32 %v3734_v42, %v3732_v40  ;;  %v3735_v12 = vmul.f32 %v3724_v34, %v3724_v34  ;;  %v3803_v61 = vpack.c.bf16 %v3724_v34, %v3721_v51  ;;  %v5196_v0 = vpop.f32.mrb[87].mxu0 }
0x1024   :  { %5625 = vrsqrt.f32 %v3736_v36  ;;  %v3737_v49 = vadd.f32 %v3735_v12, %v3733_v27  ;;  %vm3740_vm11 = vcmp.eq.f32.partialorder %v3736_v36, inf  ;;  %v3743_v24 = vand.u32 2147483648, %v3736_v36 }
0x1025   :  { %vm3742_vm6 = vcmp.eq.f32.partialorder %v3736_v36, 0.0 }
0x1026   :  { %5627 = vrsqrt.f32 %v3737_v49  ;;  %vm3747_vm5 = vcmp.eq.f32.partialorder %v3737_v49, inf  ;;  %v3750_v22 = vand.u32 2147483648, %v3737_v49  ;;  %vm3749_vm7 = vcmp.eq.f32.partialorder %v3737_v49, 0.0 }
0x102e   :  { %v5626_v41 = vpop.eup %5625 }
0x102f   :  { %v3739_v39 = vmul.f32 %v5626_v41, %v3736_v36 }
0x1030   :  { %v5628_v54 = vpop.eup %5627 }
0x1031   :  { %v3741_v18 = vsel %vm3740_vm11, %v3736_v36, %v3739_v39  ;;  %v3746_v52 = vmul.f32 %v5628_v54, %v3737_v49 }
0x1032   :  { %v3744_v32 = vsel %vm3742_vm6, %v3743_v24, %v3741_v18 }
0x1033   :  { %v3748_v6 = vsel %vm3747_vm5, %v3737_v49, %v3746_v52 }
0x1034   :  { %v3751_v38 = vsel %vm3749_vm7, %v3750_v22, %v3748_v6 }
0x1035   :  { %v3752_v58 = vpack.c.bf16 %v3751_v38, %v3744_v32 }
0x1037   :  { %5200 = vmatmul.mubr.msk.bf16.vlgmr.msra.gmra.mrb[88].mxu1 %vm426_vm3, %v3752_v58 }
0x1038   :  { %5204 = vmatpush3.bf16.msra.mxu1 %v3815_v31  ;;  %5205 = vmatprep.mubr.msk.bf16.mxu1 %vm5752_vm0, %v5751_v1 }
0x1039   :  { %5253 = vmatprep.subr.bf16.mxu1 %v5751_v1 }
0x103f   :  { %5206 = vmatmul.mubr.msk.bf16.vlgmr.msra.gmra.mrb[92].mxu1 %vm426_vm3, %v3801_v48 }
0x1040   :  { %5209 = vmatprep.mubr.msk.bf16.mxu1 %vm5752_vm0, %v5751_v1 }
0x1047   :  { %5210 = vmatmul.mubr.msk.bf16.gmra.mrb[96].mxu1 %vm426_vm3, %v3802_v45 }
0x1048   :  { %5213 = vmatprep.mubr.msk.bf16.mxu1 %vm5752_vm0, %v5751_v1 }
0x104f   :  { %5214 = vmatmul.mubr.msk.bf16.gmra.mrb[100].mxu1 %vm426_vm3, %v3803_v61 }
0x1050   :  { %5255 = vmatprep.mubr.msk.bf16.mxu1 %vm5752_vm0, %v5751_v1 }
0x107e   :  { %v3605_v20 = vpop.permute.xlu1 %3604 }
0x107f   :  { %v3603_v3 = vpop.permute.xlu0 %3602  ;;  %3968 = vrot.lane.b32.xlu1 %v3605_v20, %s5757_s3 }
0x1080   :  { %3966 = vrot.lane.b32.xlu0 %v3603_v3, %s5757_s3 }
0x1082   :  { %v3609_v4 = vpop.permute.xlu1 %3608 }
0x1083   :  { %v3607_v53 = vpop.permute.xlu0 %3606  ;;  %3972 = vrot.lane.b32.xlu1 %v3609_v4, %s5757_s3  ;;  %v4196_v4 = vld [vmem:[%s7076_s28] sm:$0xf] }
0x1084   :  { %3970 = vrot.lane.b32.xlu0 %v3607_v53, %s5757_s3  ;;  %s7074_s3 = sld [smem:[#allocation29_spill]]  ;;  %v4207_v53 = vsel %vm436_vm1, %v4196_v4, 0  ;;  %v4355_v4 = vld [vmem:[%s7079_s7] sm:$0xf] }
0x1085   :  { %5254 = vmatpush3.bf16.msra.mxu1 %v4207_v53  ;;  %v4366_v53 = vsel %vm436_vm1, %v4355_v4, 0 }
0x1086   :  { %v3965_v46 = vpop.permute.xlu1 %3964  ;;  %5267 = vmatprep.subr.bf16.mxu1 %v5751_v1 }
0x1087   :  { %v3963_v34 = vpop.permute.xlu0 %3962 }
0x108a   :  { %v4050_v48 = vld [vmem:[%s7074_s3] sm:$0xf] }
0x108b   :  { %v4061_v15 = vsel %vm436_vm1, %v4050_v48, 0 }
0x10f1   :  { %v3969_v36 = vpop.permute.xlu1 %3968 }
0x10f2   :  { %v3967_v12 = vpop.permute.xlu0 %3966 }
0x10f5   :  { %v3973_v24 = vpop.permute.xlu1 %3972 }
0x10f6   :  { %v3971_v22 = vpop.permute.xlu0 %3970 }
0x110a   :  { %v3794_v35 = vpop.f32.mrb[88].mxu1 }
0x110b   :  { %v3960_v28 = vadd.f32 %v3794_v35, %v6848_v33  ;;  %v5201_v8 = vpop.f32.mrb[89].mxu1 }
0x110c   :  { %v3797_v17 = vpop.f32.mrb[90].mxu1 }
0x110d   :  { %v3874_v5 = vpack.c.bf16 %v3797_v17, %v3794_v35  ;;  %v3961_v9 = vadd.f32 %v6846_v16, %v3797_v17  ;;  %v5202_v56 = vpop.f32.mrb[91].mxu1  ;;  %v4150_v35 = vsel %vm436_vm1, %v4145_v21, 0  ;;  %v4751_v21 = vld [vmem:[%s7080_s10] ss:$0 sm:$0xff] }
0x110f   :  { %v3986_v14 = vpack.c.bf16 %v3961_v9, %v3960_v28  ;;  %5222 = vmatmul.mubr.msk.bf16.vlgmr.msra.gmra.mrb[88].mxu0 %vm377_vm2, %v3874_v5 }
0x1110   :  { %5226 = vmatpush3.bf16.msra.mxu0 %v5569_v50  ;;  %5229 = vmatprep.mubr.msk.bf16.mxu0 %vm5752_vm0, %v5751_v1 }
0x1111   :  { %5227 = vmatprep.subr.bf16.mxu0 %v5751_v1 }
0x1112   :  { %v3851_v25 = vpop.f32.mrb[92].mxu1 }
0x1113   :  { %v5207_v23 = vpop.f32.mrb[93].mxu1 }
0x1114   :  { %v3854_v47 = vpop.f32.mrb[94].mxu1  ;;  %5228 = vmatpush3.bf16.msra.mxu0 %v5570_v59 }
0x1115   :  { %v5208_v44 = vpop.f32.mrb[95].mxu1  ;;  %5233 = vmatprep.subr.bf16.mxu0 %v5751_v1 }
0x1117   :  { %5230 = vmatmul.mubr.msk.bf16.vlgmr.msra.gmra.mrb[92].mxu0 %vm377_vm2, %v3986_v14 }
0x1118   :  { %5235 = vmatprep.mubr.msk.bf16.mxu0 %vm5752_vm0, %v5751_v1  ;;  %5234 = vmatpush3.bf16.msra.mxu0 %v4061_v15 }
0x1119   :  { %5247 = vmatprep.subr.bf16.mxu0 %v5751_v1 }
0x111a   :  { %v3859_v11 = vpop.f32.mrb[96].mxu1 }
0x111b   :  { %v5211_v10 = vpop.f32.mrb[97].mxu1 }
0x111c   :  { %v3862_v13 = vpop.f32.mrb[98].mxu1 }
0x111d   :  { %v5212_v16 = vpop.f32.mrb[99].mxu1 }
0x1122   :  { %v3867_v33 = vpop.f32.mrb[100].mxu1 }
0x1123   :  { %v5215_v62 = vpop.f32.mrb[101].mxu1 }
0x1124   :  { %v3870_v7 = vpop.f32.mrb[102].mxu1 }
0x1125   :  { %v5216_v37 = vpop.f32.mrb[103].mxu1 }
0x11e2   :  { %v3935_v26 = vpop.f32.mrb[88].mxu0 }
0x11e3   :  { %v3936_v19 = vadd.f32 %v4735_v63, %v3935_v26  ;;  %v5223_v55 = vpop.f32.mrb[89].mxu0 }
0x11e4   :  { %v3938_v43 = vpop.f32.mrb[90].mxu0 }
0x11e5   :  { %v4739_v29 = vmul.f32 -1.442695, %v3936_v19  ;;  %v3939_v40 = vadd.f32 %v4735_v63, %v3938_v43  ;;  %v5224_v57 = vpop.f32.mrb[91].mxu0 }
0x11e7   :  { %5629 = vpow2.f32 %v4739_v29  ;;  %v4740_v45 = vmul.f32 -1.442695, %v3939_v40 }
0x11e9   :  { %5631 = vpow2.f32 %v4740_v45 }
0x11f1   :  { %v5630_v2 = vpop.eup %5629 }
0x11f2   :  { %v3948_v27 = vadd.f32 1.0, %v5630_v2 }
0x11f3   :  { %v5632_v51 = vpop.eup %5631 }
0x11f4   :  { %5633 = vrcp.f32 %v3948_v27  ;;  %v3949_v42 = vadd.f32 1.0, %v5632_v51 }
0x11f6   :  { %5635 = vrcp.f32 %v3949_v42 }
0x11fe   :  { %v5634_v61 = vpop.eup %5633 }
0x11ff   :  { %v3954_v0 = vmul.f32 %v5634_v61, %v3851_v25  ;;  %v3956_v49 = vmul.f32 %v5634_v61, %v3859_v11  ;;  %v3958_v41 = vmul.f32 %v5634_v61, %v3867_v33 }
0x1200   :  { %v5636_v39 = vpop.eup %5635 }
0x1201   :  { %v3955_v54 = vmul.f32 %v5636_v39, %v3854_v47  ;;  %v3957_v18 = vmul.f32 %v5636_v39, %v3862_v13  ;;  %v3959_v52 = vmul.f32 %v5636_v39, %v3870_v7  ;;  %v3980_v30 = vadd.f32 %v3963_v34, %v3954_v0  ;;  %v5572_v34 = vld [vmem:[%s7078_s2 + $0x8] sm:$0xff]  }
0x1202   :  { %v3982_v32 = vadd.f32 %v3967_v12, %v3956_v49  ;;  %v3984_v58 = vadd.f32 %v3971_v22, %v3958_v41 }
0x1203   :  { %v3981_v6 = vadd.f32 %v3965_v46, %v3955_v54  ;;  %v3983_v38 = vadd.f32 %v3969_v36, %v3957_v18  ;;  %v3985_v31 = vadd.f32 %v3973_v24, %v3959_v52  ;;  %v5571_v46 = vld [vmem:[%s7078_s2] sm:$0xff]  }
0x1205   :  { %v4047_v60 = vpack.c.bf16 %v3981_v6, %v3980_v30  ;;  %v4048_v20 = vpack.c.bf16 %v3983_v38, %v3982_v32  ;;  %v4049_v3 = vpack.c.bf16 %v3985_v31, %v3984_v58 }
0x1207   :  { %5236 = vmatmul.mubr.msk.bf16.vlgmr.msra.gmra.mrb[96].mxu0 %vm426_vm3, %v4047_v60 }
0x1208   :  { %5239 = vmatprep.mubr.msk.bf16.mxu0 %vm5752_vm0, %v5751_v1  ;;  %5248 = vmatpush3.bf16.msra.mxu0 %v4150_v35 }
0x1209   :  { %5275 = vmatprep.subr.bf16.mxu0 %v5751_v1 }
0x120f   :  { %5240 = vmatmul.mubr.msk.bf16.gmra.mrb[100].mxu0 %vm426_vm3, %v4048_v20 }
0x1210   :  { %5243 = vmatprep.mubr.msk.bf16.mxu0 %vm5752_vm0, %v5751_v1 }
0x1217   :  { %5244 = vmatmul.mubr.msk.bf16.gmra.mrb[104].mxu0 %vm426_vm3, %v4049_v3 }
0x1218   :  { %5249 = vmatprep.mubr.msk.bf16.mxu0 %vm5752_vm0, %v5751_v1 }
0x12da   :  { %v4097_v28 = vpop.f32.mrb[96].mxu0 }
0x12db   :  { %v5237_v8 = vpop.f32.mrb[97].mxu0  ;;  %v4120_v56 = vmul.f32 %v4097_v28, %v4097_v28 }
0x12dc   :  { %v4100_v17 = vpop.f32.mrb[98].mxu0 }
0x12dd   :  { %v4193_v50 = vpack.c.bf16 %v4100_v17, %v4097_v28  ;;  %v5238_v5 = vpop.f32.mrb[99].mxu0  ;;  %v4121_v23 = vmul.f32 %v4100_v17, %v4100_v17 }
0x12df   :  { %5256 = vmatmul.mubr.msk.bf16.vlgmr.msra.gmra.mrb[104].mxu1 %vm426_vm3, %v4193_v50 }
0x12e0   :  { %5259 = vmatprep.mubr.msk.bf16.mxu1 %vm5752_vm0, %v5751_v1  ;;  %5268 = vmatpush3.bf16.msra.mxu1 %v5571_v46 }
0x12e1   :  { %5269 = vmatprep.subr.bf16.mxu1 %v5751_v1 }
0x12e2   :  { %v4105_v9 = vpop.f32.mrb[100].mxu0 }
0x12e3   :  { %v4122_v14 = vmul.f32 %v4105_v9, %v4105_v9  ;;  %v5241_v59 = vpop.f32.mrb[101].mxu0 }
0x12e4   :  { %v4108_v25 = vpop.f32.mrb[102].mxu0  ;;  %5270 = vmatpush3.bf16.msra.mxu1 %v5572_v34 }
0x12e5   :  { %v4124_v47 = vadd.f32 %v4122_v14, %v4120_v56  ;;  %v4123_v44 = vmul.f32 %v4108_v25, %v4108_v25  ;;  %v4194_v11 = vpack.c.bf16 %v4108_v25, %v4105_v9  ;;  %v5242_v10 = vpop.f32.mrb[103].mxu0 }
0x12e7   :  { %v4125_v13 = vadd.f32 %v4123_v44, %v4121_v23  ;;  %5260 = vmatmul.mubr.msk.bf16.gmra.mrb[108].mxu1 %vm426_vm3, %v4194_v11 }
0x12e8   :  { %5263 = vmatprep.mubr.msk.bf16.mxu1 %vm5752_vm0, %v5751_v1 }
0x12ea   :  { %v4113_v16 = vpop.f32.mrb[104].mxu0 }
0x12eb   :  { %v4126_v33 = vmul.f32 %v4113_v16, %v4113_v16  ;;  %v5245_v62 = vpop.f32.mrb[105].mxu0 }
0x12ec   :  { %v4116_v7 = vpop.f32.mrb[106].mxu0 }
0x12ed   :  { %v4128_v37 = vadd.f32 %v4126_v33, %v4124_v47  ;;  %v4127_v48 = vmul.f32 %v4116_v7, %v4116_v7  ;;  %v4195_v15 = vpack.c.bf16 %v4116_v7, %v4113_v16  ;;  %v5246_v63 = vpop.f32.mrb[107].mxu0 }
0x12ef   :  { %5637 = vrsqrt.f32 %v4128_v37  ;;  %v4129_v26 = vadd.f32 %v4127_v48, %v4125_v13  ;;  %5264 = vmatmul.mubr.msk.bf16.gmra.mrb[112].mxu1 %vm426_vm3, %v4195_v15  ;;  %vm4132_vm8 = vcmp.eq.f32.partialorder %v4128_v37, inf  ;;  %v4135_v57 = vand.u32 2147483648, %v4128_v37 }
0x12f0   :  { %5271 = vmatprep.mubr.msk.bf16.mxu1 %vm5752_vm0, %v5751_v1  ;;  %vm4134_vm10 = vcmp.eq.f32.partialorder %v4128_v37, 0.0 }
0x12f1   :  { %5639 = vrsqrt.f32 %v4129_v26  ;;  %vm4139_vm9 = vcmp.eq.f32.partialorder %v4129_v26, inf  ;;  %v4142_v45 = vand.u32 2147483648, %v4129_v26  ;;  %vm4141_vm13 = vcmp.eq.f32.partialorder %v4129_v26, 0.0 }
0x12f9   :  { %v5638_v19 = vpop.eup %5637 }
0x12fa   :  { %v4131_v55 = vmul.f32 %v5638_v19, %v4128_v37 }
0x12fb   :  { %v5640_v43 = vpop.eup %5639 }
0x12fc   :  { %v4133_v29 = vsel %vm4132_vm8, %v4128_v37, %v4131_v55  ;;  %v4138_v40 = vmul.f32 %v5640_v43, %v4129_v26 }
0x12fd   :  { %v4136_v27 = vsel %vm4134_vm10, %v4135_v57, %v4133_v29 }
0x12fe   :  { %v4140_v2 = vsel %vm4139_vm9, %v4129_v26, %v4138_v40 }
0x12ff   :  { %v4143_v51 = vsel %vm4141_vm13, %v4142_v45, %v4140_v2 }
0x1300   :  { %v4144_v42 = vpack.c.bf16 %v4143_v51, %v4136_v27 }
0x1302   :  { %5250 = vmatmul.mubr.msk.bf16.vlgmr.msra.gmra.mrb[92].mxu0 %vm426_vm3, %v4144_v42 }
0x1303   :  { %5277 = vmatprep.mubr.msk.bf16.mxu0 %vm5752_vm0, %v5751_v1  ;;  %5276 = vmatpush3.bf16.msra.mxu0 %v4366_v53 }
0x13b2   :  { %v4243_v36 = vpop.f32.mrb[104].mxu1 }
0x13b3   :  { %v5257_v12 = vpop.f32.mrb[105].mxu1 }
0x13b4   :  { %v4246_v61 = vpop.f32.mrb[106].mxu1 }
0x13b5   :  { %v5258_v0 = vpop.f32.mrb[107].mxu1 }
0x13ba   :  { %v4251_v49 = vpop.f32.mrb[108].mxu1 }
0x13bb   :  { %v5261_v41 = vpop.f32.mrb[109].mxu1 }
0x13bc   :  { %v4254_v39 = vpop.f32.mrb[110].mxu1 }
0x13bd   :  { %v5262_v54 = vpop.f32.mrb[111].mxu1 }
0x13c2   :  { %v4259_v18 = vpop.f32.mrb[112].mxu1 }
0x13c3   :  { %v5265_v52 = vpop.f32.mrb[113].mxu1 }
0x13c4   :  { %v4262_v24 = vpop.f32.mrb[114].mxu1 }
0x13c5   :  { %v5266_v22 = vpop.f32.mrb[115].mxu1 }
0x13d5   :  { %v4186_v30 = vpop.f32.mrb[92].mxu0 }
0x13d6   :  { %vm4453_vm14 = vcmp.ge.f32.partialorder %v4186_v30, 0.0  ;;  %v4455_v6 = vmul.f32 0.01, %v4186_v30  ;;  %v5251_v32 = vpop.f32.mrb[93].mxu0 }
0x13d7   :  { %v4189_v38 = vpop.f32.mrb[94].mxu0 }
0x13d8   :  { %v4457_v58 = vsel %vm4453_vm14, %v4186_v30, %v4455_v6  ;;  %v4266_v31 = vpack.c.bf16 %v4189_v38, %v4186_v30  ;;  %vm4454_vm15 = vcmp.ge.f32.partialorder %v4189_v38, 0.0  ;;  %v4456_v60 = vmul.f32 0.01, %v4189_v38  ;;  %v5252_v20 = vpop.f32.mrb[95].mxu0 }
0x13d9   :  { %4459 = vst.msk [vmem:[#allocation7] sm:$0xff] %vm377_vm2, %v4457_v58 }
0x13da   :  { %v4458_v3 = vsel %vm4454_vm15, %v4189_v38, %v4456_v60  ;;  %5272 = vmatmul.mubr.msk.bf16.vlgmr.msra.gmra.mrb[116].mxu1 %vm377_vm2, %v4266_v31 }
0x13db   :  { %4460 = vst.msk [vmem:[#allocation7 + $0x8] sm:$0xff] %vm377_vm2, %v4458_v3 }
0x14ad   :  { %v4327_v35 = vpop.f32.mrb[116].mxu1 }
0x14ae   :  { %v4328_v28 = vadd.f32 %v4751_v21, %v4327_v35  ;;  %v5273_v8 = vpop.f32.mrb[117].mxu1 }
0x14af   :  { %v4330_v17 = vpop.f32.mrb[118].mxu1 }
0x14b0   :  { %v4755_v50 = vmul.f32 -1.442695, %v4328_v28  ;;  %v4331_v5 = vadd.f32 %v4751_v21, %v4330_v17  ;;  %v5274_v9 = vpop.f32.mrb[119].mxu1 }
0x14b2   :  { %5641 = vpow2.f32 %v4755_v50  ;;  %v4756_v56 = vmul.f32 -1.442695, %v4331_v5 }
0x14b4   :  { %5643 = vpow2.f32 %v4756_v56 }
0x14bc   :  { %v5642_v14 = vpop.eup %5641 }
0x14bd   :  { %v4340_v59 = vadd.f32 1.0, %v5642_v14 }
0x14be   :  { %v5644_v25 = vpop.eup %5643 }
0x14bf   :  { %5645 = vrcp.f32 %v4340_v59  ;;  %v4341_v23 = vadd.f32 1.0, %v5644_v25 }
0x14c1   :  { %5647 = vrcp.f32 %v4341_v23 }
0x14c9   :  { %v5646_v47 = vpop.eup %5645 }
0x14ca   :  { %v6935_v44 = vmul.f32 %v5646_v47, %v4243_v36  ;;  %v6937_v11 = vmul.f32 %v5646_v47, %v4251_v49  ;;  %v6939_v10 = vmul.f32 %v5646_v47, %v4259_v18 }
0x14cb   :  { %v5648_v13 = vpop.eup %5647 }
0x14cc   :  { %v6941_v16 = vmul.f32 %v5648_v13, %v4246_v61  ;;  %v6943_v33 = vmul.f32 %v5648_v13, %v4254_v39  ;;  %v6945_v62 = vmul.f32 %v5648_v13, %v4262_v24 }
0x14ce   :  { %v4352_v7 = vpack.c.bf16 %v6941_v16, %v6935_v44  ;;  %v4353_v37 = vpack.c.bf16 %v6943_v33, %v6937_v11  ;;  %v4354_v48 = vpack.c.bf16 %v6945_v62, %v6939_v10 }
0x14d0   :  { %5278 = vmatmul.mubr.msk.bf16.vlgmr.msra.gmra.mrb[108].mxu0 %vm426_vm3, %v4352_v7 }
0x14d1   :  { %5281 = vmatprep.mubr.msk.bf16.mxu0 %vm5752_vm0, %v5751_v1 }
0x14d8   :  { %5282 = vmatmul.mubr.msk.bf16.gmra.mrb[112].mxu0 %vm426_vm3, %v4353_v37 }
0x14d9   :  { %5285 = vmatprep.mubr.msk.bf16.mxu0 %vm5752_vm0, %v5751_v1 }
0x14e0   :  { %5286 = vmatmul.mubr.msk.bf16.gmra.mrb[116].mxu0 %vm426_vm3, %v4354_v48 }
0x14e1   :  { %5676 = shalt.err (!%p5673_p10)
}
0x14e2   :  { %s5677_s18 = scalar_lea.hbm %s6027_s14, 256 }
0x14e3   :  { %p5678_p11 = scmp.ne.s32.totalorder %s6027_s14, %s5677_s18  ;;  %p5681_p12 = scmp.lt.u32.totalorder %s5677_s18, %s6027_s14 }
0x14e5   :  { %p5683_p13 = pnand %p5681_p12, %p5678_p11 }
0x14e7   :  { %5686 = shalt.err (!%p5683_p13)
}
0x14e8   :  { %s5767_s22 = smov 128   ;;  %s5768_s23 = smov 8   ;;  %v4467_v35 = vmul.f32 0.2, %v6935_v44  ;;  %v4479_v28 = vmul.f32 0.2, %v6937_v11 }
0x14e9   :  { %4514 = dma.vmem_to_hbm [thread:$0]  %s4509_s15, 256, %s6027_s14, [#allocation5], %s5767_s22, %s5767_s22, %s5768_s23   ;;  %v4491_v8 = vmul.f32 0.2, %v6939_v10 }
0x15a3   :  { %v4402_v1 = vpop.f32.mrb[108].mxu0 }
0x15a4   :  { %v5279_v15 = vpop.f32.mrb[109].mxu0  ;;  %v4425_v55 = vmul.f32 %v4402_v1, %v6935_v44  ;;  %v4435_v43 = vmul.f32 %v4402_v1, %v4402_v1 }
0x15a5   :  { %v4405_v63 = vpop.f32.mrb[110].mxu0  ;;  %v4468_v15 = vmul.f32 0.2, %v6941_v16 }
0x15a6   :  { %v5280_v26 = vpop.f32.mrb[111].mxu0  ;;  %v4426_v45 = vmul.f32 %v4405_v63, %v6941_v16  ;;  %v4436_v2 = vmul.f32 %v4405_v63, %v4405_v63 }
0x15ab   :  { %v4410_v19 = vpop.f32.mrb[112].mxu0 }
0x15ac   :  { %v4427_v29 = vmul.f32 %v4410_v19, %v6937_v11  ;;  %v4437_v40 = vmul.f32 %v4410_v19, %v4410_v19  ;;  %v5283_v57 = vpop.f32.mrb[113].mxu0 }
0x15ad   :  { %v4413_v27 = vpop.f32.mrb[114].mxu0 }
0x15ae   :  { %v4429_v51 = vadd.f32 %v4427_v29, %v4425_v55  ;;  %v4439_v42 = vadd.f32 %v4437_v40, %v4435_v43  ;;  %v4428_v46 = vmul.f32 %v4413_v27, %v6943_v33  ;;  %v4438_v34 = vmul.f32 %v4413_v27, %v4413_v27  ;;  %v5284_v36 = vpop.f32.mrb[115].mxu0 }
0x15af   :  { %v4480_v55 = vmul.f32 0.2, %v6943_v33  ;;  %v4492_v40 = vmul.f32 0.2, %v6945_v62 }
0x15b0   :  { %v4430_v12 = vadd.f32 %v4428_v46, %v4426_v45  ;;  %v4440_v61 = vadd.f32 %v4438_v34, %v4436_v2 }
0x15b3   :  { %v4418_v0 = vpop.f32.mrb[116].mxu0 }
0x15b4   :  { %v4431_v49 = vmul.f32 %v4418_v0, %v6939_v10  ;;  %v4441_v41 = vmul.f32 %v4418_v0, %v4418_v0  ;;  %v5287_v39 = vpop.f32.mrb[117].mxu0 }
0x15b5   :  { %v4421_v54 = vpop.f32.mrb[118].mxu0 }
0x15b6   :  { %v4433_v18 = vadd.f32 %v4431_v49, %v4429_v51  ;;  %v4443_v52 = vadd.f32 %v4441_v41, %v4439_v42  ;;  %v4432_v24 = vmul.f32 %v4421_v54, %v6945_v62  ;;  %v4442_v22 = vmul.f32 %v4421_v54, %v4421_v54  ;;  %v5288_v30 = vpop.f32.mrb[119].mxu0 }
0x15b8   :  { %v4445_v6 = vadd.f32 1e-06, %v4443_v52  ;;  %v4434_v32 = vadd.f32 %v4432_v24, %v4430_v12  ;;  %v4444_v38 = vadd.f32 %v4442_v22, %v4440_v61  ;;  %vm4451_vm0 = vcmp.ge.f32.partialorder %v4433_v18, 0.0 }
0x15ba   :  { %5649 = vrcp.f32 %v4445_v6  ;;  %v4446_v58 = vadd.f32 1e-06, %v4444_v38  ;;  %vm4452_vm1 = vcmp.ge.f32.partialorder %v4434_v32, 0.0 }
0x15bc   :  { %5651 = vrcp.f32 %v4446_v58 }
0x15c4   :  { %v5650_v31 = vpop.eup %5649 }
0x15c5   :  { %v4448_v60 = vmul.f32 %v5650_v31, %v4433_v18 }
0x15c6   :  { %v5652_v20 = vpop.eup %5651 }
0x15c7   :  { %v4461_v3 = vmul.f32 %v4448_v60, %v4402_v1  ;;  %v4473_v4 = vmul.f32 %v4448_v60, %v4410_v19  ;;  %v4485_v53 = vmul.f32 %v4448_v60, %v4418_v0  ;;  %v4450_v21 = vmul.f32 %v5652_v20, %v4434_v32 }
0x15c9   :  { %v4463_v17 = vsub.f32 %v6935_v44, %v4461_v3  ;;  %v4475_v50 = vsub.f32 %v6937_v11, %v4473_v4  ;;  %v4487_v5 = vsub.f32 %v6939_v10, %v4485_v53  ;;  %v4462_v9 = vmul.f32 %v4450_v21, %v4405_v63 }
0x15ca   :  { %v4474_v56 = vmul.f32 %v4450_v21, %v4413_v27  ;;  %v4486_v14 = vmul.f32 %v4450_v21, %v4421_v54 }
0x15cb   :  { %v4465_v59 = vsel %vm4451_vm0, %v6935_v44, %v4463_v17  ;;  %v4477_v25 = vsel %vm4451_vm0, %v6937_v11, %v4475_v50  ;;  %v4489_v23 = vsel %vm4451_vm0, %v6939_v10, %v4487_v5  ;;  %v4464_v47 = vsub.f32 %v6941_v16, %v4462_v9 }
0x15cc   :  { %v4469_v13 = vmul.f32 0.8, %v4465_v59  ;;  %v4481_v7 = vmul.f32 0.8, %v4477_v25  ;;  %v4493_v37 = vmul.f32 0.8, %v4489_v23  ;;  %v4476_v48 = vsub.f32 %v6943_v33, %v4474_v56 }
0x15cd   :  { %v4466_v1 = vsel %vm4452_vm1, %v6941_v16, %v4464_v47  ;;  %v4488_v44 = vsub.f32 %v6945_v62, %v4486_v14 }
0x15ce   :  { %v4471_v11 = vadd.f32 %v4469_v13, %v4467_v35  ;;  %v4483_v10 = vadd.f32 %v4481_v7, %v4479_v28  ;;  %v4495_v63 = vadd.f32 %v4493_v37, %v4491_v8  ;;  %v4470_v26 = vmul.f32 0.8, %v4466_v1 }
0x15cf   :  { %v4478_v19 = vsel %vm4452_vm1, %v6943_v33, %v4476_v48  ;;  %v4490_v43 = vsel %vm4452_vm1, %v6945_v62, %v4488_v44 }
0x15d0   :  { %4497 = vst.msk [vmem:[%s6032_s12] sm:$0xff] %vm426_vm3, %v4471_v11  ;;  %4499 = vst.msk [vmem:[%s6032_s12 + $0x10] sm:$0xff] %vm426_vm3, %v4483_v10  ;;  %v4472_v16 = vadd.f32 %v4470_v26, %v4468_v15  ;;  %v4482_v29 = vmul.f32 0.8, %v4478_v19  ;;  %v4494_v57 = vmul.f32 0.8, %v4490_v43 }
0x15d1   :  { %4501 = vst.msk [vmem:[%s6032_s12 + $0x20] sm:$0xff] %vm426_vm3, %v4495_v63 }
0x15d2   :  { %v4484_v45 = vadd.f32 %v4482_v29, %v4480_v55  ;;  %v4496_v2 = vadd.f32 %v4494_v57, %v4492_v40  ;;  %4498 = vst.msk [vmem:[%s6032_s12 + $0x8] sm:$0xff] %vm426_vm3, %v4472_v16 }
0x15d4   :  { %4500 = vst.msk [vmem:[%s6032_s12 + $0x18] sm:$0xff] %vm426_vm3, %v4484_v45  ;;  %4502 = vst.msk [vmem:[%s6032_s12 + $0x28] sm:$0xff] %vm426_vm3, %v4496_v2 }
0x15d5   :  { %5693 = dma.done.wait [#allocation5], 256  }
0x15d6   :  { %5694 = vsyncadd [#allocation5], 4294967040 }
0x15d7   :  { %4522 = vsyncpa [#allocation5], 1 }
0x15d8   :  { %4523 = vsyncpa [#allocation6], 1 }

</bundles_post_ra>
